<compile_context>
chip_gen: v7x
topology: tpu7x:2x2x1
jax: 0.10.0
libtpu: 0.0.40
codegen_flags: <defaults>
</compile_context>

<pallas_src>
import jax
import jax.numpy as jnp
import numpy as np
from jax import lax
from jax.experimental import pallas as pl
from jax.experimental.pallas import tpu as pltpu


# ------------------------- constant gather matrices -------------------------
# G[t] @ act_rows selects, for tap t = kh*3 + kw, the input row feeding each
# output position of a 3x3 / stride-2 / pad-1 conv (zero rows where padding).
def make_gather_matrices(hin, win, oh, ow):
    g = np.zeros((9, oh * ow, hin * win), np.float32)
    for kh in range(3):
        for kw in range(3):
            t = kh * 3 + kw
            for i in range(oh):
                for j in range(ow):
                    h = 2 * i + kh - 1
                    w = 2 * j + kw - 1
                    if 0 <= h < hin and 0 <= w < win:
                        g[t, i * ow + j, h * win + w] = 1.0
    return jnp.asarray(g)


# ------------------------------ fused kernel --------------------------------
def _net_kernel(p1_ref, g2_ref, g3_ref, w1_ref, b1_ref, w2_ref, b2_ref,
                w3_ref, b3_ref, wf1_ref, bf1_ref, wf2_ref, bf2_ref, o_ref):
    f32 = jnp.float32

    def dot(a, b):
        return jnp.dot(a, b, preferred_element_type=f32)

    # conv1 (3x3, s2, p1) + ReLU: one im2col matmul, patches built by wrapper.
    a1 = jnp.maximum(dot(p1_ref[0], w1_ref[...]) + b1_ref[...], 0.0)   # (196, 32)

    # conv2 + ReLU: 9 taps, each = (0/1 gather matmul) @ per-tap weight.
    acc2 = jnp.zeros((49, 64), f32)
    for t in range(9):
        acc2 = acc2 + dot(dot(g2_ref[t], a1), w2_ref[t])               # (49, 64)
    a2 = jnp.maximum(acc2 + b2_ref[...], 0.0)

    # conv3 + ReLU.
    acc3 = jnp.zeros((16, 128), f32)
    for t in range(9):
        acc3 = acc3 + dot(dot(g3_ref[t], a2), w3_ref[t])               # (16, 128)
    a3 = jnp.maximum(acc3 + b3_ref[...], 0.0)

    # flatten (spatial-major, channel-minor; fc1 weight pre-permuted) + fc1 + ReLU.
    h = bf1_ref[...]                                                   # (1, 128)
    for s in range(16):
        h = h + dot(a3[s:s + 1, :], wf1_ref[s])
    h = jnp.maximum(h, 0.0)

    # fc2 (lane-padded to 128 classes) + numerically stable log_softmax.
    z = dot(h, wf2_ref[...]) + bf2_ref[...]                            # (1, 128)
    z_max = jnp.max(z, axis=-1, keepdims=True)
    lse = jnp.log(jnp.sum(jnp.exp(z - z_max), axis=-1, keepdims=True)) + z_max
    o_ref[0] = z - lse


# --------------------------- one-time param prep -----------------------------
def prepare_params(p):
    def conv_taps(w):                      # (Cout, Cin, 3, 3) -> (9, Cin, Cout)
        co, ci, kh, kw = w.shape
        return jnp.transpose(w, (2, 3, 1, 0)).reshape(kh * kw, ci, co)

    # fc1: torch flatten order is (C, H, W); permute its input dim once so the
    # kernel can consume conv3 output in (spatial, channel) order directly.
    wf1r = jnp.transpose(p["wf1"].reshape(128, 128, 16), (2, 1, 0))    # (16,128,128)
    wf2m = jnp.zeros((128, 128), jnp.float32).at[:, :10].set(p["wf2"].T)
    bf2p = jnp.full((1, 128), -1e30, jnp.float32).at[0, :10].set(p["bf2"])
    return {
        "g2": make_gather_matrices(14, 14, 7, 7),      # (9, 49, 196)
        "g3": make_gather_matrices(7, 7, 4, 4),        # (9, 16, 49)
        "w1": conv_taps(p["w1"]).reshape(9, 32), "b1": p["b1"].reshape(1, 32),
        "w2": conv_taps(p["w2"]),                "b2": p["b2"].reshape(1, 64),
        "w3": conv_taps(p["w3"]),                "b3": p["b3"].reshape(1, 128),
        "wf1": wf1r,                             "bf1": p["bf1"].reshape(1, 128),
        "wf2": wf2m,                             "bf2": bf2p,
    }


# ------------------------------- wrapper -------------------------------------
def conv1_patches(x_nchw):                 # (B,1,28,28) -> (B, 196, 9), Cin = 1
    x = x_nchw[:, 0]
    xp = jnp.pad(x, ((0, 0), (1, 1), (1, 1)))
    cols = []
    for kh in range(3):
        for kw in range(3):
            cols.append(xp[:, kh:kh + 28:2, kw:kw + 28:2])             # (B,14,14)
    return jnp.stack(cols, axis=-1).reshape(x.shape[0], 196, 9)


def net_forward(x_nchw, prep):
    B = x_nchw.shape[0]
    patches = conv1_patches(x_nchw)                                    # (B,196,9)

    def resident(a):                       # full array, VMEM-resident across grid
        nd = a.ndim
        return pl.BlockSpec(a.shape, lambda b: (0,) * nd)

    ws = [prep["g2"], prep["g3"], prep["w1"], prep["b1"], prep["w2"], prep["b2"],
          prep["w3"], prep["b3"], prep["wf1"], prep["bf1"], prep["wf2"], prep["bf2"]]
    in_specs = [pl.BlockSpec((1, 196, 9), lambda b: (b, 0, 0))] + [resident(w) for w in ws]

    param_bytes = sum(int(np.prod(w.shape)) * 4 for w in ws)
    out = pl.pallas_call(
        _net_kernel,
        out_shape=jax.ShapeDtypeStruct((B, 1, 128), jnp.float32),
        grid=(B,),
        in_specs=in_specs,
        out_specs=pl.BlockSpec((1, 1, 128), lambda b: (b, 0, 0)),
        compiler_params=pltpu.CompilerParams(dimension_semantics=("parallel",)),
        cost_estimate=pl.CostEstimate(
            flops=11_300_000 * B,
            transcendentals=129 * B,
            bytes_accessed=param_bytes + patches.size * 4 + B * 128 * 4),
    )(patches, *ws)
    return out[:, 0, :10]


# --------------------------- deterministic params ----------------------------
def init_params(key):
    def u(k, shape, fan_in):
        bound = 1.0 / np.sqrt(fan_in)
        return jax.random.uniform(k, shape, jnp.float32, -bound, bound)
    ks = jax.random.split(key, 10)
    return {
        "w1": u(ks[0], (32, 1, 3, 3), 1 * 9),    "b1": u(ks[1], (32,), 1 * 9),
        "w2": u(ks[2], (64, 32, 3, 3), 32 * 9),  "b2": u(ks[3], (64,), 32 * 9),
        "w3": u(ks[4], (128, 64, 3, 3), 64 * 9), "b3": u(ks[5], (128,), 64 * 9),
        "wf1": u(ks[6], (128, 2048), 2048),      "bf1": u(ks[7], (128,), 2048),
        "wf2": u(ks[8], (10, 128), 128),         "bf2": u(ks[9], (10,), 128),
    }


# ------------------------------ pure-JAX ref ----------------------------------
def net_forward_reference(x, p):
    def conv(x, w, b):
        y = lax.conv_general_dilated(x, w, (2, 2), [(1, 1), (1, 1)],
                                     dimension_numbers=("NCHW", "OIHW", "NCHW"))
        return jax.nn.relu(y + b[None, :, None, None])
    x = conv(x, p["w1"], p["b1"])
    x = conv(x, p["w2"], p["b2"])
    x = conv(x, p["w3"], p["b3"])
    x = x.reshape(x.shape[0], -1)
    x = jax.nn.relu(x @ p["wf1"].T + p["bf1"])
    x = x @ p["wf2"].T + p["bf2"]
    return jax.nn.log_softmax(x, axis=1)


if __name__ == "__main__":
    key = jax.random.PRNGKey(0)
    kx, kp = jax.random.split(key)
    x = jax.random.normal(kx, (2, 1, 28, 28), jnp.float32)   # MNIST-shaped input
    params = init_params(kp)
    prep = prepare_params(params)                            # one-time weight prep

    fwd = jax.jit(net_forward)
    out = jax.block_until_ready(fwd(x, prep))
    ref = jax.block_until_ready(net_forward_reference(x, params))

    assert out.shape == (2, 10) and out.dtype == jnp.float32
    np.testing.assert_allclose(np.asarray(out), np.asarray(ref), rtol=2e-3, atol=2e-3)
    print("KERNEL_OK")
</pallas_src>

<mosaic_0001>
module attributes {stable_mosaic.version = 11 : i64} {
  func.func @_net_kernel(%arg0: i32, %arg1: memref<1x196x9xf32, #tpu.memory_space<vmem>>, %arg2: memref<9x49x196xf32, #tpu.memory_space<vmem>>, %arg3: memref<9x16x49xf32, #tpu.memory_space<vmem>>, %arg4: memref<9x32xf32, #tpu.memory_space<vmem>>, %arg5: memref<1x32xf32, #tpu.memory_space<vmem>>, %arg6: memref<9x32x64xf32, #tpu.memory_space<vmem>>, %arg7: memref<1x64xf32, #tpu.memory_space<vmem>>, %arg8: memref<9x64x128xf32, #tpu.memory_space<vmem>>, %arg9: memref<1x128xf32, #tpu.memory_space<vmem>>, %arg10: memref<16x128x128xf32, #tpu.memory_space<vmem>>, %arg11: memref<1x128xf32, #tpu.memory_space<vmem>>, %arg12: memref<128x128xf32, #tpu.memory_space<vmem>>, %arg13: memref<1x128xf32, #tpu.memory_space<vmem>>, %arg14: memref<1x1x128xf32, #tpu.memory_space<vmem>>) attributes {dimension_semantics = [#tpu.dimension_semantics<parallel>], iteration_bounds = array<i64: 2>, scalar_prefetch = 0 : i64, scratch_operands = 0 : i64, tpu.core_type = #tpu.core_type<tc>, window_params = [{transform_indices = @transform_0, window_bounds = array<i64: 1, 196, 9>}, {pipeline_mode = #tpu.pipeline_mode<synchronous>, transform_indices = @transform_1, window_bounds = array<i64: 9, 49, 196>}, {pipeline_mode = #tpu.pipeline_mode<synchronous>, transform_indices = @transform_2, window_bounds = array<i64: 9, 16, 49>}, {pipeline_mode = #tpu.pipeline_mode<synchronous>, transform_indices = @transform_3, window_bounds = array<i64: 9, 32>}, {pipeline_mode = #tpu.pipeline_mode<synchronous>, transform_indices = @transform_4, window_bounds = array<i64: 1, 32>}, {pipeline_mode = #tpu.pipeline_mode<synchronous>, transform_indices = @transform_5, window_bounds = array<i64: 9, 32, 64>}, {pipeline_mode = #tpu.pipeline_mode<synchronous>, transform_indices = @transform_6, window_bounds = array<i64: 1, 64>}, {pipeline_mode = #tpu.pipeline_mode<synchronous>, transform_indices = @transform_7, window_bounds = array<i64: 9, 64, 128>}, {pipeline_mode = #tpu.pipeline_mode<synchronous>, transform_indices = @transform_8, window_bounds = array<i64: 1, 128>}, {pipeline_mode = #tpu.pipeline_mode<synchronous>, transform_indices = @transform_9, window_bounds = array<i64: 16, 128, 128>}, {pipeline_mode = #tpu.pipeline_mode<synchronous>, transform_indices = @transform_10, window_bounds = array<i64: 1, 128>}, {pipeline_mode = #tpu.pipeline_mode<synchronous>, transform_indices = @transform_11, window_bounds = array<i64: 128, 128>}, {pipeline_mode = #tpu.pipeline_mode<synchronous>, transform_indices = @transform_12, window_bounds = array<i64: 1, 128>}, {transform_indices = @transform_13, window_bounds = array<i64: 1, 1, 128>}]} {
    %c0 = arith.constant 0 : index
    %c0_0 = arith.constant 0 : index
    %c0_1 = arith.constant 0 : index
    %0 = vector.load %arg1[%c0, %c0_0, %c0_1] : memref<1x196x9xf32, #tpu.memory_space<vmem>>, vector<1x196x9xf32>
    %1 = vector.shape_cast %0 : vector<1x196x9xf32> to vector<196x9xf32>
    %c0_2 = arith.constant 0 : index
    %c0_3 = arith.constant 0 : index
    %2 = vector.load %arg4[%c0_2, %c0_3] : memref<9x32xf32, #tpu.memory_space<vmem>>, vector<9x32xf32>
    %cst = arith.constant dense<0.000000e+00> : vector<196x32xf32>
    %3 = tpu.matmul %1, %2, %cst {dimension_numbers = #tpu.dot_dimension_numbers<[1], [0], [0], [1], [0, 0, 1, 1], [], []>} : vector<196x9xf32>, vector<9x32xf32>, vector<196x32xf32> -> vector<196x32xf32>
    %c0_4 = arith.constant 0 : index
    %c0_5 = arith.constant 0 : index
    %4 = vector.load %arg5[%c0_4, %c0_5] : memref<1x32xf32, #tpu.memory_space<vmem>>, vector<1x32xf32>
    %5 = vector.broadcast %4 : vector<1x32xf32> to vector<196x32xf32>
    %6 = arith.addf %3, %5 : vector<196x32xf32>
    %cst_6 = arith.constant 0.000000e+00 : f32
    %7 = vector.broadcast %cst_6 : f32 to vector<196x32xf32>
    %8 = arith.maximumf %6, %7 : vector<196x32xf32>
    %cst_7 = arith.constant 0.000000e+00 : f32
    %9 = vector.broadcast %cst_7 : f32 to vector<49x64xf32>
    %c0_8 = arith.constant 0 : index
    %c0_9 = arith.constant 0 : index
    %c0_10 = arith.constant 0 : index
    %10 = vector.load %arg2[%c0_8, %c0_9, %c0_10] : memref<9x49x196xf32, #tpu.memory_space<vmem>>, vector<1x49x196xf32>
    %11 = vector.shape_cast %10 : vector<1x49x196xf32> to vector<49x196xf32>
    %cst_11 = arith.constant dense<0.000000e+00> : vector<49x32xf32>
    %12 = tpu.matmul %11, %8, %cst_11 {dimension_numbers = #tpu.dot_dimension_numbers<[1], [0], [0], [1], [0, 0, 1, 1], [], []>} : vector<49x196xf32>, vector<196x32xf32>, vector<49x32xf32> -> vector<49x32xf32>
    %c0_12 = arith.constant 0 : index
    %c0_13 = arith.constant 0 : index
    %c0_14 = arith.constant 0 : index
    %13 = vector.load %arg6[%c0_12, %c0_13, %c0_14] : memref<9x32x64xf32, #tpu.memory_space<vmem>>, vector<1x32x64xf32>
    %14 = vector.shape_cast %13 : vector<1x32x64xf32> to vector<32x64xf32>
    %cst_15 = arith.constant dense<0.000000e+00> : vector<49x64xf32>
    %15 = tpu.matmul %12, %14, %cst_15 {dimension_numbers = #tpu.dot_dimension_numbers<[1], [0], [0], [1], [0, 0, 1, 1], [], []>} : vector<49x32xf32>, vector<32x64xf32>, vector<49x64xf32> -> vector<49x64xf32>
    %16 = arith.addf %9, %15 : vector<49x64xf32>
    %c1 = arith.constant 1 : index
    %c0_16 = arith.constant 0 : index
    %c0_17 = arith.constant 0 : index
    %17 = vector.load %arg2[%c1, %c0_16, %c0_17] : memref<9x49x196xf32, #tpu.memory_space<vmem>>, vector<1x49x196xf32>
    %18 = vector.shape_cast %17 : vector<1x49x196xf32> to vector<49x196xf32>
    %cst_18 = arith.constant dense<0.000000e+00> : vector<49x32xf32>
    %19 = tpu.matmul %18, %8, %cst_18 {dimension_numbers = #tpu.dot_dimension_numbers<[1], [0], [0], [1], [0, 0, 1, 1], [], []>} : vector<49x196xf32>, vector<196x32xf32>, vector<49x32xf32> -> vector<49x32xf32>
    %c1_19 = arith.constant 1 : index
    %c0_20 = arith.constant 0 : index
    %c0_21 = arith.constant 0 : index
    %20 = vector.load %arg6[%c1_19, %c0_20, %c0_21] : memref<9x32x64xf32, #tpu.memory_space<vmem>>, vector<1x32x64xf32>
    %21 = vector.shape_cast %20 : vector<1x32x64xf32> to vector<32x64xf32>
    %cst_22 = arith.constant dense<0.000000e+00> : vector<49x64xf32>
    %22 = tpu.matmul %19, %21, %cst_22 {dimension_numbers = #tpu.dot_dimension_numbers<[1], [0], [0], [1], [0, 0, 1, 1], [], []>} : vector<49x32xf32>, vector<32x64xf32>, vector<49x64xf32> -> vector<49x64xf32>
    %23 = arith.addf %16, %22 : vector<49x64xf32>
    %c2 = arith.constant 2 : index
    %c0_23 = arith.constant 0 : index
    %c0_24 = arith.constant 0 : index
    %24 = vector.load %arg2[%c2, %c0_23, %c0_24] : memref<9x49x196xf32, #tpu.memory_space<vmem>>, vector<1x49x196xf32>
    %25 = vector.shape_cast %24 : vector<1x49x196xf32> to vector<49x196xf32>
    %cst_25 = arith.constant dense<0.000000e+00> : vector<49x32xf32>
    %26 = tpu.matmul %25, %8, %cst_25 {dimension_numbers = #tpu.dot_dimension_numbers<[1], [0], [0], [1], [0, 0, 1, 1], [], []>} : vector<49x196xf32>, vector<196x32xf32>, vector<49x32xf32> -> vector<49x32xf32>
    %c2_26 = arith.constant 2 : index
    %c0_27 = arith.constant 0 : index
    %c0_28 = arith.constant 0 : index
    %27 = vector.load %arg6[%c2_26, %c0_27, %c0_28] : memref<9x32x64xf32, #tpu.memory_space<vmem>>, vector<1x32x64xf32>
    %28 = vector.shape_cast %27 : vector<1x32x64xf32> to vector<32x64xf32>
    %cst_29 = arith.constant dense<0.000000e+00> : vector<49x64xf32>
    %29 = tpu.matmul %26, %28, %cst_29 {dimension_numbers = #tpu.dot_dimension_numbers<[1], [0], [0], [1], [0, 0, 1, 1], [], []>} : vector<49x32xf32>, vector<32x64xf32>, vector<49x64xf32> -> vector<49x64xf32>
    %30 = arith.addf %23, %29 : vector<49x64xf32>
    %c3 = arith.constant 3 : index
    %c0_30 = arith.constant 0 : index
    %c0_31 = arith.constant 0 : index
    %31 = vector.load %arg2[%c3, %c0_30, %c0_31] : memref<9x49x196xf32, #tpu.memory_space<vmem>>, vector<1x49x196xf32>
    %32 = vector.shape_cast %31 : vector<1x49x196xf32> to vector<49x196xf32>
    %cst_32 = arith.constant dense<0.000000e+00> : vector<49x32xf32>
    %33 = tpu.matmul %32, %8, %cst_32 {dimension_numbers = #tpu.dot_dimension_numbers<[1], [0], [0], [1], [0, 0, 1, 1], [], []>} : vector<49x196xf32>, vector<196x32xf32>, vector<49x32xf32> -> vector<49x32xf32>
    %c3_33 = arith.constant 3 : index
    %c0_34 = arith.constant 0 : index
    %c0_35 = arith.constant 0 : index
    %34 = vector.load %arg6[%c3_33, %c0_34, %c0_35] : memref<9x32x64xf32, #tpu.memory_space<vmem>>, vector<1x32x64xf32>
    %35 = vector.shape_cast %34 : vector<1x32x64xf32> to vector<32x64xf32>
    %cst_36 = arith.constant dense<0.000000e+00> : vector<49x64xf32>
    %36 = tpu.matmul %33, %35, %cst_36 {dimension_numbers = #tpu.dot_dimension_numbers<[1], [0], [0], [1], [0, 0, 1, 1], [], []>} : vector<49x32xf32>, vector<32x64xf32>, vector<49x64xf32> -> vector<49x64xf32>
    %37 = arith.addf %30, %36 : vector<49x64xf32>
    %c4 = arith.constant 4 : index
    %c0_37 = arith.constant 0 : index
    %c0_38 = arith.constant 0 : index
    %38 = vector.load %arg2[%c4, %c0_37, %c0_38] : memref<9x49x196xf32, #tpu.memory_space<vmem>>, vector<1x49x196xf32>
    %39 = vector.shape_cast %38 : vector<1x49x196xf32> to vector<49x196xf32>
    %cst_39 = arith.constant dense<0.000000e+00> : vector<49x32xf32>
    %40 = tpu.matmul %39, %8, %cst_39 {dimension_numbers = #tpu.dot_dimension_numbers<[1], [0], [0], [1], [0, 0, 1, 1], [], []>} : vector<49x196xf32>, vector<196x32xf32>, vector<49x32xf32> -> vector<49x32xf32>
    %c4_40 = arith.constant 4 : index
    %c0_41 = arith.constant 0 : index
    %c0_42 = arith.constant 0 : index
    %41 = vector.load %arg6[%c4_40, %c0_41, %c0_42] : memref<9x32x64xf32, #tpu.memory_space<vmem>>, vector<1x32x64xf32>
    %42 = vector.shape_cast %41 : vector<1x32x64xf32> to vector<32x64xf32>
    %cst_43 = arith.constant dense<0.000000e+00> : vector<49x64xf32>
    %43 = tpu.matmul %40, %42, %cst_43 {dimension_numbers = #tpu.dot_dimension_numbers<[1], [0], [0], [1], [0, 0, 1, 1], [], []>} : vector<49x32xf32>, vector<32x64xf32>, vector<49x64xf32> -> vector<49x64xf32>
    %44 = arith.addf %37, %43 : vector<49x64xf32>
    %c5 = arith.constant 5 : index
    %c0_44 = arith.constant 0 : index
    %c0_45 = arith.constant 0 : index
    %45 = vector.load %arg2[%c5, %c0_44, %c0_45] : memref<9x49x196xf32, #tpu.memory_space<vmem>>, vector<1x49x196xf32>
    %46 = vector.shape_cast %45 : vector<1x49x196xf32> to vector<49x196xf32>
    %cst_46 = arith.constant dense<0.000000e+00> : vector<49x32xf32>
    %47 = tpu.matmul %46, %8, %cst_46 {dimension_numbers = #tpu.dot_dimension_numbers<[1], [0], [0], [1], [0, 0, 1, 1], [], []>} : vector<49x196xf32>, vector<196x32xf32>, vector<49x32xf32> -> vector<49x32xf32>
    %c5_47 = arith.constant 5 : index
    %c0_48 = arith.constant 0 : index
    %c0_49 = arith.constant 0 : index
    %48 = vector.load %arg6[%c5_47, %c0_48, %c0_49] : memref<9x32x64xf32, #tpu.memory_space<vmem>>, vector<1x32x64xf32>
    %49 = vector.shape_cast %48 : vector<1x32x64xf32> to vector<32x64xf32>
    %cst_50 = arith.constant dense<0.000000e+00> : vector<49x64xf32>
    %50 = tpu.matmul %47, %49, %cst_50 {dimension_numbers = #tpu.dot_dimension_numbers<[1], [0], [0], [1], [0, 0, 1, 1], [], []>} : vector<49x32xf32>, vector<32x64xf32>, vector<49x64xf32> -> vector<49x64xf32>
    %51 = arith.addf %44, %50 : vector<49x64xf32>
    %c6 = arith.constant 6 : index
    %c0_51 = arith.constant 0 : index
    %c0_52 = arith.constant 0 : index
    %52 = vector.load %arg2[%c6, %c0_51, %c0_52] : memref<9x49x196xf32, #tpu.memory_space<vmem>>, vector<1x49x196xf32>
    %53 = vector.shape_cast %52 : vector<1x49x196xf32> to vector<49x196xf32>
    %cst_53 = arith.constant dense<0.000000e+00> : vector<49x32xf32>
    %54 = tpu.matmul %53, %8, %cst_53 {dimension_numbers = #tpu.dot_dimension_numbers<[1], [0], [0], [1], [0, 0, 1, 1], [], []>} : vector<49x196xf32>, vector<196x32xf32>, vector<49x32xf32> -> vector<49x32xf32>
    %c6_54 = arith.constant 6 : index
    %c0_55 = arith.constant 0 : index
    %c0_56 = arith.constant 0 : index
    %55 = vector.load %arg6[%c6_54, %c0_55, %c0_56] : memref<9x32x64xf32, #tpu.memory_space<vmem>>, vector<1x32x64xf32>
    %56 = vector.shape_cast %55 : vector<1x32x64xf32> to vector<32x64xf32>
    %cst_57 = arith.constant dense<0.000000e+00> : vector<49x64xf32>
    %57 = tpu.matmul %54, %56, %cst_57 {dimension_numbers = #tpu.dot_dimension_numbers<[1], [0], [0], [1], [0, 0, 1, 1], [], []>} : vector<49x32xf32>, vector<32x64xf32>, vector<49x64xf32> -> vector<49x64xf32>
    %58 = arith.addf %51, %57 : vector<49x64xf32>
    %c7 = arith.constant 7 : index
    %c0_58 = arith.constant 0 : index
    %c0_59 = arith.constant 0 : index
    %59 = vector.load %arg2[%c7, %c0_58, %c0_59] : memref<9x49x196xf32, #tpu.memory_space<vmem>>, vector<1x49x196xf32>
    %60 = vector.shape_cast %59 : vector<1x49x196xf32> to vector<49x196xf32>
    %cst_60 = arith.constant dense<0.000000e+00> : vector<49x32xf32>
    %61 = tpu.matmul %60, %8, %cst_60 {dimension_numbers = #tpu.dot_dimension_numbers<[1], [0], [0], [1], [0, 0, 1, 1], [], []>} : vector<49x196xf32>, vector<196x32xf32>, vector<49x32xf32> -> vector<49x32xf32>
    %c7_61 = arith.constant 7 : index
    %c0_62 = arith.constant 0 : index
    %c0_63 = arith.constant 0 : index
    %62 = vector.load %arg6[%c7_61, %c0_62, %c0_63] : memref<9x32x64xf32, #tpu.memory_space<vmem>>, vector<1x32x64xf32>
    %63 = vector.shape_cast %62 : vector<1x32x64xf32> to vector<32x64xf32>
    %cst_64 = arith.constant dense<0.000000e+00> : vector<49x64xf32>
    %64 = tpu.matmul %61, %63, %cst_64 {dimension_numbers = #tpu.dot_dimension_numbers<[1], [0], [0], [1], [0, 0, 1, 1], [], []>} : vector<49x32xf32>, vector<32x64xf32>, vector<49x64xf32> -> vector<49x64xf32>
    %65 = arith.addf %58, %64 : vector<49x64xf32>
    %c8 = arith.constant 8 : index
    %c0_65 = arith.constant 0 : index
    %c0_66 = arith.constant 0 : index
    %66 = vector.load %arg2[%c8, %c0_65, %c0_66] : memref<9x49x196xf32, #tpu.memory_space<vmem>>, vector<1x49x196xf32>
    %67 = vector.shape_cast %66 : vector<1x49x196xf32> to vector<49x196xf32>
    %cst_67 = arith.constant dense<0.000000e+00> : vector<49x32xf32>
    %68 = tpu.matmul %67, %8, %cst_67 {dimension_numbers = #tpu.dot_dimension_numbers<[1], [0], [0], [1], [0, 0, 1, 1], [], []>} : vector<49x196xf32>, vector<196x32xf32>, vector<49x32xf32> -> vector<49x32xf32>
    %c8_68 = arith.constant 8 : index
    %c0_69 = arith.constant 0 : index
    %c0_70 = arith.constant 0 : index
    %69 = vector.load %arg6[%c8_68, %c0_69, %c0_70] : memref<9x32x64xf32, #tpu.memory_space<vmem>>, vector<1x32x64xf32>
    %70 = vector.shape_cast %69 : vector<1x32x64xf32> to vector<32x64xf32>
    %cst_71 = arith.constant dense<0.000000e+00> : vector<49x64xf32>
    %71 = tpu.matmul %68, %70, %cst_71 {dimension_numbers = #tpu.dot_dimension_numbers<[1], [0], [0], [1], [0, 0, 1, 1], [], []>} : vector<49x32xf32>, vector<32x64xf32>, vector<49x64xf32> -> vector<49x64xf32>
    %72 = arith.addf %65, %71 : vector<49x64xf32>
    %c0_72 = arith.constant 0 : index
    %c0_73 = arith.constant 0 : index
    %73 = vector.load %arg7[%c0_72, %c0_73] : memref<1x64xf32, #tpu.memory_space<vmem>>, vector<1x64xf32>
    %74 = vector.broadcast %73 : vector<1x64xf32> to vector<49x64xf32>
    %75 = arith.addf %72, %74 : vector<49x64xf32>
    %cst_74 = arith.constant 0.000000e+00 : f32
    %76 = vector.broadcast %cst_74 : f32 to vector<49x64xf32>
    %77 = arith.maximumf %75, %76 : vector<49x64xf32>
    %cst_75 = arith.constant 0.000000e+00 : f32
    %78 = vector.broadcast %cst_75 : f32 to vector<16x128xf32>
    %c0_76 = arith.constant 0 : index
    %c0_77 = arith.constant 0 : index
    %c0_78 = arith.constant 0 : index
    %79 = vector.load %arg3[%c0_76, %c0_77, %c0_78] : memref<9x16x49xf32, #tpu.memory_space<vmem>>, vector<1x16x49xf32>
    %80 = vector.shape_cast %79 : vector<1x16x49xf32> to vector<16x49xf32>
    %cst_79 = arith.constant dense<0.000000e+00> : vector<16x64xf32>
    %81 = tpu.matmul %80, %77, %cst_79 {dimension_numbers = #tpu.dot_dimension_numbers<[1], [0], [0], [1], [0, 0, 1, 1], [], []>} : vector<16x49xf32>, vector<49x64xf32>, vector<16x64xf32> -> vector<16x64xf32>
    %c0_80 = arith.constant 0 : index
    %c0_81 = arith.constant 0 : index
    %c0_82 = arith.constant 0 : index
    %82 = vector.load %arg8[%c0_80, %c0_81, %c0_82] : memref<9x64x128xf32, #tpu.memory_space<vmem>>, vector<1x64x128xf32>
    %83 = vector.shape_cast %82 : vector<1x64x128xf32> to vector<64x128xf32>
    %cst_83 = arith.constant dense<0.000000e+00> : vector<16x128xf32>
    %84 = tpu.matmul %81, %83, %cst_83 {dimension_numbers = #tpu.dot_dimension_numbers<[1], [0], [0], [1], [0, 0, 1, 1], [], []>} : vector<16x64xf32>, vector<64x128xf32>, vector<16x128xf32> -> vector<16x128xf32>
    %85 = arith.addf %78, %84 : vector<16x128xf32>
    %c1_84 = arith.constant 1 : index
    %c0_85 = arith.constant 0 : index
    %c0_86 = arith.constant 0 : index
    %86 = vector.load %arg3[%c1_84, %c0_85, %c0_86] : memref<9x16x49xf32, #tpu.memory_space<vmem>>, vector<1x16x49xf32>
    %87 = vector.shape_cast %86 : vector<1x16x49xf32> to vector<16x49xf32>
    %cst_87 = arith.constant dense<0.000000e+00> : vector<16x64xf32>
    %88 = tpu.matmul %87, %77, %cst_87 {dimension_numbers = #tpu.dot_dimension_numbers<[1], [0], [0], [1], [0, 0, 1, 1], [], []>} : vector<16x49xf32>, vector<49x64xf32>, vector<16x64xf32> -> vector<16x64xf32>
    %c1_88 = arith.constant 1 : index
    %c0_89 = arith.constant 0 : index
    %c0_90 = arith.constant 0 : index
    %89 = vector.load %arg8[%c1_88, %c0_89, %c0_90] : memref<9x64x128xf32, #tpu.memory_space<vmem>>, vector<1x64x128xf32>
    %90 = vector.shape_cast %89 : vector<1x64x128xf32> to vector<64x128xf32>
    %cst_91 = arith.constant dense<0.000000e+00> : vector<16x128xf32>
    %91 = tpu.matmul %88, %90, %cst_91 {dimension_numbers = #tpu.dot_dimension_numbers<[1], [0], [0], [1], [0, 0, 1, 1], [], []>} : vector<16x64xf32>, vector<64x128xf32>, vector<16x128xf32> -> vector<16x128xf32>
    %92 = arith.addf %85, %91 : vector<16x128xf32>
    %c2_92 = arith.constant 2 : index
    %c0_93 = arith.constant 0 : index
    %c0_94 = arith.constant 0 : index
    %93 = vector.load %arg3[%c2_92, %c0_93, %c0_94] : memref<9x16x49xf32, #tpu.memory_space<vmem>>, vector<1x16x49xf32>
    %94 = vector.shape_cast %93 : vector<1x16x49xf32> to vector<16x49xf32>
    %cst_95 = arith.constant dense<0.000000e+00> : vector<16x64xf32>
    %95 = tpu.matmul %94, %77, %cst_95 {dimension_numbers = #tpu.dot_dimension_numbers<[1], [0], [0], [1], [0, 0, 1, 1], [], []>} : vector<16x49xf32>, vector<49x64xf32>, vector<16x64xf32> -> vector<16x64xf32>
    %c2_96 = arith.constant 2 : index
    %c0_97 = arith.constant 0 : index
    %c0_98 = arith.constant 0 : index
    %96 = vector.load %arg8[%c2_96, %c0_97, %c0_98] : memref<9x64x128xf32, #tpu.memory_space<vmem>>, vector<1x64x128xf32>
    %97 = vector.shape_cast %96 : vector<1x64x128xf32> to vector<64x128xf32>
    %cst_99 = arith.constant dense<0.000000e+00> : vector<16x128xf32>
    %98 = tpu.matmul %95, %97, %cst_99 {dimension_numbers = #tpu.dot_dimension_numbers<[1], [0], [0], [1], [0, 0, 1, 1], [], []>} : vector<16x64xf32>, vector<64x128xf32>, vector<16x128xf32> -> vector<16x128xf32>
    %99 = arith.addf %92, %98 : vector<16x128xf32>
    %c3_100 = arith.constant 3 : index
    %c0_101 = arith.constant 0 : index
    %c0_102 = arith.constant 0 : index
    %100 = vector.load %arg3[%c3_100, %c0_101, %c0_102] : memref<9x16x49xf32, #tpu.memory_space<vmem>>, vector<1x16x49xf32>
    %101 = vector.shape_cast %100 : vector<1x16x49xf32> to vector<16x49xf32>
    %cst_103 = arith.constant dense<0.000000e+00> : vector<16x64xf32>
    %102 = tpu.matmul %101, %77, %cst_103 {dimension_numbers = #tpu.dot_dimension_numbers<[1], [0], [0], [1], [0, 0, 1, 1], [], []>} : vector<16x49xf32>, vector<49x64xf32>, vector<16x64xf32> -> vector<16x64xf32>
    %c3_104 = arith.constant 3 : index
    %c0_105 = arith.constant 0 : index
    %c0_106 = arith.constant 0 : index
    %103 = vector.load %arg8[%c3_104, %c0_105, %c0_106] : memref<9x64x128xf32, #tpu.memory_space<vmem>>, vector<1x64x128xf32>
    %104 = vector.shape_cast %103 : vector<1x64x128xf32> to vector<64x128xf32>
    %cst_107 = arith.constant dense<0.000000e+00> : vector<16x128xf32>
    %105 = tpu.matmul %102, %104, %cst_107 {dimension_numbers = #tpu.dot_dimension_numbers<[1], [0], [0], [1], [0, 0, 1, 1], [], []>} : vector<16x64xf32>, vector<64x128xf32>, vector<16x128xf32> -> vector<16x128xf32>
    %106 = arith.addf %99, %105 : vector<16x128xf32>
    %c4_108 = arith.constant 4 : index
    %c0_109 = arith.constant 0 : index
    %c0_110 = arith.constant 0 : index
    %107 = vector.load %arg3[%c4_108, %c0_109, %c0_110] : memref<9x16x49xf32, #tpu.memory_space<vmem>>, vector<1x16x49xf32>
    %108 = vector.shape_cast %107 : vector<1x16x49xf32> to vector<16x49xf32>
    %cst_111 = arith.constant dense<0.000000e+00> : vector<16x64xf32>
    %109 = tpu.matmul %108, %77, %cst_111 {dimension_numbers = #tpu.dot_dimension_numbers<[1], [0], [0], [1], [0, 0, 1, 1], [], []>} : vector<16x49xf32>, vector<49x64xf32>, vector<16x64xf32> -> vector<16x64xf32>
    %c4_112 = arith.constant 4 : index
    %c0_113 = arith.constant 0 : index
    %c0_114 = arith.constant 0 : index
    %110 = vector.load %arg8[%c4_112, %c0_113, %c0_114] : memref<9x64x128xf32, #tpu.memory_space<vmem>>, vector<1x64x128xf32>
    %111 = vector.shape_cast %110 : vector<1x64x128xf32> to vector<64x128xf32>
    %cst_115 = arith.constant dense<0.000000e+00> : vector<16x128xf32>
    %112 = tpu.matmul %109, %111, %cst_115 {dimension_numbers = #tpu.dot_dimension_numbers<[1], [0], [0], [1], [0, 0, 1, 1], [], []>} : vector<16x64xf32>, vector<64x128xf32>, vector<16x128xf32> -> vector<16x128xf32>
    %113 = arith.addf %106, %112 : vector<16x128xf32>
    %c5_116 = arith.constant 5 : index
    %c0_117 = arith.constant 0 : index
    %c0_118 = arith.constant 0 : index
    %114 = vector.load %arg3[%c5_116, %c0_117, %c0_118] : memref<9x16x49xf32, #tpu.memory_space<vmem>>, vector<1x16x49xf32>
    %115 = vector.shape_cast %114 : vector<1x16x49xf32> to vector<16x49xf32>
    %cst_119 = arith.constant dense<0.000000e+00> : vector<16x64xf32>
    %116 = tpu.matmul %115, %77, %cst_119 {dimension_numbers = #tpu.dot_dimension_numbers<[1], [0], [0], [1], [0, 0, 1, 1], [], []>} : vector<16x49xf32>, vector<49x64xf32>, vector<16x64xf32> -> vector<16x64xf32>
    %c5_120 = arith.constant 5 : index
    %c0_121 = arith.constant 0 : index
    %c0_122 = arith.constant 0 : index
    %117 = vector.load %arg8[%c5_120, %c0_121, %c0_122] : memref<9x64x128xf32, #tpu.memory_space<vmem>>, vector<1x64x128xf32>
    %118 = vector.shape_cast %117 : vector<1x64x128xf32> to vector<64x128xf32>
    %cst_123 = arith.constant dense<0.000000e+00> : vector<16x128xf32>
    %119 = tpu.matmul %116, %118, %cst_123 {dimension_numbers = #tpu.dot_dimension_numbers<[1], [0], [0], [1], [0, 0, 1, 1], [], []>} : vector<16x64xf32>, vector<64x128xf32>, vector<16x128xf32> -> vector<16x128xf32>
    %120 = arith.addf %113, %119 : vector<16x128xf32>
    %c6_124 = arith.constant 6 : index
    %c0_125 = arith.constant 0 : index
    %c0_126 = arith.constant 0 : index
    %121 = vector.load %arg3[%c6_124, %c0_125, %c0_126] : memref<9x16x49xf32, #tpu.memory_space<vmem>>, vector<1x16x49xf32>
    %122 = vector.shape_cast %121 : vector<1x16x49xf32> to vector<16x49xf32>
    %cst_127 = arith.constant dense<0.000000e+00> : vector<16x64xf32>
    %123 = tpu.matmul %122, %77, %cst_127 {dimension_numbers = #tpu.dot_dimension_numbers<[1], [0], [0], [1], [0, 0, 1, 1], [], []>} : vector<16x49xf32>, vector<49x64xf32>, vector<16x64xf32> -> vector<16x64xf32>
    %c6_128 = arith.constant 6 : index
    %c0_129 = arith.constant 0 : index
    %c0_130 = arith.constant 0 : index
    %124 = vector.load %arg8[%c6_128, %c0_129, %c0_130] : memref<9x64x128xf32, #tpu.memory_space<vmem>>, vector<1x64x128xf32>
    %125 = vector.shape_cast %124 : vector<1x64x128xf32> to vector<64x128xf32>
    %cst_131 = arith.constant dense<0.000000e+00> : vector<16x128xf32>
    %126 = tpu.matmul %123, %125, %cst_131 {dimension_numbers = #tpu.dot_dimension_numbers<[1], [0], [0], [1], [0, 0, 1, 1], [], []>} : vector<16x64xf32>, vector<64x128xf32>, vector<16x128xf32> -> vector<16x128xf32>
    %127 = arith.addf %120, %126 : vector<16x128xf32>
    %c7_132 = arith.constant 7 : index
    %c0_133 = arith.constant 0 : index
    %c0_134 = arith.constant 0 : index
    %128 = vector.load %arg3[%c7_132, %c0_133, %c0_134] : memref<9x16x49xf32, #tpu.memory_space<vmem>>, vector<1x16x49xf32>
    %129 = vector.shape_cast %128 : vector<1x16x49xf32> to vector<16x49xf32>
    %cst_135 = arith.constant dense<0.000000e+00> : vector<16x64xf32>
    %130 = tpu.matmul %129, %77, %cst_135 {dimension_numbers = #tpu.dot_dimension_numbers<[1], [0], [0], [1], [0, 0, 1, 1], [], []>} : vector<16x49xf32>, vector<49x64xf32>, vector<16x64xf32> -> vector<16x64xf32>
    %c7_136 = arith.constant 7 : index
    %c0_137 = arith.constant 0 : index
    %c0_138 = arith.constant 0 : index
    %131 = vector.load %arg8[%c7_136, %c0_137, %c0_138] : memref<9x64x128xf32, #tpu.memory_space<vmem>>, vector<1x64x128xf32>
    %132 = vector.shape_cast %131 : vector<1x64x128xf32> to vector<64x128xf32>
    %cst_139 = arith.constant dense<0.000000e+00> : vector<16x128xf32>
    %133 = tpu.matmul %130, %132, %cst_139 {dimension_numbers = #tpu.dot_dimension_numbers<[1], [0], [0], [1], [0, 0, 1, 1], [], []>} : vector<16x64xf32>, vector<64x128xf32>, vector<16x128xf32> -> vector<16x128xf32>
    %134 = arith.addf %127, %133 : vector<16x128xf32>
    %c8_140 = arith.constant 8 : index
    %c0_141 = arith.constant 0 : index
    %c0_142 = arith.constant 0 : index
    %135 = vector.load %arg3[%c8_140, %c0_141, %c0_142] : memref<9x16x49xf32, #tpu.memory_space<vmem>>, vector<1x16x49xf32>
    %136 = vector.shape_cast %135 : vector<1x16x49xf32> to vector<16x49xf32>
    %cst_143 = arith.constant dense<0.000000e+00> : vector<16x64xf32>
    %137 = tpu.matmul %136, %77, %cst_143 {dimension_numbers = #tpu.dot_dimension_numbers<[1], [0], [0], [1], [0, 0, 1, 1], [], []>} : vector<16x49xf32>, vector<49x64xf32>, vector<16x64xf32> -> vector<16x64xf32>
    %c8_144 = arith.constant 8 : index
    %c0_145 = arith.constant 0 : index
    %c0_146 = arith.constant 0 : index
    %138 = vector.load %arg8[%c8_144, %c0_145, %c0_146] : memref<9x64x128xf32, #tpu.memory_space<vmem>>, vector<1x64x128xf32>
    %139 = vector.shape_cast %138 : vector<1x64x128xf32> to vector<64x128xf32>
    %cst_147 = arith.constant dense<0.000000e+00> : vector<16x128xf32>
    %140 = tpu.matmul %137, %139, %cst_147 {dimension_numbers = #tpu.dot_dimension_numbers<[1], [0], [0], [1], [0, 0, 1, 1], [], []>} : vector<16x64xf32>, vector<64x128xf32>, vector<16x128xf32> -> vector<16x128xf32>
    %141 = arith.addf %134, %140 : vector<16x128xf32>
    %c0_148 = arith.constant 0 : index
    %c0_149 = arith.constant 0 : index
    %142 = vector.load %arg9[%c0_148, %c0_149] : memref<1x128xf32, #tpu.memory_space<vmem>>, vector<1x128xf32>
    %143 = vector.broadcast %142 : vector<1x128xf32> to vector<16x128xf32>
    %144 = arith.addf %141, %143 : vector<16x128xf32>
    %cst_150 = arith.constant 0.000000e+00 : f32
    %145 = vector.broadcast %cst_150 : f32 to vector<16x128xf32>
    %146 = arith.maximumf %144, %145 : vector<16x128xf32>
    %c0_151 = arith.constant 0 : index
    %c0_152 = arith.constant 0 : index
    %147 = vector.load %arg11[%c0_151, %c0_152] : memref<1x128xf32, #tpu.memory_space<vmem>>, vector<1x128xf32>
    %148 = vector.extract_strided_slice %146 {offsets = [0, 0], sizes = [1, 128], strides = [1, 1]} : vector<16x128xf32> to vector<1x128xf32>
    %c0_153 = arith.constant 0 : index
    %c0_154 = arith.constant 0 : index
    %c0_155 = arith.constant 0 : index
    %149 = vector.load %arg10[%c0_153, %c0_154, %c0_155] : memref<16x128x128xf32, #tpu.memory_space<vmem>>, vector<1x128x128xf32>
    %150 = vector.shape_cast %149 : vector<1x128x128xf32> to vector<128x128xf32>
    %cst_156 = arith.constant dense<0.000000e+00> : vector<1x128xf32>
    %151 = tpu.matmul %148, %150, %cst_156 {dimension_numbers = #tpu.dot_dimension_numbers<[1], [0], [0], [1], [0, 0, 1, 1], [], []>} : vector<1x128xf32>, vector<128x128xf32>, vector<1x128xf32> -> vector<1x128xf32>
    %152 = arith.addf %147, %151 : vector<1x128xf32>
    %153 = vector.extract_strided_slice %146 {offsets = [1, 0], sizes = [1, 128], strides = [1, 1]} : vector<16x128xf32> to vector<1x128xf32>
    %c1_157 = arith.constant 1 : index
    %c0_158 = arith.constant 0 : index
    %c0_159 = arith.constant 0 : index
    %154 = vector.load %arg10[%c1_157, %c0_158, %c0_159] : memref<16x128x128xf32, #tpu.memory_space<vmem>>, vector<1x128x128xf32>
    %155 = vector.shape_cast %154 : vector<1x128x128xf32> to vector<128x128xf32>
    %cst_160 = arith.constant dense<0.000000e+00> : vector<1x128xf32>
    %156 = tpu.matmul %153, %155, %cst_160 {dimension_numbers = #tpu.dot_dimension_numbers<[1], [0], [0], [1], [0, 0, 1, 1], [], []>} : vector<1x128xf32>, vector<128x128xf32>, vector<1x128xf32> -> vector<1x128xf32>
    %157 = arith.addf %152, %156 : vector<1x128xf32>
    %158 = vector.extract_strided_slice %146 {offsets = [2, 0], sizes = [1, 128], strides = [1, 1]} : vector<16x128xf32> to vector<1x128xf32>
    %c2_161 = arith.constant 2 : index
    %c0_162 = arith.constant 0 : index
    %c0_163 = arith.constant 0 : index
    %159 = vector.load %arg10[%c2_161, %c0_162, %c0_163] : memref<16x128x128xf32, #tpu.memory_space<vmem>>, vector<1x128x128xf32>
    %160 = vector.shape_cast %159 : vector<1x128x128xf32> to vector<128x128xf32>
    %cst_164 = arith.constant dense<0.000000e+00> : vector<1x128xf32>
    %161 = tpu.matmul %158, %160, %cst_164 {dimension_numbers = #tpu.dot_dimension_numbers<[1], [0], [0], [1], [0, 0, 1, 1], [], []>} : vector<1x128xf32>, vector<128x128xf32>, vector<1x128xf32> -> vector<1x128xf32>
    %162 = arith.addf %157, %161 : vector<1x128xf32>
    %163 = vector.extract_strided_slice %146 {offsets = [3, 0], sizes = [1, 128], strides = [1, 1]} : vector<16x128xf32> to vector<1x128xf32>
    %c3_165 = arith.constant 3 : index
    %c0_166 = arith.constant 0 : index
    %c0_167 = arith.constant 0 : index
    %164 = vector.load %arg10[%c3_165, %c0_166, %c0_167] : memref<16x128x128xf32, #tpu.memory_space<vmem>>, vector<1x128x128xf32>
    %165 = vector.shape_cast %164 : vector<1x128x128xf32> to vector<128x128xf32>
    %cst_168 = arith.constant dense<0.000000e+00> : vector<1x128xf32>
    %166 = tpu.matmul %163, %165, %cst_168 {dimension_numbers = #tpu.dot_dimension_numbers<[1], [0], [0], [1], [0, 0, 1, 1], [], []>} : vector<1x128xf32>, vector<128x128xf32>, vector<1x128xf32> -> vector<1x128xf32>
    %167 = arith.addf %162, %166 : vector<1x128xf32>
    %168 = vector.extract_strided_slice %146 {offsets = [4, 0], sizes = [1, 128], strides = [1, 1]} : vector<16x128xf32> to vector<1x128xf32>
    %c4_169 = arith.constant 4 : index
    %c0_170 = arith.constant 0 : index
    %c0_171 = arith.constant 0 : index
    %169 = vector.load %arg10[%c4_169, %c0_170, %c0_171] : memref<16x128x128xf32, #tpu.memory_space<vmem>>, vector<1x128x128xf32>
    %170 = vector.shape_cast %169 : vector<1x128x128xf32> to vector<128x128xf32>
    %cst_172 = arith.constant dense<0.000000e+00> : vector<1x128xf32>
    %171 = tpu.matmul %168, %170, %cst_172 {dimension_numbers = #tpu.dot_dimension_numbers<[1], [0], [0], [1], [0, 0, 1, 1], [], []>} : vector<1x128xf32>, vector<128x128xf32>, vector<1x128xf32> -> vector<1x128xf32>
    %172 = arith.addf %167, %171 : vector<1x128xf32>
    %173 = vector.extract_strided_slice %146 {offsets = [5, 0], sizes = [1, 128], strides = [1, 1]} : vector<16x128xf32> to vector<1x128xf32>
    %c5_173 = arith.constant 5 : index
    %c0_174 = arith.constant 0 : index
    %c0_175 = arith.constant 0 : index
    %174 = vector.load %arg10[%c5_173, %c0_174, %c0_175] : memref<16x128x128xf32, #tpu.memory_space<vmem>>, vector<1x128x128xf32>
    %175 = vector.shape_cast %174 : vector<1x128x128xf32> to vector<128x128xf32>
    %cst_176 = arith.constant dense<0.000000e+00> : vector<1x128xf32>
    %176 = tpu.matmul %173, %175, %cst_176 {dimension_numbers = #tpu.dot_dimension_numbers<[1], [0], [0], [1], [0, 0, 1, 1], [], []>} : vector<1x128xf32>, vector<128x128xf32>, vector<1x128xf32> -> vector<1x128xf32>
    %177 = arith.addf %172, %176 : vector<1x128xf32>
    %178 = vector.extract_strided_slice %146 {offsets = [6, 0], sizes = [1, 128], strides = [1, 1]} : vector<16x128xf32> to vector<1x128xf32>
    %c6_177 = arith.constant 6 : index
    %c0_178 = arith.constant 0 : index
    %c0_179 = arith.constant 0 : index
    %179 = vector.load %arg10[%c6_177, %c0_178, %c0_179] : memref<16x128x128xf32, #tpu.memory_space<vmem>>, vector<1x128x128xf32>
    %180 = vector.shape_cast %179 : vector<1x128x128xf32> to vector<128x128xf32>
    %cst_180 = arith.constant dense<0.000000e+00> : vector<1x128xf32>
    %181 = tpu.matmul %178, %180, %cst_180 {dimension_numbers = #tpu.dot_dimension_numbers<[1], [0], [0], [1], [0, 0, 1, 1], [], []>} : vector<1x128xf32>, vector<128x128xf32>, vector<1x128xf32> -> vector<1x128xf32>
    %182 = arith.addf %177, %181 : vector<1x128xf32>
    %183 = vector.extract_strided_slice %146 {offsets = [7, 0], sizes = [1, 128], strides = [1, 1]} : vector<16x128xf32> to vector<1x128xf32>
    %c7_181 = arith.constant 7 : index
    %c0_182 = arith.constant 0 : index
    %c0_183 = arith.constant 0 : index
    %184 = vector.load %arg10[%c7_181, %c0_182, %c0_183] : memref<16x128x128xf32, #tpu.memory_space<vmem>>, vector<1x128x128xf32>
    %185 = vector.shape_cast %184 : vector<1x128x128xf32> to vector<128x128xf32>
    %cst_184 = arith.constant dense<0.000000e+00> : vector<1x128xf32>
    %186 = tpu.matmul %183, %185, %cst_184 {dimension_numbers = #tpu.dot_dimension_numbers<[1], [0], [0], [1], [0, 0, 1, 1], [], []>} : vector<1x128xf32>, vector<128x128xf32>, vector<1x128xf32> -> vector<1x128xf32>
    %187 = arith.addf %182, %186 : vector<1x128xf32>
    %188 = vector.extract_strided_slice %146 {offsets = [8, 0], sizes = [1, 128], strides = [1, 1]} : vector<16x128xf32> to vector<1x128xf32>
    %c8_185 = arith.constant 8 : index
    %c0_186 = arith.constant 0 : index
    %c0_187 = arith.constant 0 : index
    %189 = vector.load %arg10[%c8_185, %c0_186, %c0_187] : memref<16x128x128xf32, #tpu.memory_space<vmem>>, vector<1x128x128xf32>
    %190 = vector.shape_cast %189 : vector<1x128x128xf32> to vector<128x128xf32>
    %cst_188 = arith.constant dense<0.000000e+00> : vector<1x128xf32>
    %191 = tpu.matmul %188, %190, %cst_188 {dimension_numbers = #tpu.dot_dimension_numbers<[1], [0], [0], [1], [0, 0, 1, 1], [], []>} : vector<1x128xf32>, vector<128x128xf32>, vector<1x128xf32> -> vector<1x128xf32>
    %192 = arith.addf %187, %191 : vector<1x128xf32>
    %193 = vector.extract_strided_slice %146 {offsets = [9, 0], sizes = [1, 128], strides = [1, 1]} : vector<16x128xf32> to vector<1x128xf32>
    %c9 = arith.constant 9 : index
    %c0_189 = arith.constant 0 : index
    %c0_190 = arith.constant 0 : index
    %194 = vector.load %arg10[%c9, %c0_189, %c0_190] : memref<16x128x128xf32, #tpu.memory_space<vmem>>, vector<1x128x128xf32>
    %195 = vector.shape_cast %194 : vector<1x128x128xf32> to vector<128x128xf32>
    %cst_191 = arith.constant dense<0.000000e+00> : vector<1x128xf32>
    %196 = tpu.matmul %193, %195, %cst_191 {dimension_numbers = #tpu.dot_dimension_numbers<[1], [0], [0], [1], [0, 0, 1, 1], [], []>} : vector<1x128xf32>, vector<128x128xf32>, vector<1x128xf32> -> vector<1x128xf32>
    %197 = arith.addf %192, %196 : vector<1x128xf32>
    %198 = vector.extract_strided_slice %146 {offsets = [10, 0], sizes = [1, 128], strides = [1, 1]} : vector<16x128xf32> to vector<1x128xf32>
    %c10 = arith.constant 10 : index
    %c0_192 = arith.constant 0 : index
    %c0_193 = arith.constant 0 : index
    %199 = vector.load %arg10[%c10, %c0_192, %c0_193] : memref<16x128x128xf32, #tpu.memory_space<vmem>>, vector<1x128x128xf32>
    %200 = vector.shape_cast %199 : vector<1x128x128xf32> to vector<128x128xf32>
    %cst_194 = arith.constant dense<0.000000e+00> : vector<1x128xf32>
    %201 = tpu.matmul %198, %200, %cst_194 {dimension_numbers = #tpu.dot_dimension_numbers<[1], [0], [0], [1], [0, 0, 1, 1], [], []>} : vector<1x128xf32>, vector<128x128xf32>, vector<1x128xf32> -> vector<1x128xf32>
    %202 = arith.addf %197, %201 : vector<1x128xf32>
    %203 = vector.extract_strided_slice %146 {offsets = [11, 0], sizes = [1, 128], strides = [1, 1]} : vector<16x128xf32> to vector<1x128xf32>
    %c11 = arith.constant 11 : index
    %c0_195 = arith.constant 0 : index
    %c0_196 = arith.constant 0 : index
    %204 = vector.load %arg10[%c11, %c0_195, %c0_196] : memref<16x128x128xf32, #tpu.memory_space<vmem>>, vector<1x128x128xf32>
    %205 = vector.shape_cast %204 : vector<1x128x128xf32> to vector<128x128xf32>
    %cst_197 = arith.constant dense<0.000000e+00> : vector<1x128xf32>
    %206 = tpu.matmul %203, %205, %cst_197 {dimension_numbers = #tpu.dot_dimension_numbers<[1], [0], [0], [1], [0, 0, 1, 1], [], []>} : vector<1x128xf32>, vector<128x128xf32>, vector<1x128xf32> -> vector<1x128xf32>
    %207 = arith.addf %202, %206 : vector<1x128xf32>
    %208 = vector.extract_strided_slice %146 {offsets = [12, 0], sizes = [1, 128], strides = [1, 1]} : vector<16x128xf32> to vector<1x128xf32>
    %c12 = arith.constant 12 : index
    %c0_198 = arith.constant 0 : index
    %c0_199 = arith.constant 0 : index
    %209 = vector.load %arg10[%c12, %c0_198, %c0_199] : memref<16x128x128xf32, #tpu.memory_space<vmem>>, vector<1x128x128xf32>
    %210 = vector.shape_cast %209 : vector<1x128x128xf32> to vector<128x128xf32>
    %cst_200 = arith.constant dense<0.000000e+00> : vector<1x128xf32>
    %211 = tpu.matmul %208, %210, %cst_200 {dimension_numbers = #tpu.dot_dimension_numbers<[1], [0], [0], [1], [0, 0, 1, 1], [], []>} : vector<1x128xf32>, vector<128x128xf32>, vector<1x128xf32> -> vector<1x128xf32>
    %212 = arith.addf %207, %211 : vector<1x128xf32>
    %213 = vector.extract_strided_slice %146 {offsets = [13, 0], sizes = [1, 128], strides = [1, 1]} : vector<16x128xf32> to vector<1x128xf32>
    %c13 = arith.constant 13 : index
    %c0_201 = arith.constant 0 : index
    %c0_202 = arith.constant 0 : index
    %214 = vector.load %arg10[%c13, %c0_201, %c0_202] : memref<16x128x128xf32, #tpu.memory_space<vmem>>, vector<1x128x128xf32>
    %215 = vector.shape_cast %214 : vector<1x128x128xf32> to vector<128x128xf32>
    %cst_203 = arith.constant dense<0.000000e+00> : vector<1x128xf32>
    %216 = tpu.matmul %213, %215, %cst_203 {dimension_numbers = #tpu.dot_dimension_numbers<[1], [0], [0], [1], [0, 0, 1, 1], [], []>} : vector<1x128xf32>, vector<128x128xf32>, vector<1x128xf32> -> vector<1x128xf32>
    %217 = arith.addf %212, %216 : vector<1x128xf32>
    %218 = vector.extract_strided_slice %146 {offsets = [14, 0], sizes = [1, 128], strides = [1, 1]} : vector<16x128xf32> to vector<1x128xf32>
    %c14 = arith.constant 14 : index
    %c0_204 = arith.constant 0 : index
    %c0_205 = arith.constant 0 : index
    %219 = vector.load %arg10[%c14, %c0_204, %c0_205] : memref<16x128x128xf32, #tpu.memory_space<vmem>>, vector<1x128x128xf32>
    %220 = vector.shape_cast %219 : vector<1x128x128xf32> to vector<128x128xf32>
    %cst_206 = arith.constant dense<0.000000e+00> : vector<1x128xf32>
    %221 = tpu.matmul %218, %220, %cst_206 {dimension_numbers = #tpu.dot_dimension_numbers<[1], [0], [0], [1], [0, 0, 1, 1], [], []>} : vector<1x128xf32>, vector<128x128xf32>, vector<1x128xf32> -> vector<1x128xf32>
    %222 = arith.addf %217, %221 : vector<1x128xf32>
    %223 = vector.extract_strided_slice %146 {offsets = [15, 0], sizes = [1, 128], strides = [1, 1]} : vector<16x128xf32> to vector<1x128xf32>
    %c15 = arith.constant 15 : index
    %c0_207 = arith.constant 0 : index
    %c0_208 = arith.constant 0 : index
    %224 = vector.load %arg10[%c15, %c0_207, %c0_208] : memref<16x128x128xf32, #tpu.memory_space<vmem>>, vector<1x128x128xf32>
    %225 = vector.shape_cast %224 : vector<1x128x128xf32> to vector<128x128xf32>
    %cst_209 = arith.constant dense<0.000000e+00> : vector<1x128xf32>
    %226 = tpu.matmul %223, %225, %cst_209 {dimension_numbers = #tpu.dot_dimension_numbers<[1], [0], [0], [1], [0, 0, 1, 1], [], []>} : vector<1x128xf32>, vector<128x128xf32>, vector<1x128xf32> -> vector<1x128xf32>
    %227 = arith.addf %222, %226 : vector<1x128xf32>
    %cst_210 = arith.constant 0.000000e+00 : f32
    %228 = vector.broadcast %cst_210 : f32 to vector<1x128xf32>
    %229 = arith.maximumf %227, %228 : vector<1x128xf32>
    %c0_211 = arith.constant 0 : index
    %c0_212 = arith.constant 0 : index
    %230 = vector.load %arg12[%c0_211, %c0_212] : memref<128x128xf32, #tpu.memory_space<vmem>>, vector<128x128xf32>
    %cst_213 = arith.constant dense<0.000000e+00> : vector<1x128xf32>
    %231 = tpu.matmul %229, %230, %cst_213 {dimension_numbers = #tpu.dot_dimension_numbers<[1], [0], [0], [1], [0, 0, 1, 1], [], []>} : vector<1x128xf32>, vector<128x128xf32>, vector<1x128xf32> -> vector<1x128xf32>
    %c0_214 = arith.constant 0 : index
    %c0_215 = arith.constant 0 : index
    %232 = vector.load %arg13[%c0_214, %c0_215] : memref<1x128xf32, #tpu.memory_space<vmem>>, vector<1x128xf32>
    %233 = arith.addf %231, %232 : vector<1x128xf32>
    %cst_216 = arith.constant dense<0xFF800000> : vector<1xf32>
    %234 = vector.multi_reduction <maximumf>, %233, %cst_216 [1] : vector<1x128xf32> to vector<1xf32>
    %235 = vector.shape_cast %234 : vector<1xf32> to vector<1x1xf32>
    %236 = vector.broadcast %235 : vector<1x1xf32> to vector<1x128xf32>
    %237 = arith.subf %233, %236 : vector<1x128xf32>
    %238 = math.exp %237 : vector<1x128xf32>
    %cst_217 = arith.constant dense<0.000000e+00> : vector<1xf32>
    %239 = vector.multi_reduction <add>, %238, %cst_217 [1] : vector<1x128xf32> to vector<1xf32>
    %240 = vector.shape_cast %239 : vector<1xf32> to vector<1x1xf32>
    %241 = math.log %240 : vector<1x1xf32>
    %242 = arith.addf %241, %235 : vector<1x1xf32>
    %243 = vector.broadcast %242 : vector<1x1xf32> to vector<1x128xf32>
    %244 = arith.subf %233, %243 : vector<1x128xf32>
    %c0_218 = arith.constant 0 : index
    %c0_219 = arith.constant 0 : index
    %c0_220 = arith.constant 0 : index
    %245 = vector.load %arg14[%c0_218, %c0_219, %c0_220] : memref<1x1x128xf32, #tpu.memory_space<vmem>>, vector<1x1x128xf32>
    %246 = vector.shape_cast %245 : vector<1x1x128xf32> to vector<1x128xf32>
    %247 = vector.shape_cast %244 : vector<1x128xf32> to vector<1x1x128xf32>
    tpu.vector_store %arg14[%c0_218, %c0_219, %c0_220], %247 {strides = array<i32>} : memref<1x1x128xf32, #tpu.memory_space<vmem>>, vector<1x1x128xf32>,
    return
  }
  func.func @transform_0(%arg0: i32) -> (i32, i32, i32) {
    %c0_i32 = arith.constant 0 : i32
    %c0_i32_0 = arith.constant 0 : i32
    %c0_i32_1 = arith.constant 0 : i32
    return %arg0, %c0_i32, %c0_i32_0 : i32, i32, i32
  }
  func.func @transform_1(%arg0: i32) -> (i32, i32, i32) {
    %c0_i32 = arith.constant 0 : i32
    %c0_i32_0 = arith.constant 0 : i32
    %c0_i32_1 = arith.constant 0 : i32
    %c0_i32_2 = arith.constant 0 : i32
    return %c0_i32, %c0_i32_0, %c0_i32_1 : i32, i32, i32
  }
  func.func @transform_2(%arg0: i32) -> (i32, i32, i32) {
    %c0_i32 = arith.constant 0 : i32
    %c0_i32_0 = arith.constant 0 : i32
    %c0_i32_1 = arith.constant 0 : i32
    %c0_i32_2 = arith.constant 0 : i32
    return %c0_i32, %c0_i32_0, %c0_i32_1 : i32, i32, i32
  }
  func.func @transform_3(%arg0: i32) -> (i32, i32) {
    %c0_i32 = arith.constant 0 : i32
    %c0_i32_0 = arith.constant 0 : i32
    %c0_i32_1 = arith.constant 0 : i32
    return %c0_i32, %c0_i32_0 : i32, i32
  }
  func.func @transform_4(%arg0: i32) -> (i32, i32) {
    %c0_i32 = arith.constant 0 : i32
    %c0_i32_0 = arith.constant 0 : i32
    %c0_i32_1 = arith.constant 0 : i32
    return %c0_i32, %c0_i32_0 : i32, i32
  }
  func.func @transform_5(%arg0: i32) -> (i32, i32, i32) {
    %c0_i32 = arith.constant 0 : i32
    %c0_i32_0 = arith.constant 0 : i32
    %c0_i32_1 = arith.constant 0 : i32
    %c0_i32_2 = arith.constant 0 : i32
    return %c0_i32, %c0_i32_0, %c0_i32_1 : i32, i32, i32
  }
  func.func @transform_6(%arg0: i32) -> (i32, i32) {
    %c0_i32 = arith.constant 0 : i32
    %c0_i32_0 = arith.constant 0 : i32
    %c0_i32_1 = arith.constant 0 : i32
    return %c0_i32, %c0_i32_0 : i32, i32
  }
  func.func @transform_7(%arg0: i32) -> (i32, i32, i32) {
    %c0_i32 = arith.constant 0 : i32
    %c0_i32_0 = arith.constant 0 : i32
    %c0_i32_1 = arith.constant 0 : i32
    %c0_i32_2 = arith.constant 0 : i32
    return %c0_i32, %c0_i32_0, %c0_i32_1 : i32, i32, i32
  }
  func.func @transform_8(%arg0: i32) -> (i32, i32) {
    %c0_i32 = arith.constant 0 : i32
    %c0_i32_0 = arith.constant 0 : i32
    %c0_i32_1 = arith.constant 0 : i32
    return %c0_i32, %c0_i32_0 : i32, i32
  }
  func.func @transform_9(%arg0: i32) -> (i32, i32, i32) {
    %c0_i32 = arith.constant 0 : i32
    %c0_i32_0 = arith.constant 0 : i32
    %c0_i32_1 = arith.constant 0 : i32
    %c0_i32_2 = arith.constant 0 : i32
    return %c0_i32, %c0_i32_0, %c0_i32_1 : i32, i32, i32
  }
  func.func @transform_10(%arg0: i32) -> (i32, i32) {
    %c0_i32 = arith.constant 0 : i32
    %c0_i32_0 = arith.constant 0 : i32
    %c0_i32_1 = arith.constant 0 : i32
    return %c0_i32, %c0_i32_0 : i32, i32
  }
  func.func @transform_11(%arg0: i32) -> (i32, i32) {
    %c0_i32 = arith.constant 0 : i32
    %c0_i32_0 = arith.constant 0 : i32
    %c0_i32_1 = arith.constant 0 : i32
    return %c0_i32, %c0_i32_0 : i32, i32
  }
  func.func @transform_12(%arg0: i32) -> (i32, i32) {
    %c0_i32 = arith.constant 0 : i32
    %c0_i32_0 = arith.constant 0 : i32
    %c0_i32_1 = arith.constant 0 : i32
    return %c0_i32, %c0_i32_0 : i32, i32
  }
  func.func @transform_13(%arg0: i32) -> (i32, i32, i32) {
    %c0_i32 = arith.constant 0 : i32
    %c0_i32_0 = arith.constant 0 : i32
    %c0_i32_1 = arith.constant 0 : i32
    return %arg0, %c0_i32, %c0_i32_0 : i32, i32, i32
  }
}

</mosaic_0001>

<bundles_post_ra>
// kernel: net_forward.1
= control target key start
LH: loop header
LB: loop body
LE: loop exit
PB: predicated region body
PF: predicated region fallthrough
CT: control target
= control target key end

     0   :  { %s12470_s0 = inlined_call_operand.vmem [shape: f32[2,196,9], index: 0, kind: input, shape index: {}]   ;;  %s12471_s1 = inlined_call_operand.hbm [shape: f32[9,49,196], index: 1, kind: input, shape index: {}]   ;;  %s12472_s2 = inlined_call_operand.hbm [shape: f32[9,16,49], index: 2, kind: input, shape index: {}]   ;;  %s12473_s3 = inlined_call_operand.vmem [shape: f32[9,32], index: 3, kind: input, shape index: {}]   ;;  %s12474_s4 = inlined_call_operand.vmem [shape: f32[1,32], index: 4, kind: input, shape index: {}]   ;;  %s12475_s5 = inlined_call_operand.hbm [shape: f32[9,32,64], index: 5, kind: input, shape index: {}]   ;;  %s12476_s6 = inlined_call_operand.vmem [shape: f32[1,64], index: 6, kind: input, shape index: {}]   ;;  %s12477_s7 = inlined_call_operand.hbm [shape: f32[9,64,128], index: 7, kind: input, shape index: {}]   ;;  %s12478_s8 = inlined_call_operand.vmem [shape: f32[1,128], index: 8, kind: input, shape index: {}]   ;;  %s12479_s9 = inlined_call_operand.vmem [shape: f32[16,128,128], index: 9, kind: input, shape index: {}]   ;;  %s12480_s10 = inlined_call_operand.vmem [shape: f32[1,128], index: 10, kind: input, shape index: {}]   ;;  %s12481_s11 = inlined_call_operand.hbm [shape: f32[128,128], index: 11, kind: input, shape index: {}]   ;;  %s12482_s12 = inlined_call_operand.vmem [shape: f32[1,128], index: 12, kind: input, shape index: {}]   ;;  %s12483_s13 = inlined_call_operand.hbm [shape: f32[2,1,128], index: 13, kind: output, shape index: {}]  }
   0x1   :  { %12501 = sst [smem:[#allocation24_spill]] %s12472_s2 }
   0x2   :  { %12502 = sst [smem:[#allocation25_spill]] %s12477_s7 }
   0x3   :  { %12503 = sst [smem:[#allocation26_spill]] %s12483_s13 }
   0x4   :  { %18 = vsyncpa [#allocation3], 0 }
   0x5   :  { %19 = vsyncpa [#allocation6], 0 }
   0x6   :  { %20 = vsyncpa [#allocation9], 0 }
   0x7   :  { %21 = vsyncpa [#allocation4], 0 }
   0x8   :  { %23 = vsyncpa [#allocation4 + $0x1], 0  ;;  %s10328_s25 = smov 0   ;;  %s10330_s26 = smov 0  }
   0x9   :  { %s10332_s27 = smov 0   ;;  %s10334_s28 = smov 0  }
   0xa LB: > { %12504 = sst [smem:[#allocation16_spill]] %s10230_s25  ;;  %s10349_s29 = sadd.s32 4294967295, %s10242_s28   ;;  %s10242_s28 = sphi %s10334_s28, %s12536_s28   ;;  %s10238_s27 = sphi %s10332_s27, %s12539_s27   ;;  %s10234_s26 = sphi %s10330_s26, %s12538_s26   ;;  %s10230_s25 = sphi %s10328_s25, %s12537_s25  }
   0xb   : > { %12505 = sst [smem:[#allocation17_spill]] %s10234_s26  ;;  %s6524_s30 = sadd.s32 4294967294, %s10242_s28  }
   0xc   : > { %12506 = sst [smem:[#allocation18_spill]] %s10238_s27  ;;  %s10353_s14 = sadd.s32 1, %s10242_s28  }
   0xd   : > { %12507 = sst [smem:[#allocation19_spill]] %s10242_s28  ;;  %s314_s15 = sadd.s32 1, %s10238_s27 }
   0xe   : > { %12508 = sst [smem:[#allocation20_spill]] %s10353_s14  ;;  %s311_s16 = ssub.s32 %s10242_s28, %s10353_s14 }
   0xf   : > { %p324_p0 = scmp.ne.s32.totalorder %s10238_s27, %s10234_s26  ;;  %p312_p1 = scmp.eq.s32.totalorder %s311_s16, 0 }
  0x10   : > { %p325_p2 = scmp.eq.s32.totalorder %s10349_s29, 1  ;;  %p330_p3 = scmp.ne.s32.totalorder %s10234_s26, %s10230_s25 }
  0x11   : > { %p331_p4 = scmp.eq.s32.totalorder %s6524_s30, 1  ;;  %p6525_p7 = scmp.ge.s32.totalorder %s10242_s28, 1 }
  0x12   : > { %s10364_s17 = scalar_select %p312_p1, %s10238_s27, %s314_s15  }
  0x13   : > { %p10366_p5 = por %p325_p2, %p324_p0  ;;  %p10370_p6 = por %p331_p4, %p330_p3 }
  0x14   : > { %12509 = sst [smem:[#allocation21_spill]] %s10364_s17  ;;  %p338_p8 = scmp.lt.s32.totalorder %s10242_s28, 3 }
  0x15   : > { %s12510_s18 = scalar_select %p10366_p5, 1, 0 }
  0x16   : > { %s12512_s19 = scalar_select %p10370_p6, 1, 0 }
  0x17   : > { %12511 = sst [smem:[#allocation22_spill]] %s12510_s18  ;;  %p12489_p9 = scmp.eq.s32.totalorder %s10349_s29, 0 }
  0x18   : > { %12513 = sst [smem:[#allocation23_spill]] %s12512_s19  ;;  %p10377_p10 = pnand %p6525_p7, %p338_p8 }
  0x19   : > { %s10244_s21 = smov [#allocation5]   ;;  %s10245_s24 = smov [#allocation8]  }
  0x1a   : > { %s12514_s20 = scalar_select %p10377_p10, 1, 0 }
  0x1b   : > { %s363_s22 = sshll.u32 %s10244_s21, 4  ;;  %p9948_p11 = pneg %p10377_p10  ;;  %s10383_s22 = int_to_ptr.vmem [resolvable:$true] %s363_s22 }
  0x1c   : > { %s398_s30 = sshll.u32 %s10245_s24, 4  ;;  %s10246_s15 = smov [#allocation2]   ;;  %s10391_s30 = int_to_ptr.vmem [resolvable:$true] %s398_s30 }
  0x1d   : > { %p10387_p12 = pnand %p12489_p9, %p9948_p11  ;;  %s10393_s16 = sshll.u32 %s10246_s15, 4  ;;  %s351_s16 = int_to_ptr.vmem [resolvable:$true] %s10393_s16 }
  0x1e   : > { %s12516_s2 = sld [smem:[#allocation24_spill]] }
  0x1f   : > { %p10403_p0 = pneg %p10387_p12 }
  0x24   : > { %s10028_s21 = scalar_lea.hbm %s12516_s2, 2304 }
  0x25   : > { %p10029_p13 = scmp.ne.s32.totalorder %s12516_s2, %s10028_s21  ;;  %p10035_p3 = scmp.lt.u32.totalorder %s10028_s21, %s12516_s2 }
  0x27   : > { %p10031_p1 = pnand %p10403_p0, %p10029_p13 }
  0x29   : > { %p10032_p2 = pneg %p10031_p1 }
  0x2b   : > { %p10037_p4 = pnand %p10035_p3, %p10032_p2 }
  0x2d   : > { %10040 = shalt.err (!%p10037_p4)
}
  0x2e   : > { %s10041_s27 = scalar_lea.vmem %s10383_s22, 2304  ;;  %p10049_p9 = scmp.lt.s32.totalorder %s10383_s22, %s10383_s22 }
  0x2f   : > { %p10042_p7 = scmp.ne.s32.totalorder %s10383_s22, %s10041_s27  ;;  %p10050_p6 = scmp.lt.s32.totalorder %s10041_s27, %s10041_s27 }
  0x31   : > { %p10044_p8 = pnand %p10042_p7, %p10403_p0  ;;  %p10051_p13 = por %p10050_p6, %p10049_p9 }
  0x33   : > { %p10045_p11 = pneg %p10044_p8 }
  0x35   : > { %p10052_p1 = pnand %p10051_p13, %p10045_p11 }
  0x37   : > { %10055 = shalt.err (!%p10052_p1)
}
  0x38   : > { %s12497_s14 = smov 128   ;;  %s12499_s17 = smov 8  }
  0x39   : > { %9954 = dma.hbm_to_vmem [thread:$0]  (!%p10387_p12), %s12516_s2, 2304, %s10383_s22, [#allocation6], %s12497_s14, %s12497_s14, %s12499_s17  }
  0x3a   : > { %s12518_s7 = sld [smem:[#allocation25_spill]] }
  0x40   : > { %s10056_s27 = scalar_lea.hbm %s12518_s7, 9216 }
  0x41   : > { %p10057_p6 = scmp.ne.s32.totalorder %s12518_s7, %s10056_s27  ;;  %p10063_p3 = scmp.lt.u32.totalorder %s10056_s27, %s12518_s7 }
  0x43   : > { %p10059_p9 = pnand %p10057_p6, %p10403_p0 }
  0x45   : > { %p10060_p2 = pneg %p10059_p9 }
  0x47   : > { %p10065_p4 = pnand %p10063_p3, %p10060_p2 }
  0x49   : > { %10068 = shalt.err (!%p10065_p4)
}
  0x4a   : > { %s10069_s22 = scalar_lea.vmem %s10391_s30, 9216  ;;  %p10077_p13 = scmp.lt.s32.totalorder %s10391_s30, %s10391_s30 }
  0x4b   : > { %p10070_p7 = scmp.ne.s32.totalorder %s10391_s30, %s10069_s22  ;;  %p10078_p1 = scmp.lt.s32.totalorder %s10069_s22, %s10069_s22 }
  0x4d   : > { %p10072_p8 = pnand %p10070_p7, %p10403_p0  ;;  %p10079_p6 = por %p10078_p1, %p10077_p13 }
  0x4f   : > { %p10073_p11 = pneg %p10072_p8 }
  0x51   : > { %p10080_p9 = pnand %p10079_p6, %p10073_p11 }
  0x53   : > { %10083 = shalt.err (!%p10080_p9)
}
  0x54   : > { %9960 = dma.hbm_to_vmem [thread:$0]  (!%p10387_p12), %s12518_s7, 9216, %s10391_s30, [#allocation9], %s12497_s14, %s12497_s14, %s12499_s17  }
  0x55   : > { %s10084_s19 = scalar_lea.hbm %s12471_s1, 16128 }
  0x56   : > { %p10085_p2 = scmp.ne.s32.totalorder %s12471_s1, %s10084_s19  ;;  %p10091_p7 = scmp.lt.u32.totalorder %s10084_s19, %s12471_s1 }
  0x58   : > { %p10087_p3 = pnand %p10085_p2, %p10403_p0 }
  0x5a   : > { %p10088_p4 = pneg %p10087_p3 }
  0x5c   : > { %p10093_p8 = pnand %p10091_p7, %p10088_p4 }
  0x5e   : > { %10096 = shalt.err (!%p10093_p8)
}
  0x5f   : > { %s10097_s22 = scalar_lea.vmem %s351_s16, 16128  ;;  %p10105_p6 = scmp.lt.s32.totalorder %s351_s16, %s351_s16 }
  0x60   : > { %p10098_p11 = scmp.ne.s32.totalorder %s351_s16, %s10097_s22  ;;  %p10106_p9 = scmp.lt.s32.totalorder %s10097_s22, %s10097_s22 }
  0x62   : > { %p10100_p13 = pnand %p10098_p11, %p10403_p0  ;;  %p10107_p5 = por %p10106_p9, %p10105_p6 }
  0x64   : > { %p10101_p1 = pneg %p10100_p13 }
  0x66   : > { %p10108_p10 = pnand %p10107_p5, %p10101_p1 }
  0x68   : > { %10111 = shalt.err (!%p10108_p10)
}
  0x69   : > { %s10249_s30 = smov 256   ;;  %s10250_s13 = smov 16  }
  0x6a   : > { %9951 = dma.hbm_to_vmem [thread:$0]  (!%p10387_p12), %s12471_s1, 16128, %s351_s16, [#allocation3], %s10249_s30, %s10249_s30, %s10250_s13  }
  0x6b   : > { %s10251_s18 = smov [#allocation7]   ;;  %s10252_s21 = smov [#allocation10]  }
  0x6c   : > { %s382_s19 = sshll.u32 %s10251_s18, 4  ;;  %s420_s24 = sshll.u32 %s10252_s21, 4  ;;  %s383_s19 = int_to_ptr.vmem [resolvable:$true] %s382_s19  ;;  %s421_s24 = int_to_ptr.vmem [resolvable:$true] %s420_s24 }
  0x6d   : > { %s10112_s22 = scalar_lea.hbm %s12475_s5, 4608 }
  0x6e   : > { %p10113_p5 = scmp.ne.s32.totalorder %s12475_s5, %s10112_s22  ;;  %p10119_p3 = scmp.lt.u32.totalorder %s10112_s22, %s12475_s5 }
  0x70   : > { %p10115_p10 = pnand %p10113_p5, %p10403_p0 }
  0x72   : > { %p10116_p2 = pneg %p10115_p10 }
  0x74   : > { %p10121_p4 = pnand %p10119_p3, %p10116_p2 }
  0x76   : > { %10124 = shalt.err (!%p10121_p4)
}
  0x77   : > { %s10125_s16 = scalar_lea.vmem %s383_s19, 4608  ;;  %p10133_p13 = scmp.lt.s32.totalorder %s383_s19, %s383_s19 }
  0x78   : > { %p10126_p7 = scmp.ne.s32.totalorder %s383_s19, %s10125_s16  ;;  %p10134_p1 = scmp.lt.s32.totalorder %s10125_s16, %s10125_s16 }
  0x7a   : > { %p10128_p8 = pnand %p10126_p7, %p10403_p0  ;;  %p10135_p6 = por %p10134_p1, %p10133_p13 }
  0x7c   : > { %p10129_p11 = pneg %p10128_p8 }
  0x7e   : > { %p10136_p9 = pnand %p10135_p6, %p10129_p11 }
  0x80   : > { %10139 = shalt.err (!%p10136_p9)
}
  0x81   : > { %s12519_s14 = smov 8   ;;  %s12520_s17 = smov 128  }
  0x82   : > { %9957 = dma.hbm_to_vmem [thread:$0]  (!%p10387_p12), %s12475_s5, 4608, %s383_s19, [#allocation6], %s12520_s17, %s12520_s17, %s12519_s14  }
  0x83   : > { %s10140_s26 = scalar_lea.hbm %s12481_s11, 2048 }
  0x84   : > { %p10141_p5 = scmp.ne.s32.totalorder %s12481_s11, %s10140_s26  ;;  %p10147_p3 = scmp.lt.u32.totalorder %s10140_s26, %s12481_s11 }
  0x86   : > { %p10143_p10 = pnand %p10141_p5, %p10403_p0 }
  0x88   : > { %p10144_p2 = pneg %p10143_p10 }
  0x8a   : > { %p10149_p4 = pnand %p10147_p3, %p10144_p2 }
  0x8c   : > { %10152 = shalt.err (!%p10149_p4)
}
  0x8d   : > { %s10153_s27 = scalar_lea.vmem %s421_s24, 2048  ;;  %p10161_p13 = scmp.lt.s32.totalorder %s421_s24, %s421_s24 }
  0x8e   : > { %p10154_p7 = scmp.ne.s32.totalorder %s421_s24, %s10153_s27  ;;  %p10162_p1 = scmp.lt.s32.totalorder %s10153_s27, %s10153_s27 }
  0x90   : > { %p10156_p8 = pnand %p10154_p7, %p10403_p0  ;;  %p10163_p6 = por %p10162_p1, %p10161_p13 }
  0x92   : > { %p10157_p11 = pneg %p10156_p8 }
  0x94   : > { %p10164_p9 = pnand %p10163_p6, %p10157_p11 }
  0x96   : > { %10167 = shalt.err (!%p10164_p9)
}
  0x97   : > { %9963 = dma.hbm_to_vmem [thread:$0]  (!%p10387_p12), %s12481_s11, 2048, %s421_s24, [#allocation9], %s12520_s17, %s12520_s17, %s12519_s14  }
  0x98   : > { %p12521_p5 = scmp.ne.s32.totalorder %s12514_s20, 0 }
  0x99   : > { %p12522_p0 = scmp.eq.s32.totalorder (!%p12521_p5), %s10349_s29, 0 }
  0x9a   : > { %447 = sbr.rel (%p12521_p5) target bundleno = 4013 (0xfad), region = 72 }
  0xa1   : > { %10213 = dma.done.wait (%p12522_p0), [#allocation3], 16128   ;;  %p12523_p10 = pmov %p12522_p0 }
  0xa2   : > { %p12524_p2 = pmov %p12522_p0 }
  0xa3   : > { %10215 = vsyncadd (%p12523_p10), [#allocation3], 4294951168 }
  0xa4   : > { %10217 = dma.done.wait (%p12524_p2), [#allocation6], 6912   ;;  %p12525_p3 = pmov %p12522_p0 }
  0xa5   : > { %p12526_p4 = pmov %p12522_p0 }
  0xa6   : > { %10219 = vsyncadd (%p12525_p3), [#allocation6], 4294960384 }
  0xa7   : > { %10221 = dma.done.wait (%p12526_p4), [#allocation9], 11264   ;;  %p12527_p12 = pmov %p12522_p0 }
  0xa8   : > { %v10253_v0 = vmov 0.0|0.0   ;;  %p506_p7 = scmp.lt.s32.totalorder %s10349_s29, 1  ;;  %vm10254_vm0 = vmmov 0   ;;  %v10255_v1 = vmov 0.0   ;;  %vm621_vm1 = vcmask 1040384   ;;  %v536_v2 = vld [vmem:[%s12473_s3] sm:$0xff] }
  0xa9   : > { %10223 = vsyncadd (%p12527_p12), [#allocation9], 4294956032  ;;  %8836 = vmatprep.subr.bf16.mxu0 %v10253_v0  ;;  %8918 = vmatprep.subr.bf16.mxu1 %v10253_v0  ;;  %v537_v3 = vld [vmem:[%s12473_s3 + $0x8] sm:$0x1]  ;;  %vm10256_vm2 = vmmov 1   ;;  %vm545_vm4 = vcmask 72704  }
  0xaa   : > { %7581 = vmatprep.mubr.msk.f32.mxu0 %vm10254_vm0, %v10255_v1  ;;  %7693 = vmatprep.mubr.msk.f32.mxu1 %vm10254_vm0, %v10255_v1  ;;  %s507_s25 = scalar_select %p506_p7, %s10349_s29, 1  ;;  %vm8838_vm3 = vmpackc.low %vm621_vm1, %vm10256_vm2  ;;  %v8837_v4 = vpack.c.bf16 %v537_v3, %v536_v2  ;;  %v841_v30 = vld [vmem:[#allocation2 + $0x8] sm:$0xff]  ;;  %vm854_vm5 = vcmask 556032   ;;  %v10651_v31 = vld [vmem:[%s12474_s4] ss:$0 sm:$0xff]  ;;  %vm876_vm6 = vcmask 1043456  }
  0xab   : > { %vm1125_vm7 = vcmask 261120   ;;  %vm3274_vm8 = vcmask 400384   ;;  %vm3460_vm9 = vcmask 523264   ;;  %s12528_s22 = sld [smem:[#allocation17_spill]]  ;;  %s6988_s23 = sshll.u32 %s10349_s29, 4 }
  0xac   : > { %s9925_s20 = smul.u32 200, %s507_s25  ;;  %8839 = vmatpush3.bf16.msk.msra.mxu0 %vm8838_vm3, %v8837_v4  ;;  %s12529_s25 = sld [smem:[#allocation22_spill]] }
  0xad   : > { %8840 = vmatprep.subr.bf16.mxu0 %v10253_v0  ;;  %s12530_s2 = sld [smem:[#allocation26_spill]]  ;;  %s10257_s29 = smov [#allocation11]  }
  0xae   : > { %s10546_s7 = scalar_lea.vmem %s12470_s0, %s9925_s20  ;;  %s10172_s26 = sshll.u32 %s10257_s29, 4  ;;  %s10173_s26 = int_to_ptr.vmem [resolvable:$false] %s10172_s26 }
  0xaf   : > { %v511_v5 = vld [vmem:[%s10546_s7] sm:$0xff]  ;;  %v512_v6 = vld [vmem:[%s10546_s7 + $0x8] sm:$0xff]  ;;  %v513_v7 = vld [vmem:[%s10546_s7 + $0x10] sm:$0xff]  ;;  %s10174_s28 = scalar_lea.vmem %s10173_s26, 32 }
  0xb0   : > { %7582 = vmatmul.mubr.msk.f32.vlgmr.msra.gmra.mrb[0].mxu0 %vm545_vm4, %v511_v5  ;;  %v514_v8 = vld [vmem:[%s10546_s7 + $0x18] sm:$0xff]  ;;  %v515_v9 = vld [vmem:[%s10546_s7 + $0x20] sm:$0xff]  ;;  %v516_v10 = vld [vmem:[%s10546_s7 + $0x28] sm:$0xff] }
  0xb1   : > { %7584 = vmatprep.mubr.msk.f32.mxu0 %vm10254_vm0, %v10255_v1  ;;  %v517_v11 = vld [vmem:[%s10546_s7 + $0x30] sm:$0xff]  ;;  %v518_v12 = vld [vmem:[%s10546_s7 + $0x38] sm:$0xff]  ;;  %v519_v13 = vld [vmem:[%s10546_s7 + $0x40] sm:$0xff]  ;;  %s504_s20 = sand.u32 1, %s12528_s22  }
  0xb2   : > { %v520_v14 = vld [vmem:[%s10546_s7 + $0x48] sm:$0xff]  ;;  %v521_v15 = vld [vmem:[%s10546_s7 + $0x50] sm:$0xff]  ;;  %v522_v16 = vld [vmem:[%s10546_s7 + $0x58] sm:$0xff]  ;;  %s505_s24 = scalar_lea.vmem [#allocation11], %s504_s20  ;;  %s6407_s30 = scalar_lea.sflag [#allocation4], %s504_s20 }
  0xb3   : > { %v523_v17 = vld [vmem:[%s10546_s7 + $0x60] sm:$0xff]  ;;  %v524_v18 = vld [vmem:[%s10546_s7 + $0x68] sm:$0xff]  ;;  %v525_v19 = vld [vmem:[%s10546_s7 + $0x70] sm:$0xff]  ;;  %s6419_s16 = sshll.u32 %s505_s24, 4  ;;  %p12531_p11 = scmp.ne.s32.totalorder %s12529_s25, 0  ;;  %s12430_s16 = int_to_ptr.vmem [resolvable:$true] %s6419_s16 }
  0xb4   : > { %7585 = vmatmul.mubr.msk.f32.gmra.mrb[2].mxu0 %vm545_vm4, %v512_v6  ;;  %v526_v20 = vld [vmem:[%s10546_s7 + $0x78] sm:$0xff]  ;;  %v527_v21 = vld [vmem:[%s10546_s7 + $0x80] sm:$0xff]  ;;  %v528_v22 = vld [vmem:[%s10546_s7 + $0x88] sm:$0xff]  ;;  %s10168_s13 = scalar_lea.vmem %s12430_s16, 16  ;;  %p10175_p6 = scmp.lt.s32.totalorder %s12430_s16, %s10173_s26 }
  0xb5   : > { %7587 = vmatprep.mubr.msk.f32.mxu0 %vm10254_vm0, %v10255_v1  ;;  %v529_v23 = vld [vmem:[%s10546_s7 + $0x90] sm:$0xff]  ;;  %v530_v24 = vld [vmem:[%s10546_s7 + $0x98] sm:$0xff]  ;;  %v531_v25 = vld [vmem:[%s10546_s7 + $0xa0] sm:$0xff]  ;;  %p10169_p8 = scmp.ne.s32.totalorder %s12430_s16, %s10168_s13  ;;  %p10176_p9 = scmp.lt.s32.totalorder %s10174_s28, %s10168_s13 }
  0xb6   : > { %v532_v26 = vld [vmem:[%s10546_s7 + $0xa8] sm:$0xff]  ;;  %v533_v27 = vld [vmem:[%s10546_s7 + $0xb0] sm:$0xff]  ;;  %v534_v28 = vld [vmem:[%s10546_s7 + $0xb8] sm:$0xff] }
  0xb7   : > { %v535_v29 = vld [vmem:[%s10546_s7 + $0xc0] sm:$0xf]  ;;  %s12428_s7 = scalar_lea.hbm %s12530_s2, %s6988_s23  ;;  %p10170_p13 = pnand %p10169_p8, %p12531_p11 }
  0xb8   : > { %7588 = vmatmul.mubr.msk.f32.gmra.mrb[4].mxu0 %vm545_vm4, %v513_v7  ;;  %p10177_p5 = por %p10176_p9, %p10175_p6 }
  0xb9   : > { %7590 = vmatprep.mubr.msk.f32.mxu0 %vm10254_vm0, %v10255_v1  ;;  %p10171_p1 = pneg %p10170_p13 }
  0xbb   : > { %p10178_p0 = pnand %p10177_p5, %p10171_p1 }
  0xbc   : > { %7591 = vmatmul.mubr.msk.f32.gmra.mrb[6].mxu0 %vm545_vm4, %v514_v8 }
  0xbd   : > { %7593 = vmatprep.mubr.msk.f32.mxu0 %vm10254_vm0, %v10255_v1 }
  0xc0   : > { %7594 = vmatmul.mubr.msk.f32.gmra.mrb[8].mxu0 %vm545_vm4, %v515_v9 }
  0xc1   : > { %7596 = vmatprep.mubr.msk.f32.mxu0 %vm10254_vm0, %v10255_v1 }
  0xc4   : > { %7597 = vmatmul.mubr.msk.f32.gmra.mrb[10].mxu0 %vm545_vm4, %v516_v10 }
  0xc5   : > { %7599 = vmatprep.mubr.msk.f32.mxu0 %vm10254_vm0, %v10255_v1 }
  0xc8   : > { %7600 = vmatmul.mubr.msk.f32.gmra.mrb[12].mxu0 %vm545_vm4, %v517_v11 }
  0xc9   : > { %7602 = vmatprep.mubr.msk.f32.mxu0 %vm10254_vm0, %v10255_v1 }
  0xcc   : > { %7603 = vmatmul.mubr.msk.f32.gmra.mrb[14].mxu0 %vm545_vm4, %v518_v12 }
  0xcd   : > { %7605 = vmatprep.mubr.msk.f32.mxu0 %vm10254_vm0, %v10255_v1 }
  0xd0   : > { %7606 = vmatmul.mubr.msk.f32.gmra.mrb[16].mxu0 %vm545_vm4, %v519_v13 }
  0xd1   : > { %7608 = vmatprep.mubr.msk.f32.mxu0 %vm10254_vm0, %v10255_v1 }
  0xd4   : > { %7609 = vmatmul.mubr.msk.f32.gmra.mrb[18].mxu0 %vm545_vm4, %v520_v14 }
  0xd5   : > { %7611 = vmatprep.mubr.msk.f32.mxu0 %vm10254_vm0, %v10255_v1 }
  0xd8   : > { %7612 = vmatmul.mubr.msk.f32.gmra.mrb[20].mxu0 %vm545_vm4, %v521_v15 }
  0xd9   : > { %7614 = vmatprep.mubr.msk.f32.mxu0 %vm10254_vm0, %v10255_v1 }
  0xdc   : > { %7615 = vmatmul.mubr.msk.f32.gmra.mrb[22].mxu0 %vm545_vm4, %v522_v16 }
  0xdd   : > { %7617 = vmatprep.mubr.msk.f32.mxu0 %vm10254_vm0, %v10255_v1 }
  0xe0   : > { %7618 = vmatmul.mubr.msk.f32.gmra.mrb[24].mxu0 %vm545_vm4, %v523_v17 }
  0xe1   : > { %7620 = vmatprep.mubr.msk.f32.mxu0 %vm10254_vm0, %v10255_v1 }
  0xe4   : > { %7621 = vmatmul.mubr.msk.f32.gmra.mrb[26].mxu0 %vm545_vm4, %v524_v18 }
  0xe5   : > { %7623 = vmatprep.mubr.msk.f32.mxu0 %vm10254_vm0, %v10255_v1 }
  0xe8   : > { %7624 = vmatmul.mubr.msk.f32.gmra.mrb[28].mxu0 %vm545_vm4, %v525_v19 }
  0xe9   : > { %7626 = vmatprep.mubr.msk.f32.mxu0 %vm10254_vm0, %v10255_v1 }
  0xec   : > { %7627 = vmatmul.mubr.msk.f32.gmra.mrb[30].mxu0 %vm545_vm4, %v526_v20 }
  0xed   : > { %7629 = vmatprep.mubr.msk.f32.mxu0 %vm10254_vm0, %v10255_v1 }
  0xf0   : > { %7630 = vmatmul.mubr.msk.f32.gmra.mrb[32].mxu0 %vm545_vm4, %v527_v21 }
  0xf1   : > { %7632 = vmatprep.mubr.msk.f32.mxu0 %vm10254_vm0, %v10255_v1 }
  0xf4   : > { %7633 = vmatmul.mubr.msk.f32.gmra.mrb[34].mxu0 %vm545_vm4, %v528_v22 }
  0xf5   : > { %7635 = vmatprep.mubr.msk.f32.mxu0 %vm10254_vm0, %v10255_v1 }
  0xf8   : > { %7636 = vmatmul.mubr.msk.f32.gmra.mrb[36].mxu0 %vm545_vm4, %v529_v23 }
  0xf9   : > { %7638 = vmatprep.mubr.msk.f32.mxu0 %vm10254_vm0, %v10255_v1 }
  0xfc   : > { %7639 = vmatmul.mubr.msk.f32.gmra.mrb[38].mxu0 %vm545_vm4, %v530_v24 }
  0xfd   : > { %7641 = vmatprep.mubr.msk.f32.mxu0 %vm10254_vm0, %v10255_v1 }
 0x100   : > { %7642 = vmatmul.mubr.msk.f32.gmra.mrb[40].mxu0 %vm545_vm4, %v531_v25 }
 0x101   : > { %7644 = vmatprep.mubr.msk.f32.mxu0 %vm10254_vm0, %v10255_v1 }
 0x104   : > { %7645 = vmatmul.mubr.msk.f32.gmra.mrb[42].mxu0 %vm545_vm4, %v532_v26  ;;  %v980_v26 = vld [vmem:[#allocation7] sm:$0xff] }
 0x105   : > { %7647 = vmatprep.mubr.msk.f32.mxu0 %vm10254_vm0, %v10255_v1 }
 0x108   : > { %7648 = vmatmul.mubr.msk.f32.gmra.mrb[44].mxu0 %vm545_vm4, %v533_v27  ;;  %v981_v27 = vld [vmem:[#allocation7 + $0x8] sm:$0xff] }
 0x109   : > { %7650 = vmatprep.mubr.msk.f32.mxu0 %vm10254_vm0, %v10255_v1 }
 0x10c   : > { %7651 = vmatmul.mubr.msk.f32.gmra.mrb[46].mxu0 %vm545_vm4, %v534_v28  ;;  %v982_v28 = vld [vmem:[#allocation7 + $0x10] sm:$0xff] }
 0x10d   : > { %7653 = vmatprep.mubr.msk.f32.mxu0 %vm10254_vm0, %v10255_v1 }
 0x110   : > { %7654 = vmatmul.mubr.msk.f32.gmra.mrb[48].mxu0 %vm545_vm4, %v535_v29 }
 0x111   : > { %6567 = vmatprep.mubr.msk.f32.mxu0 %vm854_vm5, %v841_v30  ;;  %v8919_v30 = vpack.c.bf16 %v981_v27, %v980_v26 }
 0x113   : > { %8920 = vmatpush3.bf16.msra.mxu1 %v8919_v30 }
 0x114   : > { %8921 = vmatprep.subr.bf16.mxu1 %v10253_v0 }
 0x183   : > { %v691_v32 = vpop.f32.mrb[0].mxu0 }
 0x184   : > { %v7583_v33 = vpop.f32.mrb[1].mxu0  ;;  %v692_v34 = vadd.f32 %v10651_v31, %v691_v32  ;;  %v983_v32 = vld [vmem:[#allocation7 + $0x18] sm:$0xff] }
 0x186   : > { %v815_v38 = vmax.f32 %v692_v34, 0.0 }
 0x187   : > { %v696_v35 = vpop.f32.mrb[2].mxu0 }
 0x188   : > { %v697_v36 = vadd.f32 %v10651_v31, %v696_v35  ;;  %v7586_v37 = vpop.f32.mrb[3].mxu0 }
 0x18a   : > { %v816_v39 = vmax.f32 %v697_v36, 0.0  ;;  %v8922_v36 = vpack.c.bf16 %v983_v32, %v982_v28 }
 0x18b   : > { %v701_v40 = vpop.f32.mrb[4].mxu0 }
 0x18c   : > { %v10655_v41 = vpack.c.bf16 %v816_v39, %v815_v38  ;;  %v7589_v42 = vpop.f32.mrb[5].mxu0  ;;  %v702_v43 = vadd.f32 %v10651_v31, %v701_v40  ;;  %8923 = vmatpush3.bf16.msra.mxu1 %v8922_v36  ;;  %v845_v36 = vld [vmem:[#allocation2 + $0x28] sm:$0xff] }
 0x18d   : > { %8960 = vmatprep.subr.bf16.mxu1 %v10253_v0 }
 0x18e   : > { %8842 = vmatpush1.bf16.msra.mxu0 %v10655_v41  ;;  %v817_v47 = vmax.f32 %v702_v43, 0.0 }
 0x18f   : > { %v706_v44 = vpop.f32.mrb[6].mxu0  ;;  %8843 = vmatprep.subr.bf16.mxu0 %v10253_v0 }
 0x190   : > { %v707_v45 = vadd.f32 %v10651_v31, %v706_v44  ;;  %v7592_v46 = vpop.f32.mrb[7].mxu0 }
 0x192   : > { %v818_v48 = vmax.f32 %v707_v45, 0.0 }
 0x193   : > { %v711_v49 = vpop.f32.mrb[8].mxu0 }
 0x194   : > { %v10661_v50 = vpack.c.bf16 %v818_v48, %v817_v47  ;;  %v7595_v51 = vpop.f32.mrb[9].mxu0  ;;  %v712_v52 = vadd.f32 %v10651_v31, %v711_v49 }
 0x196   : > { %8845 = vmatpush1.bf16.msra.mxu0 %v10661_v50  ;;  %v819_v56 = vmax.f32 %v712_v52, 0.0 }
 0x197   : > { %v716_v53 = vpop.f32.mrb[10].mxu0  ;;  %8846 = vmatprep.subr.bf16.mxu0 %v10253_v0 }
 0x198   : > { %v717_v54 = vadd.f32 %v10651_v31, %v716_v53  ;;  %v7598_v55 = vpop.f32.mrb[11].mxu0 }
 0x19a   : > { %v820_v57 = vmax.f32 %v717_v54, 0.0 }
 0x19b   : > { %v721_v58 = vpop.f32.mrb[12].mxu0 }
 0x19c   : > { %v10667_v59 = vpack.c.bf16 %v820_v57, %v819_v56  ;;  %v7601_v60 = vpop.f32.mrb[13].mxu0  ;;  %v722_v61 = vadd.f32 %v10651_v31, %v721_v58 }
 0x19e   : > { %8848 = vmatpush1.bf16.msra.mxu0 %v10667_v59  ;;  %v821_v3 = vmax.f32 %v722_v61, 0.0 }
 0x19f   : > { %v726_v62 = vpop.f32.mrb[14].mxu0  ;;  %8849 = vmatprep.subr.bf16.mxu0 %v10253_v0 }
 0x1a0   : > { %v727_v63 = vadd.f32 %v10651_v31, %v726_v62  ;;  %v7604_v2 = vpop.f32.mrb[15].mxu0 }
 0x1a2   : > { %v822_v4 = vmax.f32 %v727_v63, 0.0 }
 0x1a3   : > { %v731_v5 = vpop.f32.mrb[16].mxu0 }
 0x1a4   : > { %v10673_v6 = vpack.c.bf16 %v822_v4, %v821_v3  ;;  %v7607_v7 = vpop.f32.mrb[17].mxu0  ;;  %v732_v8 = vadd.f32 %v10651_v31, %v731_v5 }
 0x1a6   : > { %8851 = vmatpush1.bf16.msra.mxu0 %v10673_v6  ;;  %v823_v12 = vmax.f32 %v732_v8, 0.0 }
 0x1a7   : > { %v736_v9 = vpop.f32.mrb[18].mxu0  ;;  %8852 = vmatprep.subr.bf16.mxu0 %v10253_v0 }
 0x1a8   : > { %v737_v10 = vadd.f32 %v10651_v31, %v736_v9  ;;  %v7610_v11 = vpop.f32.mrb[19].mxu0 }
 0x1aa   : > { %v824_v13 = vmax.f32 %v737_v10, 0.0 }
 0x1ab   : > { %v741_v14 = vpop.f32.mrb[20].mxu0 }
 0x1ac   : > { %v10679_v15 = vpack.c.bf16 %v824_v13, %v823_v12  ;;  %v7613_v16 = vpop.f32.mrb[21].mxu0  ;;  %v742_v17 = vadd.f32 %v10651_v31, %v741_v14 }
 0x1ae   : > { %8854 = vmatpush1.bf16.msra.mxu0 %v10679_v15  ;;  %v825_v21 = vmax.f32 %v742_v17, 0.0 }
 0x1af   : > { %v746_v18 = vpop.f32.mrb[22].mxu0  ;;  %8855 = vmatprep.subr.bf16.mxu0 %v10253_v0 }
 0x1b0   : > { %v747_v19 = vadd.f32 %v10651_v31, %v746_v18  ;;  %v7616_v20 = vpop.f32.mrb[23].mxu0 }
 0x1b2   : > { %v826_v22 = vmax.f32 %v747_v19, 0.0 }
 0x1b3   : > { %v751_v23 = vpop.f32.mrb[24].mxu0 }
 0x1b4   : > { %v10685_v24 = vpack.c.bf16 %v826_v22, %v825_v21  ;;  %v7619_v25 = vpop.f32.mrb[25].mxu0  ;;  %v752_v29 = vadd.f32 %v10651_v31, %v751_v23 }
 0x1b6   : > { %8857 = vmatpush1.bf16.msra.mxu0 %v10685_v24  ;;  %v827_v37 = vmax.f32 %v752_v29, 0.0 }
 0x1b7   : > { %v756_v33 = vpop.f32.mrb[26].mxu0  ;;  %8858 = vmatprep.subr.bf16.mxu0 %v10253_v0 }
 0x1b8   : > { %v757_v34 = vadd.f32 %v10651_v31, %v756_v33  ;;  %v7622_v35 = vpop.f32.mrb[27].mxu0 }
 0x1b9   : > { %v843_v35 = vld [vmem:[#allocation2 + $0x18] sm:$0xff] }
 0x1ba   : > { %v828_v38 = vmax.f32 %v757_v34, 0.0  ;;  %v840_v34 = vld [vmem:[#allocation2] sm:$0xff] }
 0x1bb   : > { %v761_v39 = vpop.f32.mrb[28].mxu0 }
 0x1bc   : > { %v10692_v40 = vpack.c.bf16 %v828_v38, %v827_v37  ;;  %v7625_v42 = vpop.f32.mrb[29].mxu0  ;;  %v762_v43 = vadd.f32 %v10651_v31, %v761_v39  ;;  %v844_v37 = vld [vmem:[#allocation2 + $0x20] sm:$0xff]  ;;  %v847_v38 = vld [vmem:[#allocation2 + $0x38] sm:$0xff]  ;;  %v846_v39 = vld [vmem:[#allocation2 + $0x30] sm:$0xff] }
 0x1bd   : > { %v849_v42 = vld [vmem:[#allocation2 + $0x48] sm:$0xff] }
 0x1be   : > { %8860 = vmatpush1.bf16.msra.mxu0 %v10692_v40  ;;  %v829_v47 = vmax.f32 %v762_v43, 0.0  ;;  %v848_v43 = vld [vmem:[#allocation2 + $0x40] sm:$0xff] }
 0x1bf   : > { %v766_v44 = vpop.f32.mrb[30].mxu0  ;;  %8861 = vmatprep.subr.bf16.mxu0 %v10253_v0 }
 0x1c0   : > { %v767_v45 = vadd.f32 %v10651_v31, %v766_v44  ;;  %v7628_v46 = vpop.f32.mrb[31].mxu0  ;;  %v851_v44 = vld [vmem:[#allocation2 + $0x58] sm:$0xff] }
 0x1c1   : > { %v853_v46 = vld [vmem:[#allocation2 + $0x68] sm:$0x1] }
 0x1c2   : > { %v830_v48 = vmax.f32 %v767_v45, 0.0  ;;  %v850_v45 = vld [vmem:[#allocation2 + $0x50] sm:$0xff] }
 0x1c3   : > { %v771_v49 = vpop.f32.mrb[32].mxu0 }
 0x1c4   : > { %v10699_v51 = vpack.c.bf16 %v830_v48, %v829_v47  ;;  %v7631_v52 = vpop.f32.mrb[33].mxu0  ;;  %v772_v53 = vadd.f32 %v10651_v31, %v771_v49  ;;  %v852_v47 = vld [vmem:[#allocation2 + $0x60] sm:$0x1]  ;;  %v986_v48 = vld [vmem:[#allocation2 + $0x78] sm:$0xff]  ;;  %v985_v49 = vld [vmem:[#allocation2 + $0x70] sm:$0xff] }
 0x1c5   : > { %v988_v52 = vld [vmem:[#allocation2 + $0x88] sm:$0xff] }
 0x1c6   : > { %8863 = vmatpush1.bf16.msra.mxu0 %v10699_v51  ;;  %v831_v57 = vmax.f32 %v772_v53, 0.0  ;;  %v987_v53 = vld [vmem:[#allocation2 + $0x80] sm:$0xff] }
 0x1c7   : > { %v776_v54 = vpop.f32.mrb[34].mxu0  ;;  %8864 = vmatprep.subr.bf16.mxu0 %v10253_v0 }
 0x1c8   : > { %v777_v55 = vadd.f32 %v10651_v31, %v776_v54  ;;  %v7634_v56 = vpop.f32.mrb[35].mxu0  ;;  %v990_v54 = vld [vmem:[#allocation2 + $0x98] sm:$0xff] }
 0x1c9   : > { %v992_v56 = vld [vmem:[#allocation2 + $0xa8] sm:$0xff] }
 0x1ca   : > { %v832_v58 = vmax.f32 %v777_v55, 0.0  ;;  %v989_v55 = vld [vmem:[#allocation2 + $0x90] sm:$0xff] }
 0x1cb   : > { %v781_v60 = vpop.f32.mrb[36].mxu0 }
 0x1cc   : > { %v10705_v61 = vpack.c.bf16 %v832_v58, %v831_v57  ;;  %v7637_v62 = vpop.f32.mrb[37].mxu0  ;;  %v782_v63 = vadd.f32 %v10651_v31, %v781_v60  ;;  %v991_v57 = vld [vmem:[#allocation2 + $0xa0] sm:$0xff]  ;;  %v994_v58 = vld [vmem:[#allocation2 + $0xb8] sm:$0xff]  ;;  %v993_v60 = vld [vmem:[#allocation2 + $0xb0] sm:$0xff] }
 0x1cd   : > { %v996_v62 = vld [vmem:[#allocation2 + $0xc8] sm:$0xff] }
 0x1ce   : > { %8866 = vmatpush1.bf16.msra.mxu0 %v10705_v61  ;;  %v833_v5 = vmax.f32 %v782_v63, 0.0  ;;  %v995_v63 = vld [vmem:[#allocation2 + $0xc0] sm:$0xff] }
 0x1cf   : > { %v786_v2 = vpop.f32.mrb[38].mxu0  ;;  %8867 = vmatprep.subr.bf16.mxu0 %v10253_v0 }
 0x1d0   : > { %v787_v3 = vadd.f32 %v10651_v31, %v786_v2  ;;  %v7640_v4 = vpop.f32.mrb[39].mxu0  ;;  %v998_v2 = vld [vmem:[#allocation2 + $0xd8] sm:$0x1] }
 0x1d1   : > { %v1121_v4 = vld [vmem:[#allocation7 + $0x20] sm:$0xff] }
 0x1d2   : > { %v834_v7 = vmax.f32 %v787_v3, 0.0  ;;  %v997_v3 = vld [vmem:[#allocation2 + $0xd0] sm:$0x1] }
 0x1d3   : > { %v791_v8 = vpop.f32.mrb[40].mxu0 }
 0x1d4   : > { %v10711_v9 = vpack.c.bf16 %v834_v7, %v833_v5  ;;  %v7643_v10 = vpop.f32.mrb[41].mxu0  ;;  %v792_v11 = vadd.f32 %v10651_v31, %v791_v8  ;;  %v1122_v5 = vld [vmem:[#allocation7 + $0x28] sm:$0xff]  ;;  %v1123_v8 = vld [vmem:[#allocation7 + $0x30] sm:$0xff] }
 0x1d5   : > { %v8913_v7 = vpack.c.bf16 %v1122_v5, %v1121_v4  ;;  %v1124_v10 = vld [vmem:[#allocation7 + $0x38] sm:$0xff]  ;;  %v1638_v4 = vld [vmem:[#allocation2 + $0x150] sm:$0xff]  ;;  %v1641_v5 = vld [vmem:[#allocation2 + $0x168] sm:$0xff] }
 0x1d6   : > { %8869 = vmatpush1.bf16.msra.mxu0 %v10711_v9  ;;  %v835_v16 = vmax.f32 %v792_v11, 0.0  ;;  %v8916_v11 = vpack.c.bf16 %v1124_v10, %v1123_v8  ;;  %v1643_v8 = vld [vmem:[#allocation2 + $0x178] sm:$0xff]  ;;  %v1642_v10 = vld [vmem:[#allocation2 + $0x170] sm:$0xff] }
 0x1d7   : > { %v796_v12 = vpop.f32.mrb[42].mxu0  ;;  %8870 = vmatprep.subr.bf16.mxu0 %v10253_v0 }
 0x1d8   : > { %v797_v13 = vadd.f32 %v10651_v31, %v796_v12  ;;  %v7646_v14 = vpop.f32.mrb[43].mxu0 }
 0x1da   : > { %v836_v17 = vmax.f32 %v797_v13, 0.0 }
 0x1db   : > { %v801_v18 = vpop.f32.mrb[44].mxu0 }
 0x1dc   : > { %v10717_v19 = vpack.c.bf16 %v836_v17, %v835_v16  ;;  %v7649_v20 = vpop.f32.mrb[45].mxu0  ;;  %v802_v21 = vadd.f32 %v10651_v31, %v801_v18 }
 0x1de   : > { %8872 = vmatpush1.bf16.msra.mxu0 %v10717_v19  ;;  %v837_v26 = vmax.f32 %v802_v21, 0.0 }
 0x1df   : > { %v806_v22 = vpop.f32.mrb[46].mxu0  ;;  %8873 = vmatprep.subr.bf16.mxu0 %v10253_v0 }
 0x1e0   : > { %v807_v23 = vadd.f32 %v10651_v31, %v806_v22  ;;  %v7652_v25 = vpop.f32.mrb[47].mxu0 }
 0x1e2   : > { %v838_v27 = vmax.f32 %v807_v23, 0.0 }
 0x1e3   : > { %v811_v28 = vpop.f32.mrb[48].mxu0 }
 0x1e4   : > { %v10723_v29 = vpack.c.bf16 %v838_v27, %v837_v26  ;;  %v812_v30 = vadd.f32 %v10651_v31, %v811_v28  ;;  %v7655_v32 = vpop.f32.mrb[49].mxu0  ;;  %v842_v31 = vld [vmem:[#allocation2 + $0x10] sm:$0xff] }
 0x1e6   : > { %v10726_v33 = vmax.f32 %v812_v30, 0.0  ;;  %8875 = vmatpush1.bf16.msra.mxu0 %v10723_v29 }
 0x1e7   : > { %928 = vmatprep.subr.mxu0 %v10255_v1 }
 0x1ea   : > { %6566 = vmatpush1.msk.msra.mxu0 %vm876_vm6, %v10726_v33 }
 0x1eb   : > { %8876 = vmatprep.subr.bf16.mxu0 %v10253_v0  ;;  %945 = vmatmul.mubr.f32.vlgmr.msra.gmra.mrb[50].mxu0 %v840_v34 }
 0x1ec   : > { %8878 = vmatpush1.bf16.msra.mxu0 %v10655_v41  ;;  %6568 = vmatprep.mubr.msk.f32.mxu0 %vm854_vm5, %v843_v35 }
 0x1ed   : > { %8879 = vmatprep.subr.bf16.mxu0 %v10253_v0 }
 0x1ef   : > { %950 = vmatmul.mubr.f32.gmra.mrb[52].mxu0 %v842_v31 }
 0x1f0   : > { %8881 = vmatpush1.bf16.msra.mxu0 %v10661_v50  ;;  %6569 = vmatprep.mubr.msk.f32.mxu0 %vm854_vm5, %v845_v36 }
 0x1f1   : > { %8882 = vmatprep.subr.bf16.mxu0 %v10253_v0 }
 0x1f3   : > { %955 = vmatmul.mubr.f32.gmra.mrb[54].mxu0 %v844_v37 }
 0x1f4   : > { %8884 = vmatpush1.bf16.msra.mxu0 %v10667_v59  ;;  %6570 = vmatprep.mubr.msk.f32.mxu0 %vm854_vm5, %v847_v38 }
 0x1f5   : > { %8885 = vmatprep.subr.bf16.mxu0 %v10253_v0 }
 0x1f7   : > { %960 = vmatmul.mubr.f32.gmra.mrb[56].mxu0 %v846_v39 }
 0x1f8   : > { %8887 = vmatpush1.bf16.msra.mxu0 %v10673_v6  ;;  %6571 = vmatprep.mubr.msk.f32.mxu0 %vm854_vm5, %v849_v42 }
 0x1f9   : > { %8888 = vmatprep.subr.bf16.mxu0 %v10253_v0 }
 0x1fb   : > { %965 = vmatmul.mubr.f32.gmra.mrb[58].mxu0 %v848_v43 }
 0x1fc   : > { %8890 = vmatpush1.bf16.msra.mxu0 %v10679_v15  ;;  %6572 = vmatprep.mubr.msk.f32.mxu0 %vm854_vm5, %v851_v44 }
 0x1fd   : > { %8891 = vmatprep.subr.bf16.mxu0 %v10253_v0 }
 0x1ff   : > { %970 = vmatmul.mubr.f32.gmra.mrb[60].mxu0 %v850_v45  ;;  %v1370_v45 = vld [vmem:[#allocation2 + $0xe8] sm:$0xff] }
 0x200   : > { %8893 = vmatpush1.bf16.msra.mxu0 %v10685_v24  ;;  %6573 = vmatprep.mubr.msk.f32.mxu0 %vm854_vm5, %v853_v46 }
 0x201   : > { %8894 = vmatprep.subr.bf16.mxu0 %v10253_v0 }
 0x203   : > { %975 = vmatmul.mubr.f32.gmra.mrb[62].mxu0 %v852_v47 }
 0x204   : > { %8896 = vmatpush1.bf16.msra.mxu0 %v10692_v40  ;;  %6575 = vmatprep.mubr.msk.f32.mxu0 %vm854_vm5, %v986_v48  ;;  %v1369_v48 = vld [vmem:[#allocation2 + $0xe0] sm:$0xff] }
 0x205   : > { %8897 = vmatprep.subr.bf16.mxu0 %v10253_v0 }
 0x208   : > { %8899 = vmatpush1.bf16.msra.mxu0 %v10699_v51 }
 0x209   : > { %8900 = vmatprep.subr.bf16.mxu0 %v10253_v0 }
 0x20c   : > { %8902 = vmatpush1.bf16.msra.mxu0 %v10705_v61 }
 0x20d   : > { %8903 = vmatprep.subr.bf16.mxu0 %v10253_v0 }
 0x210   : > { %8905 = vmatpush1.bf16.msra.mxu0 %v10711_v9 }
 0x211   : > { %8906 = vmatprep.subr.bf16.mxu0 %v10253_v0 }
 0x214   : > { %8908 = vmatpush1.bf16.msra.mxu0 %v10717_v19 }
 0x215   : > { %8909 = vmatprep.subr.bf16.mxu0 %v10253_v0 }
 0x218   : > { %8911 = vmatpush1.bf16.msra.mxu0 %v10723_v29 }
 0x219   : > { %1068 = vmatprep.subr.mxu0 %v10255_v1 }
 0x21c   : > { %6574 = vmatpush1.msk.msra.mxu0 %vm876_vm6, %v10726_v33 }
 0x21d   : > { %1085 = vmatmul.mubr.f32.vlgmr.msra.gmra.mrb[64].mxu0 %v985_v49  ;;  %8912 = vmatprep.subr.bf16.mxu0 %v10253_v0  ;;  %v1372_v49 = vld [vmem:[#allocation2 + $0xf8] sm:$0xff] }
 0x21e   : > { %6576 = vmatprep.mubr.msk.f32.mxu0 %vm854_vm5, %v988_v52  ;;  %8914 = vmatpush3.bf16.msra.mxu0 %v8913_v7  ;;  %v1371_v52 = vld [vmem:[#allocation2 + $0xf0] sm:$0xff]  ;;  %v1640_v7 = vld [vmem:[#allocation2 + $0x160] sm:$0xff] }
 0x21f   : > { %8915 = vmatprep.subr.bf16.mxu0 %v10253_v0 }
 0x221   : > { %1090 = vmatmul.mubr.f32.gmra.mrb[66].mxu0 %v987_v53  ;;  %v1374_v53 = vld [vmem:[#allocation2 + $0x108] sm:$0xff] }
 0x222   : > { %6577 = vmatprep.mubr.msk.f32.mxu0 %vm854_vm5, %v990_v54  ;;  %8917 = vmatpush3.bf16.msra.mxu0 %v8916_v11  ;;  %v1373_v54 = vld [vmem:[#allocation2 + $0x100] sm:$0xff]  ;;  %v1645_v11 = vld [vmem:[#allocation2 + $0x188] sm:$0xff] }
 0x223   : > { %8924 = vmatprep.subr.bf16.mxu0 %v10253_v0 }
 0x225   : > { %1095 = vmatmul.mubr.f32.gmra.mrb[68].mxu0 %v989_v55  ;;  %v1376_v55 = vld [vmem:[#allocation2 + $0x118] sm:$0xff] }
 0x226   : > { %6578 = vmatprep.mubr.msk.f32.mxu0 %vm854_vm5, %v992_v56  ;;  %v1375_v56 = vld [vmem:[#allocation2 + $0x110] sm:$0xff] }
 0x229   : > { %1100 = vmatmul.mubr.f32.gmra.mrb[70].mxu0 %v991_v57  ;;  %v1378_v57 = vld [vmem:[#allocation2 + $0x128] sm:$0xff] }
 0x22a   : > { %6579 = vmatprep.mubr.msk.f32.mxu0 %vm854_vm5, %v994_v58  ;;  %v1377_v58 = vld [vmem:[#allocation2 + $0x120] sm:$0xff] }
 0x22d   : > { %1105 = vmatmul.mubr.f32.gmra.mrb[72].mxu0 %v993_v60  ;;  %v1380_v60 = vld [vmem:[#allocation2 + $0x138] sm:$0xff] }
 0x22e   : > { %6580 = vmatprep.mubr.msk.f32.mxu0 %vm854_vm5, %v996_v62  ;;  %v1379_v62 = vld [vmem:[#allocation2 + $0x130] sm:$0xff] }
 0x231   : > { %1110 = vmatmul.mubr.f32.gmra.mrb[74].mxu0 %v995_v63  ;;  %v1382_v63 = vld [vmem:[#allocation2 + $0x148] sm:$0x1] }
 0x232   : > { %6581 = vmatprep.mubr.msk.f32.mxu0 %vm854_vm5, %v998_v2  ;;  %v1381_v2 = vld [vmem:[#allocation2 + $0x140] sm:$0x1] }
 0x235   : > { %1115 = vmatmul.mubr.f32.gmra.mrb[76].mxu0 %v997_v3  ;;  %v1639_v3 = vld [vmem:[#allocation2 + $0x158] sm:$0xff] }
 0x236   : > { %7664 = vmatprep.mubr.msk.f32.mxu0 %vm10254_vm0, %v10255_v1 }
 0x2be   : > { %v946_v12 = vpop.f32.mrb[50].mxu0 }
 0x2bf   : > { %v948_v13 = vpop.f32.mrb[51].mxu0  ;;  %7694 = vmatmul.mubr.msk.f32.vlgmr.msra.gmra.mrb[0].mxu1 %vm1125_vm7, %v946_v12  ;;  %v1505_v12 = vld [vmem:[#allocation7 + $0x40] sm:$0xff] }
 0x2c0   : > { %7696 = vmatprep.mubr.msk.f32.mxu1 %vm10254_vm0, %v10255_v1  ;;  %v1506_v13 = vld [vmem:[#allocation7 + $0x48] sm:$0xff] }
 0x2c2   : > { %v951_v14 = vpop.f32.mrb[52].mxu0 }
 0x2c3   : > { %v953_v16 = vpop.f32.mrb[53].mxu0  ;;  %7697 = vmatmul.mubr.msk.f32.gmra.mrb[2].mxu1 %vm1125_vm7, %v951_v14  ;;  %v1507_v14 = vld [vmem:[#allocation7 + $0x50] sm:$0xff] }
 0x2c4   : > { %7699 = vmatprep.mubr.msk.f32.mxu1 %vm10254_vm0, %v10255_v1  ;;  %v1644_v16 = vld [vmem:[#allocation2 + $0x180] sm:$0xff] }
 0x2c6   : > { %v956_v17 = vpop.f32.mrb[54].mxu0 }
 0x2c7   : > { %v958_v18 = vpop.f32.mrb[55].mxu0  ;;  %7700 = vmatmul.mubr.msk.f32.gmra.mrb[4].mxu1 %vm1125_vm7, %v956_v17  ;;  %v8961_v17 = vpack.c.bf16 %v1506_v13, %v1505_v12 }
 0x2c8   : > { %7702 = vmatprep.mubr.msk.f32.mxu1 %vm10254_vm0, %v10255_v1  ;;  %v1508_v18 = vld [vmem:[#allocation7 + $0x58] sm:$0xff] }
 0x2c9   : > { %8962 = vmatpush3.bf16.msra.mxu1 %v8961_v17 }
 0x2ca   : > { %v961_v20 = vpop.f32.mrb[56].mxu0  ;;  %8963 = vmatprep.subr.bf16.mxu1 %v10253_v0 }
 0x2cb   : > { %v963_v21 = vpop.f32.mrb[57].mxu0  ;;  %7703 = vmatmul.mubr.msk.f32.gmra.mrb[6].mxu1 %vm1125_vm7, %v961_v20  ;;  %v1647_v20 = vld [vmem:[#allocation2 + $0x198] sm:$0xff] }
 0x2cc   : > { %7705 = vmatprep.mubr.msk.f32.mxu1 %vm10254_vm0, %v10255_v1  ;;  %v8964_v21 = vpack.c.bf16 %v1508_v18, %v1507_v14 }
 0x2ce   : > { %v966_v22 = vpop.f32.mrb[58].mxu0  ;;  %8965 = vmatpush3.bf16.msra.mxu1 %v8964_v21 }
 0x2cf   : > { %v968_v23 = vpop.f32.mrb[59].mxu0  ;;  %7706 = vmatmul.mubr.msk.f32.gmra.mrb[8].mxu1 %vm1125_vm7, %v966_v22  ;;  %v1646_v22 = vld [vmem:[#allocation2 + $0x190] sm:$0xff]  ;;  %9002 = vmatprep.subr.bf16.mxu1 %v10253_v0 }
 0x2d0   : > { %7708 = vmatprep.mubr.msk.f32.mxu1 %vm10254_vm0, %v10255_v1  ;;  %v1649_v23 = vld [vmem:[#allocation2 + $0x1a8] sm:$0xff] }
 0x2d2   : > { %v971_v25 = vpop.f32.mrb[60].mxu0 }
 0x2d3   : > { %v973_v26 = vpop.f32.mrb[61].mxu0  ;;  %7709 = vmatmul.mubr.msk.f32.gmra.mrb[10].mxu1 %vm1125_vm7, %v971_v25  ;;  %v1648_v25 = vld [vmem:[#allocation2 + $0x1a0] sm:$0xff] }
 0x2d4   : > { %7711 = vmatprep.mubr.msk.f32.mxu1 %vm10254_vm0, %v10255_v1  ;;  %v1651_v26 = vld [vmem:[#allocation2 + $0x1b8] sm:$0x1] }
 0x2d6   : > { %v976_v27 = vpop.f32.mrb[62].mxu0 }
 0x2d7   : > { %v978_v28 = vpop.f32.mrb[63].mxu0  ;;  %7712 = vmatmul.mubr.msk.f32.gmra.mrb[12].mxu1 %vm1125_vm7, %v976_v27  ;;  %v1650_v27 = vld [vmem:[#allocation2 + $0x1b0] sm:$0x1] }
 0x2d8   : > { %7722 = vmatprep.mubr.msk.f32.mxu1 %vm10254_vm0, %v10255_v1  ;;  %v1908_v28 = vld [vmem:[#allocation2 + $0x1c8] sm:$0xff] }
 0x2f0   : > { %v1086_v30 = vpop.f32.mrb[64].mxu0 }
 0x2f1   : > { %v1088_v32 = vpop.f32.mrb[65].mxu0  ;;  %7665 = vmatmul.mubr.msk.f32.vlgmr.msra.gmra.mrb[78].mxu0 %vm1125_vm7, %v1086_v30  ;;  %v1907_v30 = vld [vmem:[#allocation2 + $0x1c0] sm:$0xff] }
 0x2f2   : > { %8926 = vmatpush1.bf16.msra.mxu0 %v10655_v41  ;;  %7667 = vmatprep.mubr.msk.f32.mxu0 %vm10254_vm0, %v10255_v1  ;;  %v1910_v32 = vld [vmem:[#allocation2 + $0x1d8] sm:$0xff] }
 0x2f3   : > { %8927 = vmatprep.subr.bf16.mxu0 %v10253_v0 }
 0x2f4   : > { %v1091_v34 = vpop.f32.mrb[66].mxu0 }
 0x2f5   : > { %7668 = vmatmul.mubr.msk.f32.gmra.mrb[80].mxu0 %vm1125_vm7, %v1091_v34  ;;  %v1093_v35 = vpop.f32.mrb[67].mxu0  ;;  %v1909_v34 = vld [vmem:[#allocation2 + $0x1d0] sm:$0xff] }
 0x2f6   : > { %8929 = vmatpush1.bf16.msra.mxu0 %v10661_v50  ;;  %7670 = vmatprep.mubr.msk.f32.mxu0 %vm10254_vm0, %v10255_v1  ;;  %v1912_v35 = vld [vmem:[#allocation2 + $0x1e8] sm:$0xff] }
 0x2f7   : > { %8930 = vmatprep.subr.bf16.mxu0 %v10253_v0 }
 0x2f8   : > { %v1096_v31 = vpop.f32.mrb[68].mxu0 }
 0x2f9   : > { %7671 = vmatmul.mubr.msk.f32.gmra.mrb[82].mxu0 %vm1125_vm7, %v1096_v31  ;;  %v1098_v36 = vpop.f32.mrb[69].mxu0  ;;  %v1911_v31 = vld [vmem:[#allocation2 + $0x1e0] sm:$0xff] }
 0x2fa   : > { %8932 = vmatpush1.bf16.msra.mxu0 %v10667_v59  ;;  %7673 = vmatprep.mubr.msk.f32.mxu0 %vm10254_vm0, %v10255_v1  ;;  %v1914_v36 = vld [vmem:[#allocation2 + $0x1f8] sm:$0xff] }
 0x2fb   : > { %8933 = vmatprep.subr.bf16.mxu0 %v10253_v0 }
 0x2fc   : > { %v1101_v37 = vpop.f32.mrb[70].mxu0 }
 0x2fd   : > { %7674 = vmatmul.mubr.msk.f32.gmra.mrb[84].mxu0 %vm1125_vm7, %v1101_v37  ;;  %v1103_v38 = vpop.f32.mrb[71].mxu0  ;;  %v1913_v37 = vld [vmem:[#allocation2 + $0x1f0] sm:$0xff] }
 0x2fe   : > { %8935 = vmatpush1.bf16.msra.mxu0 %v10673_v6  ;;  %7676 = vmatprep.mubr.msk.f32.mxu0 %vm10254_vm0, %v10255_v1  ;;  %v1916_v38 = vld [vmem:[#allocation2 + $0x208] sm:$0xff] }
 0x2ff   : > { %8936 = vmatprep.subr.bf16.mxu0 %v10253_v0 }
 0x300   : > { %v1106_v39 = vpop.f32.mrb[72].mxu0 }
 0x301   : > { %7677 = vmatmul.mubr.msk.f32.gmra.mrb[86].mxu0 %vm1125_vm7, %v1106_v39  ;;  %v1108_v42 = vpop.f32.mrb[73].mxu0 }
 0x302   : > { %8938 = vmatpush1.bf16.msra.mxu0 %v10679_v15  ;;  %7679 = vmatprep.mubr.msk.f32.mxu0 %vm10254_vm0, %v10255_v1 }
 0x303   : > { %8939 = vmatprep.subr.bf16.mxu0 %v10253_v0 }
 0x304   : > { %v1111_v43 = vpop.f32.mrb[74].mxu0 }
 0x305   : > { %7680 = vmatmul.mubr.msk.f32.gmra.mrb[88].mxu0 %vm1125_vm7, %v1111_v43  ;;  %v1113_v44 = vpop.f32.mrb[75].mxu0  ;;  %v1915_v43 = vld [vmem:[#allocation2 + $0x200] sm:$0xff] }
 0x306   : > { %8941 = vmatpush1.bf16.msra.mxu0 %v10685_v24  ;;  %7682 = vmatprep.mubr.msk.f32.mxu0 %vm10254_vm0, %v10255_v1  ;;  %v1918_v44 = vld [vmem:[#allocation2 + $0x218] sm:$0xff] }
 0x307   : > { %8942 = vmatprep.subr.bf16.mxu0 %v10253_v0 }
 0x308   : > { %v1116_v46 = vpop.f32.mrb[76].mxu0 }
 0x309   : > { %7683 = vmatmul.mubr.msk.f32.gmra.mrb[90].mxu0 %vm1125_vm7, %v1116_v46  ;;  %v1118_v47 = vpop.f32.mrb[77].mxu0 }
 0x30a   : > { %8944 = vmatpush1.bf16.msra.mxu0 %v10692_v40  ;;  %6597 = vmatprep.mubr.msk.f32.mxu0 %vm854_vm5, %v1370_v45  ;;  %v1917_v47 = vld [vmem:[#allocation2 + $0x210] sm:$0xff] }
 0x30b   : > { %8945 = vmatprep.subr.bf16.mxu0 %v10253_v0 }
 0x30e   : > { %8947 = vmatpush1.bf16.msra.mxu0 %v10699_v51 }
 0x30f   : > { %8948 = vmatprep.subr.bf16.mxu0 %v10253_v0 }
 0x312   : > { %8950 = vmatpush1.bf16.msra.mxu0 %v10705_v61 }
 0x313   : > { %8951 = vmatprep.subr.bf16.mxu0 %v10253_v0 }
 0x316   : > { %8953 = vmatpush1.bf16.msra.mxu0 %v10711_v9 }
 0x317   : > { %8954 = vmatprep.subr.bf16.mxu0 %v10253_v0 }
 0x31a   : > { %8956 = vmatpush1.bf16.msra.mxu0 %v10717_v19 }
 0x31b   : > { %8957 = vmatprep.subr.bf16.mxu0 %v10253_v0 }
 0x31e   : > { %8959 = vmatpush1.bf16.msra.mxu0 %v10723_v29 }
 0x31f   : > { %1452 = vmatprep.subr.mxu0 %v10255_v1 }
 0x322   : > { %6596 = vmatpush1.msk.msra.mxu0 %vm876_vm6, %v10726_v33 }
 0x323   : > { %1469 = vmatmul.mubr.f32.vlgmr.msra.gmra.mrb[92].mxu0 %v1369_v48  ;;  %8966 = vmatprep.subr.bf16.mxu0 %v10253_v0  ;;  %v1920_v48 = vld [vmem:[#allocation2 + $0x228] sm:$0x1] }
 0x324   : > { %8968 = vmatpush1.bf16.msra.mxu0 %v10655_v41  ;;  %6598 = vmatprep.mubr.msk.f32.mxu0 %vm854_vm5, %v1372_v49 }
 0x325   : > { %8969 = vmatprep.subr.bf16.mxu0 %v10253_v0 }
 0x327   : > { %1474 = vmatmul.mubr.f32.gmra.mrb[94].mxu0 %v1371_v52 }
 0x328   : > { %8971 = vmatpush1.bf16.msra.mxu0 %v10661_v50  ;;  %6599 = vmatprep.mubr.msk.f32.mxu0 %vm854_vm5, %v1374_v53  ;;  %v1919_v53 = vld [vmem:[#allocation2 + $0x220] sm:$0x1] }
 0x329   : > { %8972 = vmatprep.subr.bf16.mxu0 %v10253_v0 }
 0x32b   : > { %1479 = vmatmul.mubr.f32.gmra.mrb[96].mxu0 %v1373_v54 }
 0x32c   : > { %8974 = vmatpush1.bf16.msra.mxu0 %v10667_v59  ;;  %6600 = vmatprep.mubr.msk.f32.mxu0 %vm854_vm5, %v1376_v55 }
 0x32d   : > { %8975 = vmatprep.subr.bf16.mxu0 %v10253_v0 }
 0x32f   : > { %1484 = vmatmul.mubr.f32.gmra.mrb[98].mxu0 %v1375_v56 }
 0x330   : > { %8977 = vmatpush1.bf16.msra.mxu0 %v10673_v6  ;;  %6601 = vmatprep.mubr.msk.f32.mxu0 %vm854_vm5, %v1378_v57 }
 0x331   : > { %8978 = vmatprep.subr.bf16.mxu0 %v10253_v0 }
 0x333   : > { %1489 = vmatmul.mubr.f32.gmra.mrb[100].mxu0 %v1377_v58 }
 0x334   : > { %8980 = vmatpush1.bf16.msra.mxu0 %v10679_v15  ;;  %6602 = vmatprep.mubr.msk.f32.mxu0 %vm854_vm5, %v1380_v60 }
 0x335   : > { %8981 = vmatprep.subr.bf16.mxu0 %v10253_v0 }
 0x337   : > { %1494 = vmatmul.mubr.f32.gmra.mrb[102].mxu0 %v1379_v62 }
 0x338   : > { %8983 = vmatpush1.bf16.msra.mxu0 %v10685_v24  ;;  %6603 = vmatprep.mubr.msk.f32.mxu0 %vm854_vm5, %v1382_v63 }
 0x339   : > { %8984 = vmatprep.subr.bf16.mxu0 %v10253_v0 }
 0x33b   : > { %1499 = vmatmul.mubr.f32.gmra.mrb[104].mxu0 %v1381_v2  ;;  %v2043_v2 = vld [vmem:[#allocation7 + $0x80] sm:$0xff] }
 0x33c   : > { %8986 = vmatpush1.bf16.msra.mxu0 %v10692_v40  ;;  %6612 = vmatprep.mubr.msk.f32.mxu0 %vm854_vm5, %v1639_v3  ;;  %v2044_v3 = vld [vmem:[#allocation7 + $0x88] sm:$0xff] }
 0x33d   : > { %8987 = vmatprep.subr.bf16.mxu0 %v10253_v0 }
 0x340   : > { %8989 = vmatpush1.bf16.msra.mxu0 %v10699_v51 }
 0x341   : > { %8990 = vmatprep.subr.bf16.mxu0 %v10253_v0 }
 0x344   : > { %8992 = vmatpush1.bf16.msra.mxu0 %v10705_v61 }
 0x345   : > { %8993 = vmatprep.subr.bf16.mxu0 %v10253_v0 }
 0x348   : > { %8995 = vmatpush1.bf16.msra.mxu0 %v10711_v9 }
 0x349   : > { %8996 = vmatprep.subr.bf16.mxu0 %v10253_v0 }
 0x34c   : > { %8998 = vmatpush1.bf16.msra.mxu0 %v10717_v19 }
 0x34d   : > { %8999 = vmatprep.subr.bf16.mxu0 %v10253_v0 }
 0x350   : > { %9001 = vmatpush1.bf16.msra.mxu0 %v10723_v29 }
 0x351   : > { %1721 = vmatprep.subr.mxu0 %v10255_v1 }
 0x354   : > { %6611 = vmatpush1.msk.msra.mxu0 %vm876_vm6, %v10726_v33 }
 0x355   : > { %1738 = vmatmul.mubr.f32.vlgmr.msra.gmra.mrb[106].mxu0 %v1638_v4  ;;  %9008 = vmatprep.subr.bf16.mxu0 %v10253_v0  ;;  %v2045_v4 = vld [vmem:[#allocation7 + $0x90] sm:$0xff] }
 0x356   : > { %9010 = vmatpush1.bf16.msra.mxu0 %v10655_v41  ;;  %6613 = vmatprep.mubr.msk.f32.mxu0 %vm854_vm5, %v1641_v5  ;;  %v9045_v5 = vpack.c.bf16 %v2044_v3, %v2043_v2 }
 0x357   : > { %9011 = vmatprep.subr.bf16.mxu0 %v10253_v0 }
 0x359   : > { %1743 = vmatmul.mubr.f32.gmra.mrb[108].mxu0 %v1640_v7  ;;  %v2046_v7 = vld [vmem:[#allocation7 + $0x98] sm:$0xff] }
 0x35a   : > { %9013 = vmatpush1.bf16.msra.mxu0 %v10661_v50  ;;  %6614 = vmatprep.mubr.msk.f32.mxu0 %vm854_vm5, %v1643_v8 }
 0x35b   : > { %9014 = vmatprep.subr.bf16.mxu0 %v10253_v0 }
 0x35d   : > { %1748 = vmatmul.mubr.f32.gmra.mrb[110].mxu0 %v1642_v10  ;;  %v9048_v10 = vpack.c.bf16 %v2046_v7, %v2045_v4 }
 0x35e   : > { %9016 = vmatpush1.bf16.msra.mxu0 %v10667_v59  ;;  %6615 = vmatprep.mubr.msk.f32.mxu0 %vm854_vm5, %v1645_v11 }
 0x35f   : > { %9017 = vmatprep.subr.bf16.mxu0 %v10253_v0 }
 0x361   : > { %1753 = vmatmul.mubr.f32.gmra.mrb[112].mxu0 %v1644_v16 }
 0x362   : > { %9019 = vmatpush1.bf16.msra.mxu0 %v10673_v6  ;;  %6616 = vmatprep.mubr.msk.f32.mxu0 %vm854_vm5, %v1647_v20 }
 0x363   : > { %9020 = vmatprep.subr.bf16.mxu0 %v10253_v0 }
 0x365   : > { %1758 = vmatmul.mubr.f32.gmra.mrb[114].mxu0 %v1646_v22 }
 0x366   : > { %9022 = vmatpush1.bf16.msra.mxu0 %v10679_v15  ;;  %6617 = vmatprep.mubr.msk.f32.mxu0 %vm854_vm5, %v1649_v23 }
 0x367   : > { %9023 = vmatprep.subr.bf16.mxu0 %v10253_v0 }
 0x369   : > { %1763 = vmatmul.mubr.f32.gmra.mrb[116].mxu0 %v1648_v25 }
 0x36a   : > { %9025 = vmatpush1.bf16.msra.mxu0 %v10685_v24  ;;  %6618 = vmatprep.mubr.msk.f32.mxu0 %vm854_vm5, %v1651_v26 }
 0x36b   : > { %9026 = vmatprep.subr.bf16.mxu0 %v10253_v0 }
 0x36d   : > { %1768 = vmatmul.mubr.f32.gmra.mrb[118].mxu0 %v1650_v27 }
 0x36e   : > { %9028 = vmatpush1.bf16.msra.mxu0 %v10692_v40  ;;  %6627 = vmatprep.mubr.msk.f32.mxu0 %vm854_vm5, %v1908_v28 }
 0x36f   : > { %9029 = vmatprep.subr.bf16.mxu0 %v10253_v0 }
 0x372   : > { %9031 = vmatpush1.bf16.msra.mxu0 %v10699_v51 }
 0x373   : > { %9032 = vmatprep.subr.bf16.mxu0 %v10253_v0 }
 0x376   : > { %9034 = vmatpush1.bf16.msra.mxu0 %v10705_v61 }
 0x377   : > { %9035 = vmatprep.subr.bf16.mxu0 %v10253_v0 }
 0x37a   : > { %9037 = vmatpush1.bf16.msra.mxu0 %v10711_v9 }
 0x37b   : > { %9038 = vmatprep.subr.bf16.mxu0 %v10253_v0 }
 0x37e   : > { %9040 = vmatpush1.bf16.msra.mxu0 %v10717_v19 }
 0x37f   : > { %9041 = vmatprep.subr.bf16.mxu0 %v10253_v0 }
 0x382   : > { %9043 = vmatpush1.bf16.msra.mxu0 %v10723_v29 }
 0x383   : > { %1990 = vmatprep.subr.mxu0 %v10255_v1 }
 0x386   : > { %6626 = vmatpush1.msk.msra.mxu0 %vm876_vm6, %v10726_v33 }
 0x387   : > { %2007 = vmatmul.mubr.f32.vlgmr.msra.gmra.mrb[120].mxu0 %v1907_v30  ;;  %9044 = vmatprep.subr.bf16.mxu0 %v10253_v0 }
 0x388   : > { %6628 = vmatprep.mubr.msk.f32.mxu0 %vm854_vm5, %v1910_v32  ;;  %9046 = vmatpush3.bf16.msra.mxu0 %v9045_v5 }
 0x389   : > { %9047 = vmatprep.subr.bf16.mxu0 %v10253_v0 }
 0x38b   : > { %2012 = vmatmul.mubr.f32.gmra.mrb[122].mxu0 %v1909_v34 }
 0x38c   : > { %6629 = vmatprep.mubr.msk.f32.mxu0 %vm854_vm5, %v1912_v35  ;;  %9049 = vmatpush3.bf16.msra.mxu0 %v9048_v10 }
 0x38d   : > { %9050 = vmatprep.subr.bf16.mxu0 %v10253_v0 }
 0x38f   : > { %2017 = vmatmul.mubr.f32.gmra.mrb[124].mxu0 %v1911_v31 }
 0x390   : > { %6630 = vmatprep.mubr.msk.f32.mxu0 %vm854_vm5, %v1914_v36  ;;  %v1774_v36 = vld [vmem:[#allocation7 + $0x60] sm:$0xff] }
 0x392   : > { %v1334_v39 = vpop.f32.mrb[0].mxu1 }
 0x393   : > { %2022 = vmatmul.mubr.f32.gmra.mrb[126].mxu0 %v1913_v37  ;;  %v7695_v42 = vpop.f32.mrb[1].mxu1  ;;  %v1775_v37 = vld [vmem:[#allocation7 + $0x68] sm:$0xff] }
 0x394   : > { %6631 = vmatprep.mubr.msk.f32.mxu0 %vm854_vm5, %v1916_v38  ;;  %v9003_v38 = vpack.c.bf16 %v1775_v37, %v1774_v36  ;;  %v1777_v42 = vld [vmem:[#allocation7 + $0x78] sm:$0xff] }
 0x396   : > { %v1339_v45 = vpop.f32.mrb[2].mxu1 }
 0x397   : > { %2027 = vmatmul.mubr.f32.gmra.mrb[128].mxu0 %v1915_v43  ;;  %v7698_v46 = vpop.f32.mrb[3].mxu1 }
 0x398   : > { %6632 = vmatprep.mubr.msk.f32.mxu0 %vm854_vm5, %v1918_v44 }
 0x39a   : > { %v1344_v49 = vpop.f32.mrb[4].mxu1 }
 0x39b   : > { %2032 = vmatmul.mubr.f32.gmra.mrb[130].mxu0 %v1917_v47  ;;  %v7701_v52 = vpop.f32.mrb[5].mxu1 }
 0x39c   : > { %6633 = vmatprep.mubr.msk.f32.mxu0 %vm854_vm5, %v1920_v48 }
 0x39e   : > { %v1349_v54 = vpop.f32.mrb[6].mxu1 }
 0x39f   : > { %2037 = vmatmul.mubr.f32.gmra.mrb[132].mxu0 %v1919_v53  ;;  %v7704_v55 = vpop.f32.mrb[7].mxu1 }
 0x3a0   : > { %7780 = vmatprep.mubr.msk.f32.mxu0 %vm10254_vm0, %v10255_v1 }
 0x3a2   : > { %v1354_v56 = vpop.f32.mrb[8].mxu1 }
 0x3a3   : > { %v7707_v57 = vpop.f32.mrb[9].mxu1 }
 0x3a6   : > { %v1359_v58 = vpop.f32.mrb[10].mxu1 }
 0x3a7   : > { %v7710_v60 = vpop.f32.mrb[11].mxu1 }
 0x3aa   : > { %v1364_v62 = vpop.f32.mrb[12].mxu1 }
 0x3ab   : > { %v7713_v63 = vpop.f32.mrb[13].mxu1 }
 0x3c4   : > { %v1213_v8 = vpop.f32.mrb[78].mxu0 }
 0x3c5   : > { %v10923_v11 = vadd.f32 %v1334_v39, %v1213_v8  ;;  %v7666_v12 = vpop.f32.mrb[79].mxu0  ;;  %v1776_v39 = vld [vmem:[#allocation7 + $0x70] sm:$0xff] }
 0x3c8   : > { %v1218_v13 = vpop.f32.mrb[80].mxu0 }
 0x3c9   : > { %v10926_v14 = vadd.f32 %v1339_v45, %v1218_v13  ;;  %v7669_v16 = vpop.f32.mrb[81].mxu0  ;;  %v9006_v45 = vpack.c.bf16 %v1777_v42, %v1776_v39  ;;  %v2177_v42 = vld [vmem:[#allocation2 + $0x238] sm:$0xff] }
 0x3cc   : > { %v1223_v17 = vpop.f32.mrb[82].mxu0 }
 0x3cd   : > { %v10929_v18 = vadd.f32 %v1344_v49, %v1223_v17  ;;  %v7672_v20 = vpop.f32.mrb[83].mxu0 }
 0x3d0   : > { %v1228_v21 = vpop.f32.mrb[84].mxu0 }
 0x3d1   : > { %v10931_v22 = vadd.f32 %v1349_v54, %v1228_v21  ;;  %v7675_v23 = vpop.f32.mrb[85].mxu0 }
 0x3d4   : > { %v1233_v25 = vpop.f32.mrb[86].mxu0 }
 0x3d5   : > { %v10933_v26 = vadd.f32 %v1354_v56, %v1233_v25  ;;  %v7678_v27 = vpop.f32.mrb[87].mxu0 }
 0x3d8   : > { %v1238_v28 = vpop.f32.mrb[88].mxu0 }
 0x3d9   : > { %v10935_v30 = vadd.f32 %v1359_v58, %v1238_v28  ;;  %v7681_v32 = vpop.f32.mrb[89].mxu0 }
 0x3dc   : > { %v1243_v34 = vpop.f32.mrb[90].mxu0 }
 0x3dd   : > { %v10937_v35 = vadd.f32 %v1364_v62, %v1243_v34  ;;  %v7684_v31 = vpop.f32.mrb[91].mxu0 }
 0x3f6   : > { %v1470_v43 = vpop.f32.mrb[92].mxu0 }
 0x3f7   : > { %7723 = vmatmul.mubr.msk.f32.vlgmr.msra.gmra.mrb[14].mxu1 %vm1125_vm7, %v1470_v43  ;;  %v1472_v44 = vpop.f32.mrb[93].mxu0 }
 0x3f8   : > { %7725 = vmatprep.mubr.msk.f32.mxu1 %vm10254_vm0, %v10255_v1  ;;  %9004 = vmatpush3.bf16.msra.mxu1 %v9003_v38 }
 0x3f9   : > { %9005 = vmatprep.subr.bf16.mxu1 %v10253_v0 }
 0x3fa   : > { %v1475_v46 = vpop.f32.mrb[94].mxu0 }
 0x3fb   : > { %7726 = vmatmul.mubr.msk.f32.gmra.mrb[16].mxu1 %vm1125_vm7, %v1475_v46  ;;  %v1477_v47 = vpop.f32.mrb[95].mxu0  ;;  %v2179_v46 = vld [vmem:[#allocation2 + $0x248] sm:$0xff] }
 0x3fc   : > { %7728 = vmatprep.mubr.msk.f32.mxu1 %vm10254_vm0, %v10255_v1  ;;  %9007 = vmatpush3.bf16.msra.mxu1 %v9006_v45  ;;  %v2176_v45 = vld [vmem:[#allocation2 + $0x230] sm:$0xff]  ;;  %v2178_v47 = vld [vmem:[#allocation2 + $0x240] sm:$0xff] }
 0x3fd   : > { %9086 = vmatprep.subr.bf16.mxu1 %v10253_v0 }
 0x3fe   : > { %v1480_v48 = vpop.f32.mrb[96].mxu0 }
 0x3ff   : > { %7729 = vmatmul.mubr.msk.f32.gmra.mrb[18].mxu1 %vm1125_vm7, %v1480_v48  ;;  %v1482_v49 = vpop.f32.mrb[97].mxu0  ;;  %v2181_v48 = vld [vmem:[#allocation2 + $0x258] sm:$0xff] }
 0x400   : > { %7731 = vmatprep.mubr.msk.f32.mxu1 %vm10254_vm0, %v10255_v1  ;;  %v2180_v49 = vld [vmem:[#allocation2 + $0x250] sm:$0xff] }
 0x402   : > { %v1485_v52 = vpop.f32.mrb[98].mxu0 }
 0x403   : > { %7732 = vmatmul.mubr.msk.f32.gmra.mrb[20].mxu1 %vm1125_vm7, %v1485_v52  ;;  %v1487_v53 = vpop.f32.mrb[99].mxu0  ;;  %v2183_v52 = vld [vmem:[#allocation2 + $0x268] sm:$0xff] }
 0x404   : > { %7734 = vmatprep.mubr.msk.f32.mxu1 %vm10254_vm0, %v10255_v1  ;;  %v2182_v53 = vld [vmem:[#allocation2 + $0x260] sm:$0xff] }
 0x406   : > { %v1490_v54 = vpop.f32.mrb[100].mxu0 }
 0x407   : > { %7735 = vmatmul.mubr.msk.f32.gmra.mrb[22].mxu1 %vm1125_vm7, %v1490_v54  ;;  %v1492_v55 = vpop.f32.mrb[101].mxu0  ;;  %v2185_v54 = vld [vmem:[#allocation2 + $0x278] sm:$0xff] }
 0x408   : > { %7737 = vmatprep.mubr.msk.f32.mxu1 %vm10254_vm0, %v10255_v1  ;;  %v2184_v55 = vld [vmem:[#allocation2 + $0x270] sm:$0xff] }
 0x40a   : > { %v1495_v56 = vpop.f32.mrb[102].mxu0 }
 0x40b   : > { %7738 = vmatmul.mubr.msk.f32.gmra.mrb[24].mxu1 %vm1125_vm7, %v1495_v56  ;;  %v1497_v57 = vpop.f32.mrb[103].mxu0  ;;  %v2187_v56 = vld [vmem:[#allocation2 + $0x288] sm:$0xff] }
 0x40c   : > { %7740 = vmatprep.mubr.msk.f32.mxu1 %vm10254_vm0, %v10255_v1  ;;  %v2186_v57 = vld [vmem:[#allocation2 + $0x280] sm:$0xff] }
 0x40e   : > { %v1500_v58 = vpop.f32.mrb[104].mxu0 }
 0x40f   : > { %7741 = vmatmul.mubr.msk.f32.gmra.mrb[26].mxu1 %vm1125_vm7, %v1500_v58  ;;  %v1502_v60 = vpop.f32.mrb[105].mxu0  ;;  %v2189_v58 = vld [vmem:[#allocation2 + $0x298] sm:$0x1] }
 0x410   : > { %7751 = vmatprep.mubr.msk.f32.mxu1 %vm10254_vm0, %v10255_v1  ;;  %v2188_v60 = vld [vmem:[#allocation2 + $0x290] sm:$0x1] }
 0x428   : > { %v1739_v62 = vpop.f32.mrb[106].mxu0 }
 0x429   : > { %7752 = vmatmul.mubr.msk.f32.vlgmr.msra.gmra.mrb[28].mxu1 %vm1125_vm7, %v1739_v62  ;;  %v1741_v63 = vpop.f32.mrb[107].mxu0  ;;  %v2446_v62 = vld [vmem:[#allocation2 + $0x2a8] sm:$0xff] }
 0x42a   : > { %7754 = vmatprep.mubr.msk.f32.mxu1 %vm10254_vm0, %v10255_v1  ;;  %v2445_v63 = vld [vmem:[#allocation2 + $0x2a0] sm:$0xff] }
 0x42c   : > { %v1744_v2 = vpop.f32.mrb[108].mxu0 }
 0x42d   : > { %7755 = vmatmul.mubr.msk.f32.gmra.mrb[30].mxu1 %vm1125_vm7, %v1744_v2  ;;  %v1746_v3 = vpop.f32.mrb[109].mxu0  ;;  %v2448_v2 = vld [vmem:[#allocation2 + $0x2b8] sm:$0xff] }
 0x42e   : > { %7757 = vmatprep.mubr.msk.f32.mxu1 %vm10254_vm0, %v10255_v1  ;;  %v2447_v3 = vld [vmem:[#allocation2 + $0x2b0] sm:$0xff] }
 0x430   : > { %v1749_v4 = vpop.f32.mrb[110].mxu0 }
 0x431   : > { %7758 = vmatmul.mubr.msk.f32.gmra.mrb[32].mxu1 %vm1125_vm7, %v1749_v4  ;;  %v1751_v5 = vpop.f32.mrb[111].mxu0  ;;  %v2450_v4 = vld [vmem:[#allocation2 + $0x2c8] sm:$0xff] }
 0x432   : > { %7760 = vmatprep.mubr.msk.f32.mxu1 %vm10254_vm0, %v10255_v1  ;;  %v2449_v5 = vld [vmem:[#allocation2 + $0x2c0] sm:$0xff] }
 0x434   : > { %v1754_v7 = vpop.f32.mrb[112].mxu0 }
 0x435   : > { %7761 = vmatmul.mubr.msk.f32.gmra.mrb[34].mxu1 %vm1125_vm7, %v1754_v7  ;;  %v1756_v8 = vpop.f32.mrb[113].mxu0  ;;  %v2452_v7 = vld [vmem:[#allocation2 + $0x2d8] sm:$0xff] }
 0x436   : > { %7763 = vmatprep.mubr.msk.f32.mxu1 %vm10254_vm0, %v10255_v1  ;;  %v2312_v8 = vld [vmem:[#allocation7 + $0xa0] sm:$0xff] }
 0x438   : > { %v1759_v10 = vpop.f32.mrb[114].mxu0 }
 0x439   : > { %7764 = vmatmul.mubr.msk.f32.gmra.mrb[36].mxu1 %vm1125_vm7, %v1759_v10  ;;  %v1761_v12 = vpop.f32.mrb[115].mxu0  ;;  %v2313_v10 = vld [vmem:[#allocation7 + $0xa8] sm:$0xff] }
 0x43a   : > { %7766 = vmatprep.mubr.msk.f32.mxu1 %vm10254_vm0, %v10255_v1  ;;  %v2314_v12 = vld [vmem:[#allocation7 + $0xb0] sm:$0xff] }
 0x43c   : > { %v1764_v13 = vpop.f32.mrb[116].mxu0 }
 0x43d   : > { %7767 = vmatmul.mubr.msk.f32.gmra.mrb[38].mxu1 %vm1125_vm7, %v1764_v13  ;;  %v1766_v16 = vpop.f32.mrb[117].mxu0  ;;  %v2451_v13 = vld [vmem:[#allocation2 + $0x2d0] sm:$0xff] }
 0x43e   : > { %7769 = vmatprep.mubr.msk.f32.mxu1 %vm10254_vm0, %v10255_v1  ;;  %v9087_v16 = vpack.c.bf16 %v2313_v10, %v2312_v8 }
 0x440   : > { %v1769_v17 = vpop.f32.mrb[118].mxu0  ;;  %9088 = vmatpush3.bf16.msra.mxu1 %v9087_v16 }
 0x441   : > { %7770 = vmatmul.mubr.msk.f32.gmra.mrb[40].mxu1 %vm1125_vm7, %v1769_v17  ;;  %v1771_v20 = vpop.f32.mrb[119].mxu0  ;;  %v2315_v17 = vld [vmem:[#allocation7 + $0xb8] sm:$0xff]  ;;  %9089 = vmatprep.subr.bf16.mxu1 %v10253_v0 }
 0x442   : > { %7809 = vmatprep.mubr.msk.f32.mxu1 %vm10254_vm0, %v10255_v1  ;;  %v2454_v20 = vld [vmem:[#allocation2 + $0x2e8] sm:$0xff] }
 0x45a   : > { %v2008_v21 = vpop.f32.mrb[120].mxu0 }
 0x45b   : > { %v2010_v23 = vpop.f32.mrb[121].mxu0  ;;  %7781 = vmatmul.mubr.msk.f32.vlgmr.msra.gmra.mrb[134].mxu0 %vm1125_vm7, %v2008_v21 }
 0x45c   : > { %9052 = vmatpush1.bf16.msra.mxu0 %v10655_v41  ;;  %7783 = vmatprep.mubr.msk.f32.mxu0 %vm10254_vm0, %v10255_v1  ;;  %v9090_v23 = vpack.c.bf16 %v2315_v17, %v2314_v12 }
 0x45d   : > { %9053 = vmatprep.subr.bf16.mxu0 %v10253_v0 }
 0x45e   : > { %v2013_v25 = vpop.f32.mrb[122].mxu0  ;;  %9091 = vmatpush3.bf16.msra.mxu1 %v9090_v23 }
 0x45f   : > { %7784 = vmatmul.mubr.msk.f32.gmra.mrb[136].mxu0 %vm1125_vm7, %v2013_v25  ;;  %v2015_v27 = vpop.f32.mrb[123].mxu0  ;;  %9170 = vmatprep.subr.bf16.mxu1 %v10253_v0 }
 0x460   : > { %9055 = vmatpush1.bf16.msra.mxu0 %v10661_v50  ;;  %7786 = vmatprep.mubr.msk.f32.mxu0 %vm10254_vm0, %v10255_v1 }
 0x461   : > { %9056 = vmatprep.subr.bf16.mxu0 %v10253_v0 }
 0x462   : > { %v2018_v28 = vpop.f32.mrb[124].mxu0 }
 0x463   : > { %7787 = vmatmul.mubr.msk.f32.gmra.mrb[138].mxu0 %vm1125_vm7, %v2018_v28  ;;  %v2020_v32 = vpop.f32.mrb[125].mxu0  ;;  %v2453_v28 = vld [vmem:[#allocation2 + $0x2e0] sm:$0xff] }
 0x464   : > { %9058 = vmatpush1.bf16.msra.mxu0 %v10667_v59  ;;  %7789 = vmatprep.mubr.msk.f32.mxu0 %vm10254_vm0, %v10255_v1  ;;  %v2456_v32 = vld [vmem:[#allocation2 + $0x2f8] sm:$0xff] }
 0x465   : > { %9059 = vmatprep.subr.bf16.mxu0 %v10253_v0 }
 0x466   : > { %v2023_v34 = vpop.f32.mrb[126].mxu0 }
 0x467   : > { %7790 = vmatmul.mubr.msk.f32.gmra.mrb[140].mxu0 %vm1125_vm7, %v2023_v34  ;;  %v2025_v31 = vpop.f32.mrb[127].mxu0 }
 0x468   : > { %9061 = vmatpush1.bf16.msra.mxu0 %v10673_v6  ;;  %7792 = vmatprep.mubr.msk.f32.mxu0 %vm10254_vm0, %v10255_v1 }
 0x469   : > { %9062 = vmatprep.subr.bf16.mxu0 %v10253_v0 }
 0x46a   : > { %v2028_v36 = vpop.f32.mrb[128].mxu0 }
 0x46b   : > { %7793 = vmatmul.mubr.msk.f32.gmra.mrb[142].mxu0 %vm1125_vm7, %v2028_v36  ;;  %v2030_v37 = vpop.f32.mrb[129].mxu0 }
 0x46c   : > { %9064 = vmatpush1.bf16.msra.mxu0 %v10679_v15  ;;  %7795 = vmatprep.mubr.msk.f32.mxu0 %vm10254_vm0, %v10255_v1  ;;  %v2455_v37 = vld [vmem:[#allocation2 + $0x2f0] sm:$0xff] }
 0x46d   : > { %9065 = vmatprep.subr.bf16.mxu0 %v10253_v0 }
 0x46e   : > { %v2033_v38 = vpop.f32.mrb[130].mxu0 }
 0x46f   : > { %7796 = vmatmul.mubr.msk.f32.gmra.mrb[144].mxu0 %vm1125_vm7, %v2033_v38  ;;  %v2035_v39 = vpop.f32.mrb[131].mxu0 }
 0x470   : > { %9067 = vmatpush1.bf16.msra.mxu0 %v10685_v24  ;;  %7798 = vmatprep.mubr.msk.f32.mxu0 %vm10254_vm0, %v10255_v1 }
 0x471   : > { %9068 = vmatprep.subr.bf16.mxu0 %v10253_v0 }
 0x472   : > { %v2038_v43 = vpop.f32.mrb[132].mxu0 }
 0x473   : > { %7799 = vmatmul.mubr.msk.f32.gmra.mrb[146].mxu0 %vm1125_vm7, %v2038_v43  ;;  %v2040_v44 = vpop.f32.mrb[133].mxu0  ;;  %v2457_v43 = vld [vmem:[#allocation2 + $0x300] sm:$0x1] }
 0x474   : > { %9070 = vmatpush1.bf16.msra.mxu0 %v10692_v40  ;;  %6642 = vmatprep.mubr.msk.f32.mxu0 %vm854_vm5, %v2177_v42 }
 0x475   : > { %9071 = vmatprep.subr.bf16.mxu0 %v10253_v0 }
 0x478   : > { %9073 = vmatpush1.bf16.msra.mxu0 %v10699_v51 }
 0x479   : > { %9074 = vmatprep.subr.bf16.mxu0 %v10253_v0 }
 0x47c   : > { %9076 = vmatpush1.bf16.msra.mxu0 %v10705_v61 }
 0x47d   : > { %9077 = vmatprep.subr.bf16.mxu0 %v10253_v0 }
 0x480   : > { %9079 = vmatpush1.bf16.msra.mxu0 %v10711_v9 }
 0x481   : > { %9080 = vmatprep.subr.bf16.mxu0 %v10253_v0 }
 0x484   : > { %9082 = vmatpush1.bf16.msra.mxu0 %v10717_v19 }
 0x485   : > { %9083 = vmatprep.subr.bf16.mxu0 %v10253_v0 }
 0x488   : > { %9085 = vmatpush1.bf16.msra.mxu0 %v10723_v29 }
 0x489   : > { %2259 = vmatprep.subr.mxu0 %v10255_v1 }
 0x48c   : > { %6641 = vmatpush1.msk.msra.mxu0 %vm876_vm6, %v10726_v33 }
 0x48d   : > { %2276 = vmatmul.mubr.f32.vlgmr.msra.gmra.mrb[148].mxu0 %v2176_v45  ;;  %9092 = vmatprep.subr.bf16.mxu0 %v10253_v0 }
 0x48e   : > { %9094 = vmatpush1.bf16.msra.mxu0 %v10655_v41  ;;  %6643 = vmatprep.mubr.msk.f32.mxu0 %vm854_vm5, %v2179_v46 }
 0x48f   : > { %9095 = vmatprep.subr.bf16.mxu0 %v10253_v0 }
 0x491   : > { %2281 = vmatmul.mubr.f32.gmra.mrb[150].mxu0 %v2178_v47 }
 0x492   : > { %9097 = vmatpush1.bf16.msra.mxu0 %v10661_v50  ;;  %6644 = vmatprep.mubr.msk.f32.mxu0 %vm854_vm5, %v2181_v48 }
 0x493   : > { %9098 = vmatprep.subr.bf16.mxu0 %v10253_v0 }
 0x495   : > { %2286 = vmatmul.mubr.f32.gmra.mrb[152].mxu0 %v2180_v49 }
 0x496   : > { %9100 = vmatpush1.bf16.msra.mxu0 %v10667_v59  ;;  %6645 = vmatprep.mubr.msk.f32.mxu0 %vm854_vm5, %v2183_v52 }
 0x497   : > { %9101 = vmatprep.subr.bf16.mxu0 %v10253_v0 }
 0x499   : > { %2291 = vmatmul.mubr.f32.gmra.mrb[154].mxu0 %v2182_v53 }
 0x49a   : > { %9103 = vmatpush1.bf16.msra.mxu0 %v10673_v6  ;;  %6646 = vmatprep.mubr.msk.f32.mxu0 %vm854_vm5, %v2185_v54 }
 0x49b   : > { %9104 = vmatprep.subr.bf16.mxu0 %v10253_v0 }
 0x49d   : > { %2296 = vmatmul.mubr.f32.gmra.mrb[156].mxu0 %v2184_v55 }
 0x49e   : > { %9106 = vmatpush1.bf16.msra.mxu0 %v10679_v15  ;;  %6647 = vmatprep.mubr.msk.f32.mxu0 %vm854_vm5, %v2187_v56  ;;  %v2581_v56 = vld [vmem:[#allocation7 + $0xc0] sm:$0xff] }
 0x49f   : > { %9107 = vmatprep.subr.bf16.mxu0 %v10253_v0 }
 0x4a1   : > { %2301 = vmatmul.mubr.f32.gmra.mrb[158].mxu0 %v2186_v57  ;;  %v2582_v57 = vld [vmem:[#allocation7 + $0xc8] sm:$0xff] }
 0x4a2   : > { %9109 = vmatpush1.bf16.msra.mxu0 %v10685_v24  ;;  %6648 = vmatprep.mubr.msk.f32.mxu0 %vm854_vm5, %v2189_v58  ;;  %v9129_v58 = vpack.c.bf16 %v2582_v57, %v2581_v56 }
 0x4a3   : > { %9110 = vmatprep.subr.bf16.mxu0 %v10253_v0 }
 0x4a5   : > { %2306 = vmatmul.mubr.f32.gmra.mrb[160].mxu0 %v2188_v60  ;;  %v2584_v60 = vld [vmem:[#allocation7 + $0xd8] sm:$0xff] }
 0x4a6   : > { %9112 = vmatpush1.bf16.msra.mxu0 %v10692_v40  ;;  %6657 = vmatprep.mubr.msk.f32.mxu0 %vm854_vm5, %v2446_v62 }
 0x4a7   : > { %9113 = vmatprep.subr.bf16.mxu0 %v10253_v0 }
 0x4aa   : > { %9115 = vmatpush1.bf16.msra.mxu0 %v10699_v51 }
 0x4ab   : > { %9116 = vmatprep.subr.bf16.mxu0 %v10253_v0 }
 0x4ae   : > { %9118 = vmatpush1.bf16.msra.mxu0 %v10705_v61 }
 0x4af   : > { %9119 = vmatprep.subr.bf16.mxu0 %v10253_v0 }
 0x4b2   : > { %9121 = vmatpush1.bf16.msra.mxu0 %v10711_v9 }
 0x4b3   : > { %9122 = vmatprep.subr.bf16.mxu0 %v10253_v0 }
 0x4b6   : > { %9124 = vmatpush1.bf16.msra.mxu0 %v10717_v19 }
 0x4b7   : > { %9125 = vmatprep.subr.bf16.mxu0 %v10253_v0 }
 0x4ba   : > { %9127 = vmatpush1.bf16.msra.mxu0 %v10723_v29 }
 0x4bb   : > { %2528 = vmatprep.subr.mxu0 %v10255_v1 }
 0x4be   : > { %6656 = vmatpush1.msk.msra.mxu0 %vm876_vm6, %v10726_v33 }
 0x4bf   : > { %2545 = vmatmul.mubr.f32.vlgmr.msra.gmra.mrb[162].mxu0 %v2445_v63  ;;  %9128 = vmatprep.subr.bf16.mxu0 %v10253_v0 }
 0x4c0   : > { %6658 = vmatprep.mubr.msk.f32.mxu0 %vm854_vm5, %v2448_v2  ;;  %9130 = vmatpush3.bf16.msra.mxu0 %v9129_v58 }
 0x4c1   : > { %9131 = vmatprep.subr.bf16.mxu0 %v10253_v0 }
 0x4c3   : > { %2550 = vmatmul.mubr.f32.gmra.mrb[164].mxu0 %v2447_v3 }
 0x4c4   : > { %6659 = vmatprep.mubr.msk.f32.mxu0 %vm854_vm5, %v2450_v4 }
 0x4c7   : > { %2555 = vmatmul.mubr.f32.gmra.mrb[166].mxu0 %v2449_v5 }
 0x4c8   : > { %6660 = vmatprep.mubr.msk.f32.mxu0 %vm854_vm5, %v2452_v7 }
 0x4ca   : > { %v1596_v21 = vpop.f32.mrb[14].mxu1 }
 0x4cb   : > { %v1630_v25 = vadd.f32 %v1596_v21, %v10923_v11  ;;  %2560 = vmatmul.mubr.f32.gmra.mrb[168].mxu0 %v2451_v13  ;;  %v7724_v27 = vpop.f32.mrb[15].mxu1  ;;  %v2458_v11 = vld [vmem:[#allocation2 + $0x308] sm:$0x1] }
 0x4cc   : > { %6661 = vmatprep.mubr.msk.f32.mxu0 %vm854_vm5, %v2454_v20 }
 0x4ce   : > { %v1601_v34 = vpop.f32.mrb[16].mxu1 }
 0x4cf   : > { %v1631_v31 = vadd.f32 %v1601_v34, %v10926_v14  ;;  %2565 = vmatmul.mubr.f32.gmra.mrb[170].mxu0 %v2453_v28  ;;  %v7727_v36 = vpop.f32.mrb[17].mxu1 }
 0x4d0   : > { %6662 = vmatprep.mubr.msk.f32.mxu0 %vm854_vm5, %v2456_v32 }
 0x4d2   : > { %v1606_v38 = vpop.f32.mrb[18].mxu1 }
 0x4d3   : > { %v1632_v39 = vadd.f32 %v1606_v38, %v10929_v18  ;;  %2570 = vmatmul.mubr.f32.gmra.mrb[172].mxu0 %v2455_v37  ;;  %v7730_v42 = vpop.f32.mrb[19].mxu1 }
 0x4d4   : > { %6663 = vmatprep.mubr.msk.f32.mxu0 %vm854_vm5, %v2458_v11 }
 0x4d6   : > { %v1611_v44 = vpop.f32.mrb[20].mxu1 }
 0x4d7   : > { %v1633_v45 = vadd.f32 %v1611_v44, %v10931_v22  ;;  %2575 = vmatmul.mubr.f32.gmra.mrb[174].mxu0 %v2457_v43  ;;  %v7733_v14 = vpop.f32.mrb[21].mxu1  ;;  %v2583_v22 = vld [vmem:[#allocation7 + $0xd0] sm:$0xff] }
 0x4d8   : > { %7838 = vmatprep.mubr.msk.f32.mxu0 %vm10254_vm0, %v10255_v1  ;;  %v9132_v63 = vpack.c.bf16 %v2584_v60, %v2583_v22 }
 0x4da   : > { %v1616_v46 = vpop.f32.mrb[22].mxu1  ;;  %9133 = vmatpush3.bf16.msra.mxu0 %v9132_v63 }
 0x4db   : > { %v1634_v47 = vadd.f32 %v1616_v46, %v10933_v26  ;;  %v7736_v48 = vpop.f32.mrb[23].mxu1  ;;  %9134 = vmatprep.subr.bf16.mxu0 %v10253_v0 }
 0x4de   : > { %v1621_v49 = vpop.f32.mrb[24].mxu1 }
 0x4df   : > { %v1635_v18 = vadd.f32 %v1621_v49, %v10935_v30  ;;  %v7739_v52 = vpop.f32.mrb[25].mxu1 }
 0x4e2   : > { %v1626_v53 = vpop.f32.mrb[26].mxu1 }
 0x4e3   : > { %v1636_v54 = vadd.f32 %v1626_v53, %v10937_v35  ;;  %v7742_v55 = vpop.f32.mrb[27].mxu1 }
 0x4fc   : > { %v1865_v62 = vpop.f32.mrb[28].mxu1 }
 0x4fd   : > { %v1899_v2 = vadd.f32 %v1865_v62, %v1630_v25  ;;  %v7753_v3 = vpop.f32.mrb[29].mxu1 }
 0x500   : > { %v1870_v26 = vpop.f32.mrb[30].mxu1 }
 0x501   : > { %v1900_v30 = vadd.f32 %v1870_v26, %v1631_v31  ;;  %v7756_v4 = vpop.f32.mrb[31].mxu1 }
 0x504   : > { %v1875_v35 = vpop.f32.mrb[32].mxu1 }
 0x505   : > { %v1901_v5 = vadd.f32 %v1875_v35, %v1632_v39  ;;  %v7759_v7 = vpop.f32.mrb[33].mxu1 }
 0x508   : > { %v1880_v8 = vpop.f32.mrb[34].mxu1 }
 0x509   : > { %v1902_v10 = vadd.f32 %v1880_v8, %v1633_v45  ;;  %v7762_v12 = vpop.f32.mrb[35].mxu1 }
 0x50c   : > { %v1885_v13 = vpop.f32.mrb[36].mxu1 }
 0x50d   : > { %v1903_v16 = vadd.f32 %v1885_v13, %v1634_v47  ;;  %v7765_v17 = vpop.f32.mrb[37].mxu1 }
 0x510   : > { %v1890_v20 = vpop.f32.mrb[38].mxu1 }
 0x511   : > { %v1904_v21 = vadd.f32 %v1890_v20, %v1635_v18  ;;  %v7768_v23 = vpop.f32.mrb[39].mxu1 }
 0x514   : > { %v1895_v25 = vpop.f32.mrb[40].mxu1 }
 0x515   : > { %v1905_v27 = vadd.f32 %v1895_v25, %v1636_v54  ;;  %v7771_v28 = vpop.f32.mrb[41].mxu1 }
 0x52e   : > { %v2134_v32 = vpop.f32.mrb[134].mxu0 }
 0x52f   : > { %v11083_v34 = vadd.f32 %v2134_v32, %v1899_v2  ;;  %v7782_v31 = vpop.f32.mrb[135].mxu0 }
 0x530   : > { %v2714_v31 = vld [vmem:[#allocation2 + $0x310] sm:$0xff] }
 0x532   : > { %v2139_v36 = vpop.f32.mrb[136].mxu0 }
 0x533   : > { %v11085_v37 = vadd.f32 %v2139_v36, %v1900_v30  ;;  %v7785_v11 = vpop.f32.mrb[137].mxu0  ;;  %v2717_v36 = vld [vmem:[#allocation2 + $0x328] sm:$0xff] }
 0x534   : > { %v2716_v11 = vld [vmem:[#allocation2 + $0x320] sm:$0xff] }
 0x536   : > { %v2144_v38 = vpop.f32.mrb[138].mxu0 }
 0x537   : > { %v11087_v39 = vadd.f32 %v2144_v38, %v1901_v5  ;;  %v7788_v42 = vpop.f32.mrb[139].mxu0  ;;  %v2719_v38 = vld [vmem:[#allocation2 + $0x338] sm:$0xff] }
 0x538   : > { %v2718_v42 = vld [vmem:[#allocation2 + $0x330] sm:$0xff] }
 0x53a   : > { %v2149_v43 = vpop.f32.mrb[140].mxu0 }
 0x53b   : > { %v11089_v44 = vadd.f32 %v2149_v43, %v1902_v10  ;;  %v7791_v45 = vpop.f32.mrb[141].mxu0  ;;  %v2721_v43 = vld [vmem:[#allocation2 + $0x348] sm:$0xff] }
 0x53c   : > { %v2720_v45 = vld [vmem:[#allocation2 + $0x340] sm:$0xff] }
 0x53e   : > { %v2154_v14 = vpop.f32.mrb[142].mxu0 }
 0x53f   : > { %v11091_v46 = vadd.f32 %v2154_v14, %v1903_v16  ;;  %v7794_v47 = vpop.f32.mrb[143].mxu0  ;;  %v2723_v14 = vld [vmem:[#allocation2 + $0x358] sm:$0xff] }
 0x540   : > { %v2722_v47 = vld [vmem:[#allocation2 + $0x350] sm:$0xff] }
 0x542   : > { %v2159_v48 = vpop.f32.mrb[144].mxu0 }
 0x543   : > { %v11093_v49 = vadd.f32 %v2159_v48, %v1904_v21  ;;  %v7797_v18 = vpop.f32.mrb[145].mxu0  ;;  %v2725_v48 = vld [vmem:[#allocation2 + $0x368] sm:$0xff] }
 0x544   : > { %v2724_v18 = vld [vmem:[#allocation2 + $0x360] sm:$0xff] }
 0x546   : > { %v2164_v52 = vpop.f32.mrb[146].mxu0 }
 0x547   : > { %v11095_v53 = vadd.f32 %v2164_v52, %v1905_v27  ;;  %v7800_v54 = vpop.f32.mrb[147].mxu0  ;;  %v2715_v27 = vld [vmem:[#allocation2 + $0x318] sm:$0xff] }
 0x548   : > { %v2727_v52 = vld [vmem:[#allocation2 + $0x378] sm:$0x1]  ;;  %v2726_v54 = vld [vmem:[#allocation2 + $0x370] sm:$0x1] }
 0x560   : > { %v2277_v55 = vpop.f32.mrb[148].mxu0 }
 0x561   : > { %7810 = vmatmul.mubr.msk.f32.vlgmr.msra.gmra.mrb[42].mxu1 %vm1125_vm7, %v2277_v55  ;;  %v2279_v56 = vpop.f32.mrb[149].mxu0  ;;  %v2850_v55 = vld [vmem:[#allocation7 + $0xe0] sm:$0xff] }
 0x562   : > { %7812 = vmatprep.mubr.msk.f32.mxu1 %vm10254_vm0, %v10255_v1  ;;  %v2851_v56 = vld [vmem:[#allocation7 + $0xe8] sm:$0xff] }
 0x564   : > { %v2282_v57 = vpop.f32.mrb[150].mxu0 }
 0x565   : > { %7813 = vmatmul.mubr.msk.f32.gmra.mrb[44].mxu1 %vm1125_vm7, %v2282_v57  ;;  %v2284_v22 = vpop.f32.mrb[151].mxu0  ;;  %v2852_v57 = vld [vmem:[#allocation7 + $0xf0] sm:$0xff] }
 0x566   : > { %7815 = vmatprep.mubr.msk.f32.mxu1 %vm10254_vm0, %v10255_v1  ;;  %v9171_v22 = vpack.c.bf16 %v2851_v56, %v2850_v55 }
 0x568   : > { %v2287_v58 = vpop.f32.mrb[152].mxu0  ;;  %9172 = vmatpush3.bf16.msra.mxu1 %v9171_v22 }
 0x569   : > { %7816 = vmatmul.mubr.msk.f32.gmra.mrb[46].mxu1 %vm1125_vm7, %v2287_v58  ;;  %v2289_v60 = vpop.f32.mrb[153].mxu0  ;;  %v2853_v58 = vld [vmem:[#allocation7 + $0xf8] sm:$0xff]  ;;  %9173 = vmatprep.subr.bf16.mxu1 %v10253_v0 }
 0x56a   : > { %7818 = vmatprep.mubr.msk.f32.mxu1 %vm10254_vm0, %v10255_v1  ;;  %v9174_v60 = vpack.c.bf16 %v2853_v58, %v2852_v57 }
 0x56c   : > { %v2292_v62 = vpop.f32.mrb[154].mxu0  ;;  %9175 = vmatpush3.bf16.msra.mxu1 %v9174_v60 }
 0x56d   : > { %7819 = vmatmul.mubr.msk.f32.gmra.mrb[48].mxu1 %vm1125_vm7, %v2292_v62  ;;  %v2294_v63 = vpop.f32.mrb[155].mxu0  ;;  %9176 = vmatprep.subr.bf16.mxu1 %v10253_v0 }
 0x56e   : > { %7821 = vmatprep.mubr.msk.f32.mxu1 %vm10254_vm0, %v10255_v1 }
 0x570   : > { %v2297_v2 = vpop.f32.mrb[156].mxu0 }
 0x571   : > { %7822 = vmatmul.mubr.msk.f32.gmra.mrb[50].mxu1 %vm1125_vm7, %v2297_v2  ;;  %v2299_v3 = vpop.f32.mrb[157].mxu0 }
 0x572   : > { %7824 = vmatprep.mubr.msk.f32.mxu1 %vm10254_vm0, %v10255_v1 }
 0x574   : > { %v2302_v26 = vpop.f32.mrb[158].mxu0 }
 0x575   : > { %7825 = vmatmul.mubr.msk.f32.gmra.mrb[52].mxu1 %vm1125_vm7, %v2302_v26  ;;  %v2304_v30 = vpop.f32.mrb[159].mxu0 }
 0x576   : > { %7827 = vmatprep.mubr.msk.f32.mxu1 %vm10254_vm0, %v10255_v1 }
 0x578   : > { %v2307_v4 = vpop.f32.mrb[160].mxu0 }
 0x579   : > { %7828 = vmatmul.mubr.msk.f32.gmra.mrb[54].mxu1 %vm1125_vm7, %v2307_v4  ;;  %v2309_v35 = vpop.f32.mrb[161].mxu0 }
 0x57a   : > { %7867 = vmatprep.mubr.msk.f32.mxu1 %vm10254_vm0, %v10255_v1 }
 0x592   : > { %v2546_v5 = vpop.f32.mrb[162].mxu0 }
 0x593   : > { %v2548_v7 = vpop.f32.mrb[163].mxu0  ;;  %7839 = vmatmul.mubr.msk.f32.vlgmr.msra.gmra.mrb[176].mxu0 %vm1125_vm7, %v2546_v5 }
 0x594   : > { %9136 = vmatpush1.bf16.msra.mxu0 %v10655_v41  ;;  %7841 = vmatprep.mubr.msk.f32.mxu0 %vm10254_vm0, %v10255_v1 }
 0x595   : > { %9137 = vmatprep.subr.bf16.mxu0 %v10253_v0 }
 0x596   : > { %v2551_v8 = vpop.f32.mrb[164].mxu0 }
 0x597   : > { %7842 = vmatmul.mubr.msk.f32.gmra.mrb[178].mxu0 %vm1125_vm7, %v2551_v8  ;;  %v2553_v10 = vpop.f32.mrb[165].mxu0 }
 0x598   : > { %9139 = vmatpush1.bf16.msra.mxu0 %v10661_v50  ;;  %7844 = vmatprep.mubr.msk.f32.mxu0 %vm10254_vm0, %v10255_v1 }
 0x599   : > { %9140 = vmatprep.subr.bf16.mxu0 %v10253_v0 }
 0x59a   : > { %v2556_v12 = vpop.f32.mrb[166].mxu0 }
 0x59b   : > { %7845 = vmatmul.mubr.msk.f32.gmra.mrb[180].mxu0 %vm1125_vm7, %v2556_v12  ;;  %v2558_v13 = vpop.f32.mrb[167].mxu0 }
 0x59c   : > { %9142 = vmatpush1.bf16.msra.mxu0 %v10667_v59  ;;  %7847 = vmatprep.mubr.msk.f32.mxu0 %vm10254_vm0, %v10255_v1 }
 0x59d   : > { %9143 = vmatprep.subr.bf16.mxu0 %v10253_v0 }
 0x59e   : > { %v2561_v16 = vpop.f32.mrb[168].mxu0 }
 0x59f   : > { %7848 = vmatmul.mubr.msk.f32.gmra.mrb[182].mxu0 %vm1125_vm7, %v2561_v16  ;;  %v2563_v17 = vpop.f32.mrb[169].mxu0 }
 0x5a0   : > { %9145 = vmatpush1.bf16.msra.mxu0 %v10673_v6  ;;  %7850 = vmatprep.mubr.msk.f32.mxu0 %vm10254_vm0, %v10255_v1 }
 0x5a1   : > { %9146 = vmatprep.subr.bf16.mxu0 %v10253_v0 }
 0x5a2   : > { %v2566_v20 = vpop.f32.mrb[170].mxu0 }
 0x5a3   : > { %7851 = vmatmul.mubr.msk.f32.gmra.mrb[184].mxu0 %vm1125_vm7, %v2566_v20  ;;  %v2568_v21 = vpop.f32.mrb[171].mxu0 }
 0x5a4   : > { %9148 = vmatpush1.bf16.msra.mxu0 %v10679_v15  ;;  %7853 = vmatprep.mubr.msk.f32.mxu0 %vm10254_vm0, %v10255_v1 }
 0x5a5   : > { %9149 = vmatprep.subr.bf16.mxu0 %v10253_v0 }
 0x5a6   : > { %v2571_v23 = vpop.f32.mrb[172].mxu0 }
 0x5a7   : > { %7854 = vmatmul.mubr.msk.f32.gmra.mrb[186].mxu0 %vm1125_vm7, %v2571_v23  ;;  %v2573_v25 = vpop.f32.mrb[173].mxu0 }
 0x5a8   : > { %9151 = vmatpush1.bf16.msra.mxu0 %v10685_v24  ;;  %7856 = vmatprep.mubr.msk.f32.mxu0 %vm10254_vm0, %v10255_v1 }
 0x5a9   : > { %9152 = vmatprep.subr.bf16.mxu0 %v10253_v0 }
 0x5aa   : > { %v2576_v28 = vpop.f32.mrb[174].mxu0 }
 0x5ab   : > { %7857 = vmatmul.mubr.msk.f32.gmra.mrb[188].mxu0 %vm1125_vm7, %v2576_v28  ;;  %v2578_v32 = vpop.f32.mrb[175].mxu0 }
 0x5ac   : > { %9154 = vmatpush1.bf16.msra.mxu0 %v10692_v40  ;;  %6672 = vmatprep.mubr.msk.f32.mxu0 %vm854_vm5, %v2715_v27 }
 0x5ad   : > { %9155 = vmatprep.subr.bf16.mxu0 %v10253_v0 }
 0x5b0   : > { %9157 = vmatpush1.bf16.msra.mxu0 %v10699_v51 }
 0x5b1   : > { %9158 = vmatprep.subr.bf16.mxu0 %v10253_v0 }
 0x5b4   : > { %9160 = vmatpush1.bf16.msra.mxu0 %v10705_v61 }
 0x5b5   : > { %9161 = vmatprep.subr.bf16.mxu0 %v10253_v0 }
 0x5b8   : > { %9163 = vmatpush1.bf16.msra.mxu0 %v10711_v9 }
 0x5b9   : > { %9164 = vmatprep.subr.bf16.mxu0 %v10253_v0 }
 0x5bc   : > { %9166 = vmatpush1.bf16.msra.mxu0 %v10717_v19 }
 0x5bd   : > { %9167 = vmatprep.subr.bf16.mxu0 %v10253_v0 }
 0x5c0   : > { %9169 = vmatpush1.bf16.msra.mxu0 %v10723_v29 }
 0x5c1   : > { %2797 = vmatprep.subr.mxu0 %v10255_v1 }
 0x5c4   : > { %6671 = vmatpush1.msk.msra.mxu0 %vm876_vm6, %v10726_v33 }
 0x5c5   : > { %2814 = vmatmul.mubr.f32.vlgmr.msra.gmra.mrb[190].mxu0 %v2714_v31  ;;  %9212 = vmatprep.subr.bf16.mxu0 %v10253_v0 }
 0x5c6   : > { %6673 = vmatprep.mubr.msk.f32.mxu0 %vm854_vm5, %v2717_v36 }
 0x5c9   : > { %2819 = vmatmul.mubr.f32.gmra.mrb[192].mxu0 %v2716_v11 }
 0x5ca   : > { %6674 = vmatprep.mubr.msk.f32.mxu0 %vm854_vm5, %v2719_v38 }
 0x5cd   : > { %2824 = vmatmul.mubr.f32.gmra.mrb[194].mxu0 %v2718_v42 }
 0x5ce   : > { %6675 = vmatprep.mubr.msk.f32.mxu0 %vm854_vm5, %v2721_v43 }
 0x5d1   : > { %2829 = vmatmul.mubr.f32.gmra.mrb[196].mxu0 %v2720_v45 }
 0x5d2   : > { %6676 = vmatprep.mubr.msk.f32.mxu0 %vm854_vm5, %v2723_v14 }
 0x5d5   : > { %2834 = vmatmul.mubr.f32.gmra.mrb[198].mxu0 %v2722_v47 }
 0x5d6   : > { %6677 = vmatprep.mubr.msk.f32.mxu0 %vm854_vm5, %v2725_v48 }
 0x5d9   : > { %2839 = vmatmul.mubr.f32.gmra.mrb[200].mxu0 %v2724_v18 }
 0x5da   : > { %6678 = vmatprep.mubr.msk.f32.mxu0 %vm854_vm5, %v2727_v52 }
 0x5dd   : > { %2844 = vmatmul.mubr.f32.gmra.mrb[202].mxu0 %v2726_v54 }
 0x5de   : > { %7896 = vmatprep.mubr.msk.f32.mxu0 %vm10254_vm0, %v10255_v1 }
 0x634   : > { %v2403_v62 = vpop.f32.mrb[42].mxu1 }
 0x635   : > { %v2437_v63 = vadd.f32 %v2403_v62, %v11083_v34  ;;  %v7811_v2 = vpop.f32.mrb[43].mxu1 }
 0x638   : > { %v2408_v3 = vpop.f32.mrb[44].mxu1 }
 0x639   : > { %v2438_v26 = vadd.f32 %v2408_v3, %v11085_v37  ;;  %v7814_v30 = vpop.f32.mrb[45].mxu1  ;;  %v2992_v3 = vld [vmem:[#allocation2 + $0x3c8] sm:$0xff] }
 0x63a   : > { %v2993_v30 = vld [vmem:[#allocation2 + $0x3d0] sm:$0xff] }
 0x63c   : > { %v2413_v4 = vpop.f32.mrb[46].mxu1 }
 0x63d   : > { %v2439_v35 = vadd.f32 %v2413_v4, %v11087_v39  ;;  %v7817_v5 = vpop.f32.mrb[47].mxu1  ;;  %v2996_v4 = vld [vmem:[#allocation2 + $0x3e8] sm:$0x1] }
 0x63e   : > { %v3119_v5 = vld [vmem:[#allocation7 + $0x100] sm:$0xff] }
 0x640   : > { %v2418_v7 = vpop.f32.mrb[48].mxu1 }
 0x641   : > { %v2440_v8 = vadd.f32 %v2418_v7, %v11089_v44  ;;  %v7820_v10 = vpop.f32.mrb[49].mxu1  ;;  %v3120_v7 = vld [vmem:[#allocation7 + $0x108] sm:$0xff] }
 0x642   : > { %v9213_v10 = vpack.c.bf16 %v3120_v7, %v3119_v5 }
 0x644   : > { %v2423_v12 = vpop.f32.mrb[50].mxu1  ;;  %9214 = vmatpush3.bf16.msra.mxu0 %v9213_v10 }
 0x645   : > { %v2441_v13 = vadd.f32 %v2423_v12, %v11091_v46  ;;  %v7823_v16 = vpop.f32.mrb[51].mxu1  ;;  %v3122_v12 = vld [vmem:[#allocation7 + $0x118] sm:$0xff]  ;;  %9215 = vmatprep.subr.bf16.mxu0 %v10253_v0 }
 0x648   : > { %v2428_v17 = vpop.f32.mrb[52].mxu1 }
 0x649   : > { %v2442_v34 = vadd.f32 %v2428_v17, %v11093_v49  ;;  %v7826_v20 = vpop.f32.mrb[53].mxu1 }
 0x64c   : > { %v2433_v21 = vpop.f32.mrb[54].mxu1 }
 0x64d   : > { %v2443_v37 = vadd.f32 %v2433_v21, %v11095_v53  ;;  %v7829_v23 = vpop.f32.mrb[55].mxu1 }
 0x666   : > { %v2672_v25 = vpop.f32.mrb[176].mxu0 }
 0x667   : > { %v11182_v27 = vadd.f32 %v2672_v25, %v2437_v63  ;;  %v7840_v39 = vpop.f32.mrb[177].mxu0  ;;  %v2984_v63 = vld [vmem:[#allocation2 + $0x388] sm:$0xff] }
 0x66a   : > { %v2677_v28 = vpop.f32.mrb[178].mxu0 }
 0x66b   : > { %v11184_v32 = vadd.f32 %v2677_v28, %v2438_v26  ;;  %v7843_v44 = vpop.f32.mrb[179].mxu0  ;;  %v2991_v26 = vld [vmem:[#allocation2 + $0x3c0] sm:$0xff] }
 0x66e   : > { %v2682_v31 = vpop.f32.mrb[180].mxu0 }
 0x66f   : > { %v11186_v36 = vadd.f32 %v2682_v31, %v2439_v35  ;;  %v7846_v46 = vpop.f32.mrb[181].mxu0  ;;  %v2995_v35 = vld [vmem:[#allocation2 + $0x3e0] sm:$0x1] }
 0x672   : > { %v2687_v11 = vpop.f32.mrb[182].mxu0 }
 0x673   : > { %v11188_v38 = vadd.f32 %v2687_v11, %v2440_v8  ;;  %v7849_v49 = vpop.f32.mrb[183].mxu0  ;;  %v3121_v8 = vld [vmem:[#allocation7 + $0x110] sm:$0xff] }
 0x676   : > { %v2692_v42 = vpop.f32.mrb[184].mxu0 }
 0x677   : > { %v11190_v43 = vadd.f32 %v2692_v42, %v2441_v13  ;;  %v7852_v53 = vpop.f32.mrb[185].mxu0  ;;  %v9216_v13 = vpack.c.bf16 %v3122_v12, %v3121_v8 }
 0x679   : > { %9217 = vmatpush3.bf16.msra.mxu0 %v9216_v13 }
 0x67a   : > { %v2697_v45 = vpop.f32.mrb[186].mxu0 }
 0x67b   : > { %v11192_v14 = vadd.f32 %v2697_v45, %v2442_v34  ;;  %v7855_v47 = vpop.f32.mrb[187].mxu0 }
 0x67e   : > { %v2702_v48 = vpop.f32.mrb[188].mxu0 }
 0x67f   : > { %v11194_v18 = vadd.f32 %v2702_v48, %v2443_v37  ;;  %v7858_v52 = vpop.f32.mrb[189].mxu0 }
 0x698   : > { %v2815_v54 = vpop.f32.mrb[190].mxu0 }
 0x699   : > { %v2817_v55 = vpop.f32.mrb[191].mxu0  ;;  %7868 = vmatmul.mubr.msk.f32.vlgmr.msra.gmra.mrb[56].mxu1 %vm1125_vm7, %v2815_v54 }
 0x69a   : > { %9178 = vmatpush1.bf16.msra.mxu1 %v10655_v41  ;;  %7870 = vmatprep.mubr.msk.f32.mxu1 %vm10254_vm0, %v10255_v1 }
 0x69b   : > { %9179 = vmatprep.subr.bf16.mxu1 %v10253_v0 }
 0x69c   : > { %v2820_v56 = vpop.f32.mrb[192].mxu0 }
 0x69d   : > { %7871 = vmatmul.mubr.msk.f32.gmra.mrb[58].mxu1 %vm1125_vm7, %v2820_v56  ;;  %v2822_v57 = vpop.f32.mrb[193].mxu0 }
 0x69e   : > { %9181 = vmatpush1.bf16.msra.mxu1 %v10661_v50  ;;  %7873 = vmatprep.mubr.msk.f32.mxu1 %vm10254_vm0, %v10255_v1 }
 0x69f   : > { %9182 = vmatprep.subr.bf16.mxu1 %v10253_v0 }
 0x6a0   : > { %v2825_v22 = vpop.f32.mrb[194].mxu0 }
 0x6a1   : > { %7874 = vmatmul.mubr.msk.f32.gmra.mrb[60].mxu1 %vm1125_vm7, %v2825_v22  ;;  %v2827_v41 = vpop.f32.mrb[195].mxu0 }
 0x6a2   : > { %9184 = vmatpush1.bf16.msra.mxu1 %v10667_v59  ;;  %7876 = vmatprep.mubr.msk.f32.mxu1 %vm10254_vm0, %v10255_v1 }
 0x6a3   : > { %9185 = vmatprep.subr.bf16.mxu1 %v10253_v0 }
 0x6a4   : > { %v2830_v58 = vpop.f32.mrb[196].mxu0 }
 0x6a5   : > { %7877 = vmatmul.mubr.msk.f32.gmra.mrb[62].mxu1 %vm1125_vm7, %v2830_v58  ;;  %v2832_v50 = vpop.f32.mrb[197].mxu0 }
 0x6a6   : > { %9187 = vmatpush1.bf16.msra.mxu1 %v10673_v6  ;;  %7879 = vmatprep.mubr.msk.f32.mxu1 %vm10254_vm0, %v10255_v1  ;;  %v3272_v50 = vld [vmem:[#allocation5] sm:$0xff] }
 0x6a7   : > { %9188 = vmatprep.subr.bf16.mxu1 %v10253_v0 }
 0x6a8   : > { %v2835_v60 = vpop.f32.mrb[198].mxu0 }
 0x6a9   : > { %7880 = vmatmul.mubr.msk.f32.gmra.mrb[64].mxu1 %vm1125_vm7, %v2835_v60  ;;  %v2837_v59 = vpop.f32.mrb[199].mxu0  ;;  %v3624_v60 = vld [vmem:[#allocation5 + $0x20] sm:$0xff] }
 0x6aa   : > { %9190 = vmatpush1.bf16.msra.mxu1 %v10679_v15  ;;  %7882 = vmatprep.mubr.msk.f32.mxu1 %vm10254_vm0, %v10255_v1 }
 0x6ab   : > { %9191 = vmatprep.subr.bf16.mxu1 %v10253_v0 }
 0x6ac   : > { %v2840_v62 = vpop.f32.mrb[200].mxu0 }
 0x6ad   : > { %7883 = vmatmul.mubr.msk.f32.gmra.mrb[66].mxu1 %vm1125_vm7, %v2840_v62  ;;  %v2842_v6 = vpop.f32.mrb[201].mxu0 }
 0x6ae   : > { %9193 = vmatpush1.bf16.msra.mxu1 %v10685_v24  ;;  %7885 = vmatprep.mubr.msk.f32.mxu1 %vm10254_vm0, %v10255_v1  ;;  %v2983_v24 = vld [vmem:[#allocation2 + $0x380] sm:$0xff] }
 0x6af   : > { %9194 = vmatprep.subr.bf16.mxu1 %v10253_v0 }
 0x6b0   : > { %v2845_v2 = vpop.f32.mrb[202].mxu0 }
 0x6b1   : > { %7886 = vmatmul.mubr.msk.f32.gmra.mrb[68].mxu1 %vm1125_vm7, %v2845_v2  ;;  %v2847_v15 = vpop.f32.mrb[203].mxu0 }
 0x6b2   : > { %9196 = vmatpush1.bf16.msra.mxu1 %v10692_v40  ;;  %6687 = vmatprep.mubr.msk.f32.mxu1 %vm854_vm5, %v2984_v63  ;;  %v2986_v40 = vld [vmem:[#allocation2 + $0x398] sm:$0xff]  ;;  %v6701_v63 = vld [vmem:[%s12476_s6] ss:$0 sm:$0xff] }
 0x6b3   : > { %9197 = vmatprep.subr.bf16.mxu1 %v10253_v0 }
 0x6b6   : > { %9199 = vmatpush1.bf16.msra.mxu1 %v10699_v51  ;;  %v2985_v51 = vld [vmem:[#allocation2 + $0x390] sm:$0xff] }
 0x6b7   : > { %9200 = vmatprep.subr.bf16.mxu1 %v10253_v0 }
 0x6ba   : > { %9202 = vmatpush1.bf16.msra.mxu1 %v10705_v61  ;;  %v2988_v61 = vld [vmem:[#allocation2 + $0x3a8] sm:$0xff] }
 0x6bb   : > { %9203 = vmatprep.subr.bf16.mxu1 %v10253_v0 }
 0x6be   : > { %9205 = vmatpush1.bf16.msra.mxu1 %v10711_v9  ;;  %v2987_v9 = vld [vmem:[#allocation2 + $0x3a0] sm:$0xff] }
 0x6bf   : > { %9206 = vmatprep.subr.bf16.mxu1 %v10253_v0 }
 0x6c2   : > { %9208 = vmatpush1.bf16.msra.mxu1 %v10717_v19  ;;  %v2990_v19 = vld [vmem:[#allocation2 + $0x3b8] sm:$0xff] }
 0x6c3   : > { %9209 = vmatprep.subr.bf16.mxu1 %v10253_v0 }
 0x6c6   : > { %9211 = vmatpush1.bf16.msra.mxu1 %v10723_v29  ;;  %v2989_v29 = vld [vmem:[#allocation2 + $0x3b0] sm:$0xff] }
 0x6c7   : > { %3066 = vmatprep.subr.mxu1 %v10255_v1 }
 0x6ca   : > { %6686 = vmatpush1.msk.msra.mxu1 %vm876_vm6, %v10726_v33  ;;  %v2994_v33 = vld [vmem:[#allocation2 + $0x3d8] sm:$0xff] }
 0x6cb   : > { %3083 = vmatmul.mubr.f32.vlgmr.msra.gmra.mrb[70].mxu1 %v2983_v24 }
 0x6cc   : > { %6688 = vmatprep.mubr.msk.f32.mxu1 %vm854_vm5, %v2986_v40 }
 0x6cf   : > { %3088 = vmatmul.mubr.f32.gmra.mrb[72].mxu1 %v2985_v51 }
 0x6d0   : > { %6689 = vmatprep.mubr.msk.f32.mxu1 %vm854_vm5, %v2988_v61 }
 0x6d3   : > { %3093 = vmatmul.mubr.f32.gmra.mrb[74].mxu1 %v2987_v9 }
 0x6d4   : > { %6690 = vmatprep.mubr.msk.f32.mxu1 %vm854_vm5, %v2990_v19 }
 0x6d7   : > { %3098 = vmatmul.mubr.f32.gmra.mrb[76].mxu1 %v2989_v29 }
 0x6d8   : > { %6691 = vmatprep.mubr.msk.f32.mxu1 %vm854_vm5, %v2992_v3 }
 0x6db   : > { %3103 = vmatmul.mubr.f32.gmra.mrb[78].mxu1 %v2991_v26 }
 0x6dc   : > { %6692 = vmatprep.mubr.msk.f32.mxu1 %vm854_vm5, %v2994_v33 }
 0x6df   : > { %3108 = vmatmul.mubr.f32.gmra.mrb[80].mxu1 %v2993_v30 }
 0x6e0   : > { %6693 = vmatprep.mubr.msk.f32.mxu1 %vm854_vm5, %v2996_v4 }
 0x6e3   : > { %3113 = vmatmul.mubr.f32.gmra.mrb[82].mxu1 %v2995_v35 }
 0x6e4   : > { %8003 = vmatprep.mubr.msk.f32.mxu1 %vm3274_vm8, %v3624_v60  ;;  %v4505_v60 = vld [vmem:[#allocation5 + $0x78] sm:$0xff] }
 0x76c   : > { %v2941_v16 = vpop.f32.mrb[56].mxu1 }
 0x76d   : > { %v2975_v17 = vadd.f32 %v2941_v16, %v11182_v27  ;;  %v7869_v34 = vpop.f32.mrb[57].mxu1 }
 0x770   : > { %v2946_v20 = vpop.f32.mrb[58].mxu1 }
 0x771   : > { %v2976_v21 = vadd.f32 %v2946_v20, %v11184_v32  ;;  %v7872_v37 = vpop.f32.mrb[59].mxu1 }
 0x774   : > { %v2951_v23 = vpop.f32.mrb[60].mxu1 }
 0x775   : > { %v2977_v25 = vadd.f32 %v2951_v23, %v11186_v36  ;;  %v7875_v39 = vpop.f32.mrb[61].mxu1 }
 0x778   : > { %v2956_v28 = vpop.f32.mrb[62].mxu1 }
 0x779   : > { %v2978_v44 = vadd.f32 %v2956_v28, %v11188_v38  ;;  %v7878_v31 = vpop.f32.mrb[63].mxu1 }
 0x77c   : > { %v2961_v46 = vpop.f32.mrb[64].mxu1 }
 0x77d   : > { %v11254_v11 = vadd.f32 %v2961_v46, %v11190_v43  ;;  %v7881_v49 = vpop.f32.mrb[65].mxu1 }
 0x77e   : > { %v3273_v49 = vld [vmem:[#allocation5 + $0x8] sm:$0xff] }
 0x780   : > { %v2966_v42 = vpop.f32.mrb[66].mxu1 }
 0x781   : > { %v11257_v27 = vadd.f32 %v2966_v42, %v11192_v14  ;;  %v7884_v53 = vpop.f32.mrb[67].mxu1  ;;  %v3625_v42 = vld [vmem:[#allocation5 + $0x28] sm:$0xff] }
 0x782   : > { %v3800_v53 = vld [vmem:[#allocation5 + $0x30] sm:$0xff] }
 0x784   : > { %v2971_v32 = vpop.f32.mrb[68].mxu1 }
 0x785   : > { %v11260_v45 = vadd.f32 %v2971_v32, %v11194_v18  ;;  %v7887_v36 = vpop.f32.mrb[69].mxu1  ;;  %v3452_v32 = vld [vmem:[#allocation8 + $0x40] sm:$0xff] }
 0x786   : > { %v3369_v36 = vld [vmem:[#allocation5 + $0x18] sm:$0xff] }
 0x79e   : > { %v3084_v47 = vpop.f32.mrb[70].mxu1 }
 0x79f   : > { %v3086_v48 = vpop.f32.mrb[71].mxu1  ;;  %7897 = vmatmul.mubr.msk.f32.vlgmr.msra.gmra.mrb[204].mxu0 %vm1125_vm7, %v3084_v47 }
 0x7a0   : > { %7899 = vmatprep.mubr.msk.f32.mxu0 %vm10254_vm0, %v10255_v1  ;;  %v3454_v48 = vld [vmem:[#allocation8 + $0x50] sm:$0xff] }
 0x7a2   : > { %v3089_v38 = vpop.f32.mrb[72].mxu1 }
 0x7a3   : > { %v3091_v43 = vpop.f32.mrb[73].mxu1  ;;  %7900 = vmatmul.mubr.msk.f32.gmra.mrb[206].mxu0 %vm1125_vm7, %v3089_v38  ;;  %v3455_v38 = vld [vmem:[#allocation8 + $0x58] sm:$0xff] }
 0x7a4   : > { %7902 = vmatprep.mubr.msk.f32.mxu0 %vm10254_vm0, %v10255_v1  ;;  %v3801_v43 = vld [vmem:[#allocation5 + $0x38] sm:$0xff] }
 0x7a6   : > { %v3094_v14 = vpop.f32.mrb[74].mxu1 }
 0x7a7   : > { %v3096_v52 = vpop.f32.mrb[75].mxu1  ;;  %7903 = vmatmul.mubr.msk.f32.gmra.mrb[208].mxu0 %vm1125_vm7, %v3094_v14  ;;  %v3976_v14 = vld [vmem:[#allocation5 + $0x40] sm:$0xff] }
 0x7a8   : > { %7905 = vmatprep.mubr.msk.f32.mxu0 %vm10254_vm0, %v10255_v1  ;;  %v9246_v52 = vpack.c.bf16 %v3455_v38, %v3454_v48  ;;  %v3712_v48 = vld [vmem:[#allocation8 + $0xa0] sm:$0xff]  ;;  %v3713_v38 = vld [vmem:[#allocation8 + $0xa8] sm:$0xff] }
 0x7aa   : > { %v3099_v18 = vpop.f32.mrb[76].mxu1 }
 0x7ab   : > { %v3101_v54 = vpop.f32.mrb[77].mxu1  ;;  %7906 = vmatmul.mubr.msk.f32.gmra.mrb[210].mxu0 %vm1125_vm7, %v3099_v18  ;;  %v3456_v18 = vld [vmem:[#allocation8 + $0x60] sm:$0xff] }
 0x7ac   : > { %7908 = vmatprep.mubr.msk.f32.mxu0 %vm10254_vm0, %v10255_v1  ;;  %v3457_v54 = vld [vmem:[#allocation8 + $0x68] sm:$0xff] }
 0x7ae   : > { %v3104_v55 = vpop.f32.mrb[78].mxu1 }
 0x7af   : > { %v3106_v56 = vpop.f32.mrb[79].mxu1  ;;  %7909 = vmatmul.mubr.msk.f32.gmra.mrb[212].mxu0 %vm1125_vm7, %v3104_v55  ;;  %v9250_v55 = vpack.c.bf16 %v3457_v54, %v3456_v18  ;;  %v9294_v18 = vpack.c.bf16 %v3713_v38, %v3712_v48  ;;  %v3714_v54 = vld [vmem:[#allocation8 + $0xb0] sm:$0xff]  ;;  %v4416_v38 = vld [vmem:[#allocation8 + $0x1a0] sm:$0xff] }
 0x7b0   : > { %7911 = vmatprep.mubr.msk.f32.mxu0 %vm10254_vm0, %v10255_v1  ;;  %v3977_v56 = vld [vmem:[#allocation5 + $0x48] sm:$0xff] }
 0x7b2   : > { %v3109_v57 = vpop.f32.mrb[80].mxu1 }
 0x7b3   : > { %v3111_v22 = vpop.f32.mrb[81].mxu1  ;;  %7912 = vmatmul.mubr.msk.f32.gmra.mrb[214].mxu0 %vm1125_vm7, %v3109_v57  ;;  %v4152_v57 = vld [vmem:[#allocation5 + $0x50] sm:$0xff] }
 0x7b4   : > { %7914 = vmatprep.mubr.msk.f32.mxu0 %vm10254_vm0, %v10255_v1  ;;  %v4153_v22 = vld [vmem:[#allocation5 + $0x58] sm:$0xff] }
 0x7b6   : > { %v3114_v41 = vpop.f32.mrb[82].mxu1 }
 0x7b7   : > { %7915 = vmatmul.mubr.msk.f32.gmra.mrb[216].mxu0 %vm1125_vm7, %v3114_v41  ;;  %v3116_v58 = vpop.f32.mrb[83].mxu1  ;;  %v4328_v41 = vld [vmem:[#allocation5 + $0x60] sm:$0xff] }
 0x7b8   : > { %7931 = vmatprep.mubr.msk.f32.mxu0 %vm3274_vm8, %v3272_v50  ;;  %v4329_v58 = vld [vmem:[#allocation5 + $0x68] sm:$0xff]  ;;  %v4504_v50 = vld [vmem:[#allocation5 + $0x70] sm:$0xff] }
 0x872   : > { %v3210_v59 = vpop.f32.mrb[204].mxu0 }
 0x873   : > { %v3244_v62 = vadd.f32 %v3210_v59, %v2975_v17  ;;  %v7898_v6 = vpop.f32.mrb[205].mxu0  ;;  %v4680_v59 = vld [vmem:[#allocation5 + $0x80] sm:$0xff] }
 0x874   : > { %v3458_v6 = vld [vmem:[#allocation8 + $0x70] sm:$0xff] }
 0x875   : > { %v3258_v15 = vadd.f32 %v6701_v63, %v3244_v62  ;;  %v4681_v62 = vld [vmem:[#allocation5 + $0x88] sm:$0xff] }
 0x876   : > { %v3215_v2 = vpop.f32.mrb[206].mxu0 }
 0x877   : > { %v3245_v24 = vadd.f32 %v3215_v2, %v2976_v21  ;;  %v7901_v40 = vpop.f32.mrb[207].mxu0  ;;  %v3265_v9 = vmax.f32 %v3258_v15, 0.0  ;;  %v3359_v15 = vld [vmem:[#allocation8] sm:$0xff] }
 0x879   : > { %v3259_v51 = vadd.f32 %v6701_v63, %v3245_v24  ;;  %v3360_v24 = vld [vmem:[#allocation8 + $0x8] sm:$0xff] }
 0x87a   : > { %v3220_v61 = vpop.f32.mrb[208].mxu0  ;;  %v9258_v40 = vpack.c.bf16 %v3360_v24, %v3359_v15  ;;  %v3888_v24 = vld [vmem:[#allocation8 + $0xe0] sm:$0xff] }
 0x87b   : > { %v3266_v19 = vmax.f32 %v3259_v51, 0.0  ;;  %v3246_v29 = vadd.f32 %v3220_v61, %v2977_v25  ;;  %v7904_v3 = vpop.f32.mrb[209].mxu0 }
 0x87c   : > { %v3362_v3 = vld [vmem:[#allocation8 + $0x18] sm:$0xff] }
 0x87d   : > { %v11286_v26 = vpack.c.bf16 %v3266_v19, %v3265_v9  ;;  %v3260_v30 = vadd.f32 %v6701_v63, %v3246_v29  ;;  %v3361_v29 = vld [vmem:[#allocation8 + $0x10] sm:$0xff] }
 0x87e   : > { %v3225_v33 = vpop.f32.mrb[210].mxu0 }
 0x87f   : > { %v3247_v4 = vadd.f32 %v3225_v33, %v2978_v44  ;;  %v7907_v35 = vpop.f32.mrb[211].mxu0  ;;  %9219 = vmatprep.subr.bf16.mxu0 %v11286_v26  ;;  %9275 = vmatprep.subr.bf16.mxu1 %v11286_v26  ;;  %v3267_v8 = vmax.f32 %v3260_v30, 0.0  ;;  %v9262_v30 = vpack.c.bf16 %v3362_v3, %v3361_v29  ;;  %v4060_v3 = vld [vmem:[#allocation8 + $0x100] sm:$0xff] }
 0x880   : > { %9221 = vmatpush3.bf16.msra.mxu0 %v11286_v26  ;;  %9277 = vmatpush3.bf16.msra.mxu1 %v11286_v26  ;;  %v3363_v35 = vld [vmem:[#allocation8 + $0x20] sm:$0xff] }
 0x881   : > { %v3261_v5 = vadd.f32 %v6701_v63, %v3247_v4 }
 0x882   : > { %v3230_v7 = vpop.f32.mrb[212].mxu0 }
 0x883   : > { %v3268_v10 = vmax.f32 %v3261_v5, 0.0  ;;  %v3248_v12 = vadd.f32 %v3230_v7, %v11254_v11  ;;  %v7910_v13 = vpop.f32.mrb[213].mxu0  ;;  %v3364_v5 = vld [vmem:[#allocation8 + $0x28] sm:$0xff] }
 0x885   : > { %v11293_v16 = vpack.c.bf16 %v3268_v10, %v3267_v8  ;;  %v3262_v34 = vadd.f32 %v6701_v63, %v3248_v12  ;;  %v4867_v8 = vld [vmem:[%s12479_s9] sm:$0xff]  ;;  %v4868_v10 = vld [vmem:[%s12479_s9 + $0x8] sm:$0xff]  ;;  %v4869_v12 = vld [vmem:[%s12479_s9 + $0x10] sm:$0xff] }
 0x886   : > { %v3235_v17 = vpop.f32.mrb[214].mxu0  ;;  %v9471_v13 = vpack.c.bf16 %v4868_v10, %v4867_v8  ;;  %v4064_v8 = vld [vmem:[#allocation8 + $0x120] sm:$0xff]  ;;  %v4065_v10 = vld [vmem:[#allocation8 + $0x128] sm:$0xff] }
 0x887   : > { %v3249_v20 = vadd.f32 %v3235_v17, %v11257_v27  ;;  %v7913_v21 = vpop.f32.mrb[215].mxu0  ;;  %9223 = vmatprep.subr.bf16.mxu0 %v11293_v16  ;;  %9279 = vmatprep.subr.bf16.mxu1 %v11293_v16  ;;  %v3269_v25 = vmax.f32 %v3262_v34, 0.0  ;;  %v3368_v27 = vld [vmem:[#allocation5 + $0x10] sm:$0xff]  ;;  %v9266_v17 = vpack.c.bf16 %v3364_v5, %v3363_v35  ;;  %v3365_v34 = vld [vmem:[#allocation8 + $0x30] sm:$0xff]  ;;  %v4063_v5 = vld [vmem:[#allocation8 + $0x118] sm:$0xff] }
 0x888   : > { %9225 = vmatpush3.bf16.msra.mxu0 %v11293_v16  ;;  %9281 = vmatpush3.bf16.msra.mxu1 %v11293_v16 }
 0x889   : > { %v3263_v37 = vadd.f32 %v6701_v63, %v3249_v20  ;;  %v3366_v20 = vld [vmem:[#allocation8 + $0x38] sm:$0xff] }
 0x88a   : > { %v3240_v23 = vpop.f32.mrb[216].mxu0 }
 0x88b   : > { %v3270_v39 = vmax.f32 %v3263_v37, 0.0  ;;  %v3250_v28 = vadd.f32 %v3240_v23, %v11260_v45  ;;  %v7916_v44 = vpop.f32.mrb[217].mxu0  ;;  %v3453_v45 = vld [vmem:[#allocation8 + $0x48] sm:$0xff]  ;;  %v4871_v37 = vld [vmem:[%s12479_s9 + $0x20] sm:$0xff] }
 0x88c   : > { %v9242_v47 = vpack.c.bf16 %v3453_v45, %v3452_v32  ;;  %v4872_v23 = vld [vmem:[%s12479_s9 + $0x28] sm:$0xff]  ;;  %v4875_v32 = vld [vmem:[%s12479_s9 + $0x40] sm:$0xff] }
 0x88d   : > { %v11301_v31 = vpack.c.bf16 %v3270_v39, %v3269_v25  ;;  %v3264_v46 = vadd.f32 %v6701_v63, %v3250_v28  ;;  %v3459_v63 = vld [vmem:[#allocation8 + $0x78] sm:$0xff]  ;;  %v9270_v25 = vpack.c.bf16 %v3366_v20, %v3365_v34  ;;  %v3708_v39 = vld [vmem:[#allocation8 + $0x80] sm:$0xff]  ;;  %v3709_v28 = vld [vmem:[#allocation8 + $0x88] sm:$0xff]  ;;  %v9477_v44 = vpack.c.bf16 %v4872_v23, %v4871_v37 }
 0x88e   : > { %v9254_v2 = vpack.c.bf16 %v3459_v63, %v3458_v6  ;;  %v4876_v45 = vld [vmem:[%s12479_s9 + $0x48] sm:$0xff]  ;;  %v3886_v6 = vld [vmem:[#allocation8 + $0xd0] sm:$0xff]  ;;  %v3887_v63 = vld [vmem:[#allocation8 + $0xd8] sm:$0xff] }
 0x88f   : > { %v11303_v11 = vmax.f32 %v3264_v46, 0.0  ;;  %9227 = vmatprep.subr.bf16.mxu0 %v11301_v31  ;;  %9283 = vmatprep.subr.bf16.mxu1 %v11301_v31  ;;  %v4874_v46 = vld [vmem:[%s12479_s9 + $0x38] sm:$0xff]  ;;  %v9318_v15 = vpack.c.bf16 %v3887_v63, %v3886_v6  ;;  %v4236_v20 = vld [vmem:[#allocation8 + $0x140] sm:$0xff] }
 0x890   : > { %9229 = vmatpush3.bf16.msra.mxu0 %v11301_v31  ;;  %9285 = vmatpush3.bf16.msra.mxu1 %v11301_v31  ;;  %v4595_v6 = vld [vmem:[#allocation8 + $0x1f8] sm:$0xff] }
 0x891   : > { %7929 = vmatprep.subr.msk.mxu0 %vm621_vm1, %v11303_v11  ;;  %8001 = vmatprep.subr.msk.mxu1 %vm621_vm1, %v11303_v11 }
 0x894   : > { %7930 = vmatpush3.msk.msra.mxu0 %vm621_vm1, %v11303_v11  ;;  %8002 = vmatpush3.msk.msra.mxu1 %vm621_vm1, %v11303_v11 }
 0x895   : > { %9231 = vmatprep.subr.bf16.mxu0 %v11286_v26  ;;  %9303 = vmatprep.subr.bf16.mxu1 %v11286_v26 }
 0x896   : > { %7932 = vmatmul.mubr.msk.f32.vlgmr.msra.gmra.mrb[218].mxu0 %vm3274_vm8, %v3273_v49  ;;  %8004 = vmatmul.mubr.msk.f32.vlgmr.msra.gmra.mrb[84].mxu1 %vm3274_vm8, %v3625_v42  ;;  %v3710_v49 = vld [vmem:[#allocation8 + $0x90] sm:$0xff]  ;;  %v3711_v42 = vld [vmem:[#allocation8 + $0x98] sm:$0xff] }
 0x897   : > { %9233 = vmatpush3.bf16.msra.mxu0 %v11286_v26  ;;  %9305 = vmatpush3.bf16.msra.mxu1 %v11286_v26 }
 0x898   : > { %9235 = vmatprep.subr.bf16.mxu0 %v11293_v16  ;;  %9307 = vmatprep.subr.bf16.mxu1 %v11293_v16 }
 0x899   : > { %7948 = vmatprep.mubr.msk.f32.mxu0 %vm3274_vm8, %v3368_v27  ;;  %8039 = vmatprep.mubr.msk.f32.mxu1 %vm3274_vm8, %v3800_v53 }
 0x89b   : > { %9237 = vmatpush3.bf16.msra.mxu0 %v11293_v16  ;;  %9309 = vmatpush3.bf16.msra.mxu1 %v11293_v16 }
 0x89c   : > { %9239 = vmatprep.subr.bf16.mxu0 %v11301_v31  ;;  %9311 = vmatprep.subr.bf16.mxu1 %v11301_v31 }
 0x89f   : > { %9241 = vmatpush3.bf16.msra.mxu0 %v11301_v31  ;;  %9313 = vmatpush3.bf16.msra.mxu1 %v11301_v31 }
 0x8a0   : > { %7946 = vmatprep.subr.msk.mxu0 %vm621_vm1, %v11303_v11  ;;  %8037 = vmatprep.subr.msk.mxu1 %vm621_vm1, %v11303_v11 }
 0x8a3   : > { %7947 = vmatpush3.msk.msra.mxu0 %vm621_vm1, %v11303_v11  ;;  %8038 = vmatpush3.msk.msra.mxu1 %vm621_vm1, %v11303_v11 }
 0x8a4   : > { %7949 = vmatmul.mubr.msk.f32.vlgmr.msra.gmra.mrb[220].mxu0 %vm3274_vm8, %v3369_v36  ;;  %9331 = vmatprep.subr.bf16.mxu1 %v11286_v26 }
 0x8a5   : > { %8040 = vmatmul.mubr.msk.f32.vlgmr.msra.gmra.mrb[86].mxu1 %vm3274_vm8, %v3801_v43  ;;  %9243 = vmatprep.subr.bf16.mxu0 %v9242_v47  ;;  %v9483_v43 = vpack.c.bf16 %v4876_v45, %v4875_v32  ;;  %v4412_v32 = vld [vmem:[#allocation8 + $0x180] sm:$0xff]  ;;  %v4413_v45 = vld [vmem:[#allocation8 + $0x188] sm:$0xff] }
 0x8a6   : > { %9333 = vmatpush3.bf16.msra.mxu1 %v11286_v26  ;;  %8075 = vmatprep.mubr.msk.f32.mxu1 %vm3274_vm8, %v3976_v14  ;;  %v4877_v14 = vld [vmem:[%s12479_s9 + $0x50] sm:$0xff] }
 0x8a7   : > { %9335 = vmatprep.subr.bf16.mxu1 %v11293_v16  ;;  %9245 = vmatpush3.bf16.msra.mxu0 %v9242_v47  ;;  %v9290_v47 = vpack.c.bf16 %v3711_v42, %v3710_v49 }
 0x8a8   : > { %9247 = vmatprep.subr.bf16.mxu0 %v9246_v52 }
 0x8aa   : > { %9337 = vmatpush3.bf16.msra.mxu1 %v11293_v16 }
 0x8ab   : > { %9339 = vmatprep.subr.bf16.mxu1 %v11301_v31  ;;  %9249 = vmatpush3.bf16.msra.mxu0 %v9246_v52  ;;  %v4878_v52 = vld [vmem:[%s12479_s9 + $0x58] sm:$0xff] }
 0x8ac   : > { %9251 = vmatprep.subr.bf16.mxu0 %v9250_v55 }
 0x8ae   : > { %9341 = vmatpush3.bf16.msra.mxu1 %v11301_v31 }
 0x8af   : > { %8073 = vmatprep.subr.msk.mxu1 %vm621_vm1, %v11303_v11  ;;  %9253 = vmatpush3.bf16.msra.mxu0 %v9250_v55  ;;  %v3715_v55 = vld [vmem:[#allocation8 + $0xb8] sm:$0xff] }
 0x8b0   : > { %9255 = vmatprep.subr.bf16.mxu0 %v9254_v2 }
 0x8b2   : > { %8074 = vmatpush3.msk.msra.mxu1 %vm621_vm1, %v11303_v11 }
 0x8b3   : > { %9359 = vmatprep.subr.bf16.mxu1 %v11286_v26  ;;  %8076 = vmatmul.mubr.msk.f32.vlgmr.msra.gmra.mrb[88].mxu1 %vm3274_vm8, %v3977_v56  ;;  %v9486_v56 = vpack.c.bf16 %v4878_v52, %v4877_v14  ;;  %v4418_v52 = vld [vmem:[#allocation8 + $0x1b0] sm:$0xff] }
 0x8b4   : > { %9361 = vmatpush3.bf16.msra.mxu1 %v11286_v26  ;;  %8111 = vmatprep.mubr.msk.f32.mxu1 %vm3274_vm8, %v4152_v57  ;;  %v4879_v57 = vld [vmem:[%s12479_s9 + $0x60] sm:$0xff] }
 0x8b5   : > { %9363 = vmatprep.subr.bf16.mxu1 %v11293_v16  ;;  %9257 = vmatpush3.bf16.msra.mxu0 %v9254_v2 }
 0x8b6   : > { %9259 = vmatprep.subr.bf16.mxu0 %v9258_v40 }
 0x8b8   : > { %9365 = vmatpush3.bf16.msra.mxu1 %v11293_v16 }
 0x8b9   : > { %9367 = vmatprep.subr.bf16.mxu1 %v11301_v31 }
 0x8bc   : > { %9369 = vmatpush3.bf16.msra.mxu1 %v11301_v31 }
 0x8bd   : > { %8109 = vmatprep.subr.msk.mxu1 %vm621_vm1, %v11303_v11 }
 0x8c0   : > { %8110 = vmatpush3.msk.msra.mxu1 %vm621_vm1, %v11303_v11 }
 0x8c1   : > { %9387 = vmatprep.subr.bf16.mxu1 %v11286_v26  ;;  %8112 = vmatmul.mubr.msk.f32.vlgmr.msra.gmra.mrb[90].mxu1 %vm3274_vm8, %v4153_v22  ;;  %v4880_v22 = vld [vmem:[%s12479_s9 + $0x68] sm:$0xff] }
 0x8c2   : > { %9389 = vmatpush3.bf16.msra.mxu1 %v11286_v26  ;;  %8147 = vmatprep.mubr.msk.f32.mxu1 %vm3274_vm8, %v4328_v41  ;;  %v9298_v41 = vpack.c.bf16 %v3715_v55, %v3714_v54  ;;  %v4588_v55 = vld [vmem:[#allocation8 + $0x1c0] sm:$0xff] }
 0x8c3   : > { %9391 = vmatprep.subr.bf16.mxu1 %v11293_v16 }
 0x8c6   : > { %9393 = vmatpush3.bf16.msra.mxu1 %v11293_v16 }
 0x8c7   : > { %9395 = vmatprep.subr.bf16.mxu1 %v11301_v31 }
 0x8ca   : > { %9397 = vmatpush3.bf16.msra.mxu1 %v11301_v31 }
 0x8cb   : > { %8145 = vmatprep.subr.msk.mxu1 %vm621_vm1, %v11303_v11 }
 0x8ce   : > { %8146 = vmatpush3.msk.msra.mxu1 %vm621_vm1, %v11303_v11 }
 0x8cf   : > { %9415 = vmatprep.subr.bf16.mxu1 %v11286_v26  ;;  %8148 = vmatmul.mubr.msk.f32.vlgmr.msra.gmra.mrb[92].mxu1 %vm3274_vm8, %v4329_v58  ;;  %v3884_v58 = vld [vmem:[#allocation8 + $0xc0] sm:$0xff] }
 0x8d0   : > { %9417 = vmatpush3.bf16.msra.mxu1 %v11286_v26  ;;  %8183 = vmatprep.mubr.msk.f32.mxu1 %vm3274_vm8, %v4504_v50  ;;  %v3885_v50 = vld [vmem:[#allocation8 + $0xc8] sm:$0xff] }
 0x8d1   : > { %9419 = vmatprep.subr.bf16.mxu1 %v11293_v16 }
 0x8d4   : > { %9421 = vmatpush3.bf16.msra.mxu1 %v11293_v16 }
 0x8d5   : > { %9423 = vmatprep.subr.bf16.mxu1 %v11301_v31 }
 0x8d8   : > { %9425 = vmatpush3.bf16.msra.mxu1 %v11301_v31 }
 0x8d9   : > { %8181 = vmatprep.subr.msk.mxu1 %vm621_vm1, %v11303_v11 }
 0x8dc   : > { %8182 = vmatpush3.msk.msra.mxu1 %vm621_vm1, %v11303_v11 }
 0x8dd   : > { %9443 = vmatprep.subr.bf16.mxu1 %v11286_v26  ;;  %8184 = vmatmul.mubr.msk.f32.vlgmr.msra.gmra.mrb[94].mxu1 %vm3274_vm8, %v4505_v60  ;;  %v9489_v60 = vpack.c.bf16 %v4880_v22, %v4879_v57  ;;  %v4590_v22 = vld [vmem:[#allocation8 + $0x1d0] sm:$0xff] }
 0x8de   : > { %9445 = vmatpush3.bf16.msra.mxu1 %v11286_v26  ;;  %8219 = vmatprep.mubr.msk.f32.mxu1 %vm3274_vm8, %v4680_v59  ;;  %v9314_v59 = vpack.c.bf16 %v3885_v50, %v3884_v58  ;;  %v4592_v50 = vld [vmem:[#allocation8 + $0x1e0] sm:$0xff] }
 0x8df   : > { %9447 = vmatprep.subr.bf16.mxu1 %v11293_v16 }
 0x8e2   : > { %9449 = vmatpush3.bf16.msra.mxu1 %v11293_v16  ;;  %v4870_v16 = vld [vmem:[%s12479_s9 + $0x18] sm:$0xff] }
 0x8e3   : > { %9451 = vmatprep.subr.bf16.mxu1 %v11301_v31  ;;  %v9474_v21 = vpack.c.bf16 %v4870_v16, %v4869_v12  ;;  %v9350_v12 = vpack.c.bf16 %v4065_v10, %v4064_v8  ;;  %v4067_v16 = vld [vmem:[#allocation8 + $0x138] sm:$0xff]  ;;  %v6748_v10 = vld [vmem:[%s12479_s9 + $0x80] sm:$0xff] }
 0x8e6   : > { %9453 = vmatpush3.bf16.msra.mxu1 %v11301_v31  ;;  %v4873_v31 = vld [vmem:[%s12479_s9 + $0x30] sm:$0xff] }
 0x8e7   : > { %8217 = vmatprep.subr.msk.mxu1 %vm621_vm1, %v11303_v11  ;;  %v9480_v27 = vpack.c.bf16 %v4874_v46, %v4873_v31  ;;  %v4242_v46 = vld [vmem:[#allocation8 + $0x170] sm:$0xff] }
 0x8ea   : > { %8218 = vmatpush3.msk.msra.mxu1 %vm621_vm1, %v11303_v11  ;;  %v9286_v11 = vpack.c.bf16 %v3709_v28, %v3708_v39  ;;  %v4240_v28 = vld [vmem:[#allocation8 + $0x160] sm:$0xff] }
 0x8eb   : > { %8220 = vmatmul.mubr.msk.f32.vlgmr.msra.gmra.mrb[96].mxu1 %vm3274_vm8, %v4681_v62  ;;  %9470 = vmatprep.subr.bf16.mxu1 %v10253_v0 }
 0x8ec   : > { %8273 = vmatprep.mubr.msk.f32.mxu1 %vm10254_vm0, %v10255_v1  ;;  %9472 = vmatpush3.bf16.msra.mxu1 %v9471_v13  ;;  %v4066_v13 = vld [vmem:[#allocation8 + $0x130] sm:$0xff] }
 0x8ed   : > { %9473 = vmatprep.subr.bf16.mxu1 %v10253_v0 }
 0x8f0   : > { %9475 = vmatpush3.bf16.msra.mxu1 %v9474_v21  ;;  %v4237_v21 = vld [vmem:[#allocation8 + $0x148] sm:$0xff] }
 0x8f1   : > { %9476 = vmatprep.subr.bf16.mxu1 %v10253_v0  ;;  %v9370_v23 = vpack.c.bf16 %v4237_v21, %v4236_v20  ;;  %v6750_v21 = vld [vmem:[%s12479_s9 + $0x90] sm:$0xff] }
 0x8f4   : > { %9478 = vmatpush3.bf16.msra.mxu1 %v9477_v44  ;;  %v4241_v44 = vld [vmem:[#allocation8 + $0x168] sm:$0xff] }
 0x8f5   : > { %9479 = vmatprep.subr.bf16.mxu1 %v10253_v0  ;;  %v9378_v31 = vpack.c.bf16 %v4241_v44, %v4240_v28  ;;  %v6754_v28 = vld [vmem:[%s12479_s9 + $0xb0] sm:$0xff]  ;;  %v6755_v44 = vld [vmem:[%s12479_s9 + $0xb8] sm:$0xff] }
 0x8f8   : > { %9481 = vmatpush3.bf16.msra.mxu1 %v9480_v27 }
 0x8f9   : > { %9482 = vmatprep.subr.bf16.mxu1 %v10253_v0 }
 0x8fc   : > { %9484 = vmatpush3.bf16.msra.mxu1 %v9483_v43  ;;  %v4417_v43 = vld [vmem:[#allocation8 + $0x1a8] sm:$0xff] }
 0x8fd   : > { %9485 = vmatprep.subr.bf16.mxu1 %v10253_v0  ;;  %v9406_v14 = vpack.c.bf16 %v4417_v43, %v4416_v38  ;;  %v6764_v43 = vld [vmem:[%s12479_s9 + $0x100] sm:$0xff] }
 0x900   : > { %9487 = vmatpush3.bf16.msra.mxu1 %v9486_v56  ;;  %v4589_v56 = vld [vmem:[#allocation8 + $0x1c8] sm:$0xff] }
 0x901   : > { %9488 = vmatprep.subr.bf16.mxu1 %v10253_v0  ;;  %v9426_v57 = vpack.c.bf16 %v4589_v56, %v4588_v55  ;;  %v6767_v55 = vld [vmem:[%s12479_s9 + $0x118] sm:$0xff] }
 0x904   : > { %9490 = vmatpush3.bf16.msra.mxu1 %v9489_v60  ;;  %v4593_v60 = vld [vmem:[#allocation8 + $0x1e8] sm:$0xff] }
 0x905   : > { %9491 = vmatprep.subr.bf16.mxu1 %v10253_v0 }
 0x969   : > { %v7933_v51 = vpop.f32.mrb[218].mxu0  ;;  %v11406_v61 = vpop.f32.mrb[84].mxu1 }
 0x96a   : > { %v3350_v9 = vpop.f32.mrb[219].mxu0  ;;  %v11408_v19 = vpop.f32.mrb[85].mxu1 }
 0x977   : > { %v7950_v26 = vpop.f32.mrb[220].mxu0 }
 0x978   : > { %v3442_v33 = vpop.f32.mrb[221].mxu0  ;;  %v11410_v4 = vpop.f32.mrb[86].mxu1 }
 0x979   : > { %7967 = vmatprep.mubr.msk.f32.mxu0 %vm3460_vm9, %v3442_v33  ;;  %v11413_v7 = vpop.f32.mrb[87].mxu1 }
 0x97a   : > { %7968 = vmatmul.mubr.msk.f32.vlgmr.msra.gmra.mrb[222].mxu0 %vm3460_vm9, %v7950_v26  ;;  %v4061_v26 = vld [vmem:[#allocation8 + $0x108] sm:$0xff] }
 0x97b   : > { %9261 = vmatpush3.bf16.msra.mxu0 %v9258_v40  ;;  %7986 = vmatprep.mubr.msk.f32.mxu0 %vm3460_vm9, %v3350_v9  ;;  %v3889_v40 = vld [vmem:[#allocation8 + $0xe8] sm:$0xff]  ;;  %v3890_v9 = vld [vmem:[#allocation8 + $0xf0] sm:$0xff]  ;;  %v9342_v35 = vpack.c.bf16 %v4061_v26, %v4060_v3 }
 0x97c   : > { %9263 = vmatprep.subr.bf16.mxu0 %v9262_v30  ;;  %v4770_v26 = vld [vmem:[#allocation8 + $0x230] sm:$0xff] }
 0x97f   : > { %9265 = vmatpush3.bf16.msra.mxu0 %v9262_v30 }
 0x980   : > { %9267 = vmatprep.subr.bf16.mxu0 %v9266_v17 }
 0x983   : > { %9269 = vmatpush3.bf16.msra.mxu0 %v9266_v17  ;;  %v9354_v17 = vpack.c.bf16 %v4067_v16, %v4066_v13 }
 0x984   : > { %9271 = vmatprep.subr.bf16.mxu0 %v9270_v25 }
 0x986   : > { %v11443_v53 = vpop.f32.mrb[88].mxu1 }
 0x987   : > { %9273 = vmatpush3.bf16.msra.mxu0 %v9270_v25  ;;  %v11452_v36 = vpop.f32.mrb[89].mxu1  ;;  %v4239_v25 = vld [vmem:[#allocation8 + $0x158] sm:$0xff] }
 0x988   : > { %9287 = vmatprep.subr.bf16.mxu0 %v9286_v11 }
 0x98a   : > { %7987 = vmatmul.mubr.msk.f32.vlgmr.msra.gmra.mrb[222].mxu0 %vm3460_vm9, %v7933_v51  ;;  %v9322_v51 = vpack.c.bf16 %v3889_v40, %v3888_v24  ;;  %v4766_v40 = vld [vmem:[#allocation8 + $0x210] sm:$0xff] }
 0x98b   : > { %9289 = vmatpush3.bf16.msra.mxu0 %v9286_v11  ;;  %8022 = vmatprep.mubr.msk.f32.mxu0 %vm3460_vm9, %v11408_v19  ;;  %v3891_v19 = vld [vmem:[#allocation8 + $0xf8] sm:$0xff] }
 0x98c   : > { %9291 = vmatprep.subr.bf16.mxu0 %v9290_v47  ;;  %v9326_v29 = vpack.c.bf16 %v3891_v19, %v3890_v9  ;;  %v4243_v11 = vld [vmem:[#allocation8 + $0x178] sm:$0xff]  ;;  %v4768_v19 = vld [vmem:[#allocation8 + $0x220] sm:$0xff] }
 0x98d   : > { %v9382_v27 = vpack.c.bf16 %v4243_v11, %v4242_v46  ;;  %v6756_v46 = vld [vmem:[%s12479_s9 + $0xc0] sm:$0xff]  ;;  %v6757_v11 = vld [vmem:[%s12479_s9 + $0xc8] sm:$0xff] }
 0x98f   : > { %9293 = vmatpush3.bf16.msra.mxu0 %v9290_v47  ;;  %v4414_v47 = vld [vmem:[#allocation8 + $0x190] sm:$0xff] }
 0x990   : > { %9295 = vmatprep.subr.bf16.mxu0 %v9294_v18 }
 0x993   : > { %9297 = vmatpush3.bf16.msra.mxu0 %v9294_v18  ;;  %v4419_v18 = vld [vmem:[#allocation8 + $0x1b8] sm:$0xff] }
 0x994   : > { %9299 = vmatprep.subr.bf16.mxu0 %v9298_v41  ;;  %v11472_v62 = vpop.f32.mrb[90].mxu1  ;;  %v9410_v54 = vpack.c.bf16 %v4419_v18, %v4418_v52 }
 0x995   : > { %v4226_v2 = vpop.f32.mrb[91].mxu1 }
 0x997   : > { %9301 = vmatpush3.bf16.msra.mxu0 %v9298_v41  ;;  %v4591_v41 = vld [vmem:[#allocation8 + $0x1d8] sm:$0xff] }
 0x998   : > { %9315 = vmatprep.subr.bf16.mxu0 %v9314_v59  ;;  %v9430_v58 = vpack.c.bf16 %v4591_v41, %v4590_v22  ;;  %v6769_v22 = vld [vmem:[%s12479_s9 + $0x128] sm:$0xff] }
 0x99a   : > { %8023 = vmatmul.mubr.msk.f32.vlgmr.msra.gmra.mrb[222].mxu0 %vm3460_vm9, %v11406_v61  ;;  %v4062_v61 = vld [vmem:[#allocation8 + $0x110] sm:$0xff] }
 0x99b   : > { %9317 = vmatpush3.bf16.msra.mxu0 %v9314_v59  ;;  %8058 = vmatprep.mubr.msk.f32.mxu0 %vm3460_vm9, %v11413_v7  ;;  %v9346_v7 = vpack.c.bf16 %v4063_v5, %v4062_v61  ;;  %v9434_v59 = vpack.c.bf16 %v4593_v60, %v4592_v50  ;;  %v4882_v61 = vld [vmem:[%s12479_s9 + $0x78] sm:$0xff] }
 0x99c   : > { %9319 = vmatprep.subr.bf16.mxu0 %v9318_v15  ;;  %v6771_v50 = vld [vmem:[%s12479_s9 + $0x138] sm:$0xff] }
 0x99f   : > { %9321 = vmatpush3.bf16.msra.mxu0 %v9318_v15  ;;  %v4765_v15 = vld [vmem:[#allocation8 + $0x208] sm:$0xff] }
 0x9a0   : > { %9323 = vmatprep.subr.bf16.mxu0 %v9322_v51 }
 0x9a2   : > { %v11479_v33 = vpop.f32.mrb[92].mxu1 }
 0x9a3   : > { %9325 = vmatpush3.bf16.msra.mxu0 %v9322_v51  ;;  %v4402_v30 = vpop.f32.mrb[93].mxu1  ;;  %v4767_v51 = vld [vmem:[#allocation8 + $0x218] sm:$0xff] }
 0x9a4   : > { %9327 = vmatprep.subr.bf16.mxu0 %v9326_v29  ;;  %v9458_v9 = vpack.c.bf16 %v4767_v51, %v4766_v40  ;;  %v6777_v40 = vld [vmem:[%s12479_s9 + $0x168] sm:$0xff] }
 0x9a7   : > { %9329 = vmatpush3.bf16.msra.mxu0 %v9326_v29  ;;  %v4769_v29 = vld [vmem:[#allocation8 + $0x228] sm:$0xff] }
 0x9a8   : > { %9343 = vmatprep.subr.bf16.mxu0 %v9342_v35  ;;  %v9462_v3 = vpack.c.bf16 %v4769_v29, %v4768_v19  ;;  %v6779_v19 = vld [vmem:[%s12479_s9 + $0x178] sm:$0xff] }
 0x9aa   : > { %8059 = vmatmul.mubr.msk.f32.vlgmr.msra.gmra.mrb[222].mxu0 %vm3460_vm9, %v11410_v4  ;;  %v4238_v4 = vld [vmem:[#allocation8 + $0x150] sm:$0xff] }
 0x9ab   : > { %9345 = vmatpush3.bf16.msra.mxu0 %v9342_v35  ;;  %8094 = vmatprep.mubr.msk.f32.mxu0 %vm3460_vm9, %v11452_v36  ;;  %v9374_v39 = vpack.c.bf16 %v4239_v25, %v4238_v4  ;;  %v9398_v36 = vpack.c.bf16 %v4413_v45, %v4412_v32  ;;  %v4881_v35 = vld [vmem:[%s12479_s9 + $0x70] sm:$0xff]  ;;  %v6752_v4 = vld [vmem:[%s12479_s9 + $0xa0] sm:$0xff]  ;;  %v6753_v25 = vld [vmem:[%s12479_s9 + $0xa8] sm:$0xff] }
 0x9ac   : > { %9347 = vmatprep.subr.bf16.mxu0 %v9346_v7  ;;  %v9492_v5 = vpack.c.bf16 %v4882_v61, %v4881_v35  ;;  %v6760_v45 = vld [vmem:[%s12479_s9 + $0xe0] sm:$0xff]  ;;  %v6782_v35 = vld [vmem:[%s12479_s9 + $0x190] sm:$0xff]  ;;  %v6783_v61 = vld [vmem:[%s12479_s9 + $0x198] sm:$0xff] }
 0x9ae   : > { %9493 = vmatpush3.bf16.msra.mxu1 %v9492_v5  ;;  %v9546_v5 = vpack.c.bf16 %v6783_v61, %v6782_v35  ;;  %v6821_v35 = vld [vmem:[%s12479_s9 + $0x2c8] sm:$0xff] }
 0x9af   : > { %9349 = vmatpush3.bf16.msra.mxu0 %v9346_v7  ;;  %9494 = vmatprep.subr.bf16.mxu1 %v10253_v0  ;;  %v6747_v7 = vld [vmem:[%s12478_s8] ss:$0 sm:$0xff] }
 0x9b0   : > { %9351 = vmatprep.subr.bf16.mxu0 %v9350_v12  ;;  %v11485_v34 = vpop.f32.mrb[94].mxu1 }
 0x9b1   : > { %v4578_v37 = vpop.f32.mrb[95].mxu1 }
 0x9b3   : > { %9353 = vmatpush3.bf16.msra.mxu0 %v9350_v12  ;;  %v6749_v12 = vld [vmem:[%s12479_s9 + $0x88] sm:$0xff] }
 0x9b4   : > { %9355 = vmatprep.subr.bf16.mxu0 %v9354_v17 }
 0x9b7   : > { %9357 = vmatpush3.bf16.msra.mxu0 %v9354_v17 }
 0x9b8   : > { %9371 = vmatprep.subr.bf16.mxu0 %v9370_v23 }
 0x9ba   : > { %8095 = vmatmul.mubr.msk.f32.vlgmr.msra.gmra.mrb[222].mxu0 %vm3460_vm9, %v11443_v53  ;;  %v4415_v53 = vld [vmem:[#allocation8 + $0x198] sm:$0xff] }
 0x9bb   : > { %9373 = vmatpush3.bf16.msra.mxu0 %v9370_v23  ;;  %8130 = vmatprep.mubr.msk.f32.mxu0 %vm3460_vm9, %v4226_v2  ;;  %v9402_v48 = vpack.c.bf16 %v4415_v53, %v4414_v47  ;;  %v4764_v2 = vld [vmem:[#allocation8 + $0x200] sm:$0xff]  ;;  %v6762_v53 = vld [vmem:[%s12479_s9 + $0xf0] sm:$0xff] }
 0x9bc   : > { %9375 = vmatprep.subr.bf16.mxu0 %v9374_v39  ;;  %v9454_v24 = vpack.c.bf16 %v4765_v15, %v4764_v2  ;;  %v6775_v2 = vld [vmem:[%s12479_s9 + $0x158] sm:$0xff] }
 0x9be   : > { %v11490_v49 = vpop.f32.mrb[96].mxu1 }
 0x9bf   : > { %9377 = vmatpush3.bf16.msra.mxu0 %v9374_v39  ;;  %v4754_v42 = vpop.f32.mrb[97].mxu1  ;;  %v9501_v39 = vpack.c.bf16 %v6753_v25, %v6752_v4  ;;  %v6791_v4 = vld [vmem:[%s12479_s9 + $0x1d8] sm:$0xff] }
 0x9c0   : > { %9379 = vmatprep.subr.bf16.mxu0 %v9378_v31 }
 0x9c3   : > { %9381 = vmatpush3.bf16.msra.mxu0 %v9378_v31  ;;  %v9504_v31 = vpack.c.bf16 %v6755_v44, %v6754_v28  ;;  %v6793_v28 = vld [vmem:[%s12479_s9 + $0x1e8] sm:$0xff] }
 0x9c4   : > { %9383 = vmatprep.subr.bf16.mxu0 %v9382_v27 }
 0x9c7   : > { %9385 = vmatpush3.bf16.msra.mxu0 %v9382_v27  ;;  %v6759_v27 = vld [vmem:[%s12479_s9 + $0xd8] sm:$0xff] }
 0x9c8   : > { %9399 = vmatprep.subr.bf16.mxu0 %v9398_v36 }
 0x9ca   : > { %8131 = vmatmul.mubr.msk.f32.vlgmr.msra.gmra.mrb[222].mxu0 %vm3460_vm9, %v11472_v62  ;;  %v4594_v62 = vld [vmem:[#allocation8 + $0x1f0] sm:$0xff] }
 0x9cb   : > { %9401 = vmatpush3.bf16.msra.mxu0 %v9398_v36  ;;  %8166 = vmatprep.mubr.msk.f32.mxu0 %vm3460_vm9, %v4402_v30  ;;  %v9438_v63 = vpack.c.bf16 %v4595_v6, %v4594_v62  ;;  %v6761_v36 = vld [vmem:[%s12479_s9 + $0xe8] sm:$0xff] }
 0x9cc   : > { %9403 = vmatprep.subr.bf16.mxu0 %v9402_v48  ;;  %v9513_v47 = vpack.c.bf16 %v6761_v36, %v6760_v45  ;;  %v6773_v62 = vld [vmem:[%s12479_s9 + $0x148] sm:$0xff]  ;;  %v6798_v45 = vld [vmem:[%s12479_s9 + $0x210] sm:$0xff]  ;;  %v6799_v36 = vld [vmem:[%s12479_s9 + $0x218] sm:$0xff] }
 0x9cf   : > { %9405 = vmatpush3.bf16.msra.mxu0 %v9402_v48  ;;  %v6763_v48 = vld [vmem:[%s12479_s9 + $0xf8] sm:$0xff] }
 0x9d0   : > { %9407 = vmatprep.subr.bf16.mxu0 %v9406_v14  ;;  %v9516_v38 = vpack.c.bf16 %v6763_v48, %v6762_v53  ;;  %v6800_v53 = vld [vmem:[%s12479_s9 + $0x220] sm:$0xff]  ;;  %v6801_v48 = vld [vmem:[%s12479_s9 + $0x228] sm:$0xff] }
 0x9d3   : > { %9409 = vmatpush3.bf16.msra.mxu0 %v9406_v14  ;;  %v6765_v14 = vld [vmem:[%s12479_s9 + $0x108] sm:$0xff] }
 0x9d4   : > { %9411 = vmatprep.subr.bf16.mxu0 %v9410_v54  ;;  %v9519_v52 = vpack.c.bf16 %v6765_v14, %v6764_v43  ;;  %v6802_v43 = vld [vmem:[%s12479_s9 + $0x230] sm:$0xff]  ;;  %v6803_v14 = vld [vmem:[%s12479_s9 + $0x238] sm:$0xff] }
 0x9d7   : > { %9413 = vmatpush3.bf16.msra.mxu0 %v9410_v54  ;;  %v6766_v54 = vld [vmem:[%s12479_s9 + $0x110] sm:$0xff] }
 0x9d8   : > { %9427 = vmatprep.subr.bf16.mxu0 %v9426_v57  ;;  %v9522_v56 = vpack.c.bf16 %v6767_v55, %v6766_v54  ;;  %v6805_v54 = vld [vmem:[%s12479_s9 + $0x248] sm:$0xff] }
 0x9da   : > { %8167 = vmatmul.mubr.msk.f32.vlgmr.msra.gmra.mrb[222].mxu0 %vm3460_vm9, %v11479_v33  ;;  %v4771_v33 = vld [vmem:[#allocation8 + $0x238] sm:$0xff] }
 0x9db   : > { %9429 = vmatpush3.bf16.msra.mxu0 %v9426_v57  ;;  %8202 = vmatprep.mubr.msk.f32.mxu0 %vm3460_vm9, %v4578_v37  ;;  %v9466_v30 = vpack.c.bf16 %v4771_v33, %v4770_v26  ;;  %v6751_v37 = vld [vmem:[%s12479_s9 + $0x98] sm:$0xff]  ;;  %v6768_v57 = vld [vmem:[%s12479_s9 + $0x120] sm:$0xff]  ;;  %v6781_v26 = vld [vmem:[%s12479_s9 + $0x188] sm:$0xff] }
 0x9dc   : > { %9431 = vmatprep.subr.bf16.mxu0 %v9430_v58  ;;  %v9498_v23 = vpack.c.bf16 %v6751_v37, %v6750_v21  ;;  %v9525_v41 = vpack.c.bf16 %v6769_v22, %v6768_v57  ;;  %v6789_v21 = vld [vmem:[%s12479_s9 + $0x1c8] sm:$0xff]  ;;  %v6807_v57 = vld [vmem:[%s12479_s9 + $0x258] sm:$0xff] }
 0x9df   : > { %9433 = vmatpush3.bf16.msra.mxu0 %v9430_v58  ;;  %v6770_v58 = vld [vmem:[%s12479_s9 + $0x130] sm:$0xff] }
 0x9e0   : > { %9435 = vmatprep.subr.bf16.mxu0 %v9434_v59  ;;  %v9528_v60 = vpack.c.bf16 %v6771_v50, %v6770_v58  ;;  %v6809_v58 = vld [vmem:[%s12479_s9 + $0x268] sm:$0xff] }
 0x9e3   : > { %9437 = vmatpush3.bf16.msra.mxu0 %v9434_v59  ;;  %v6772_v59 = vld [vmem:[%s12479_s9 + $0x140] sm:$0xff] }
 0x9e4   : > { %9439 = vmatprep.subr.bf16.mxu0 %v9438_v63  ;;  %v9531_v6 = vpack.c.bf16 %v6773_v62, %v6772_v59  ;;  %v6811_v59 = vld [vmem:[%s12479_s9 + $0x278] sm:$0xff] }
 0x9e7   : > { %9441 = vmatpush3.bf16.msra.mxu0 %v9438_v63  ;;  %v6774_v63 = vld [vmem:[%s12479_s9 + $0x150] sm:$0xff] }
 0x9e8   : > { %9455 = vmatprep.subr.bf16.mxu0 %v9454_v24  ;;  %v9534_v15 = vpack.c.bf16 %v6775_v2, %v6774_v63  ;;  %v6813_v63 = vld [vmem:[%s12479_s9 + $0x288] sm:$0xff] }
 0x9ea   : > { %8203 = vmatmul.mubr.msk.f32.vlgmr.msra.gmra.mrb[222].mxu0 %vm3460_vm9, %v11485_v34  ;;  %v9495_v34 = vpack.c.bf16 %v6749_v12, %v6748_v10  ;;  %v6786_v12 = vld [vmem:[%s12479_s9 + $0x1b0] sm:$0xff] }
 0x9eb   : > { %9457 = vmatpush3.bf16.msra.mxu0 %v9454_v24  ;;  %8238 = vmatprep.mubr.msk.f32.mxu0 %vm3460_vm9, %v4754_v42  ;;  %v6758_v42 = vld [vmem:[%s12479_s9 + $0xd0] sm:$0xff]  ;;  %v6776_v24 = vld [vmem:[%s12479_s9 + $0x160] sm:$0xff] }
 0x9ec   : > { %9459 = vmatprep.subr.bf16.mxu0 %v9458_v9  ;;  %v9510_v32 = vpack.c.bf16 %v6759_v27, %v6758_v42  ;;  %v9537_v51 = vpack.c.bf16 %v6777_v40, %v6776_v24  ;;  %v6797_v42 = vld [vmem:[%s12479_s9 + $0x208] sm:$0xff]  ;;  %v6814_v24 = vld [vmem:[%s12479_s9 + $0x290] sm:$0xff]  ;;  %v6815_v40 = vld [vmem:[%s12479_s9 + $0x298] sm:$0xff] }
 0x9ef   : > { %9461 = vmatpush3.bf16.msra.mxu0 %v9458_v9  ;;  %v6778_v9 = vld [vmem:[%s12479_s9 + $0x170] sm:$0xff] }
 0x9f0   : > { %9463 = vmatprep.subr.bf16.mxu0 %v9462_v3  ;;  %v9540_v29 = vpack.c.bf16 %v6779_v19, %v6778_v9  ;;  %v6816_v9 = vld [vmem:[%s12479_s9 + $0x2a0] sm:$0xff]  ;;  %v6817_v19 = vld [vmem:[%s12479_s9 + $0x2a8] sm:$0xff] }
 0x9f3   : > { %9465 = vmatpush3.bf16.msra.mxu0 %v9462_v3  ;;  %v6780_v3 = vld [vmem:[%s12479_s9 + $0x180] sm:$0xff] }
 0x9f4   : > { %9467 = vmatprep.subr.bf16.mxu0 %v9466_v30  ;;  %v9543_v33 = vpack.c.bf16 %v6781_v26, %v6780_v3  ;;  %v6818_v3 = vld [vmem:[%s12479_s9 + $0x2b0] sm:$0xff]  ;;  %v6819_v26 = vld [vmem:[%s12479_s9 + $0x2b8] sm:$0xff] }
 0x9f7   : > { %9469 = vmatpush3.bf16.msra.mxu0 %v9466_v30 }
 0x9f8   : > { %9854 = vmatprep.subr.bf16.mxu0 %v10253_v0 }
 0x9fa   : > { %8239 = vmatmul.mubr.msk.f32.vlgmr.msra.gmra.mrb[222].mxu0 %vm3460_vm9, %v11490_v49  ;;  %v9507_v49 = vpack.c.bf16 %v6757_v11, %v6756_v46  ;;  %v6795_v46 = vld [vmem:[%s12479_s9 + $0x1f8] sm:$0xff] }
 0x9fb   : > { %8833 = vmatprep.mubr.msk.f32.mxu0 %vm10254_vm0, %v10255_v1 }
 0xacd   : > { %v8240_v8 = vpop.f32.mrb[222].mxu0 }
 0xace   : > { %v11522_v13 = vadd.f32 %v8240_v8, %v6747_v7  ;;  %v4844_v16 = vpop.f32.mrb[223].mxu0  ;;  %v6785_v8 = vld [vmem:[%s12479_s9 + $0x1a8] sm:$0xff] }
 0xacf   : > { %v4862_v17 = vadd.f32 %v6747_v7, %v4844_v16  ;;  %v6784_v7 = vld [vmem:[%s12479_s9 + $0x1a0] sm:$0xff]  ;;  %v6787_v16 = vld [vmem:[%s12479_s9 + $0x1b8] sm:$0xff] }
 0xad0   : > { %v9549_v10 = vpack.c.bf16 %v6785_v8, %v6784_v7  ;;  %v6823_v7 = vld [vmem:[%s12479_s9 + $0x2d8] sm:$0xff] }
 0xad1   : > { %v11524_v20 = vmax.f32 %v4862_v17, 0.0  ;;  %v9552_v17 = vpack.c.bf16 %v6787_v16, %v6786_v12  ;;  %v6825_v12 = vld [vmem:[%s12479_s9 + $0x2e8] sm:$0xff] }
 0xad3   : > { %8274 = vmatmul.mubr.f32.vlgmr.msra.gmra.mrb[98].mxu1 %v11524_v20  ;;  %v4972_v18 = vrot.slane %v11524_v20, 1  ;;  %v5062_v30 = vrot.slane %v11524_v20, 2 }
 0xad4   : > { %9496 = vmatpush3.bf16.msra.mxu1 %v9495_v34  ;;  %8308 = vmatprep.mubr.msk.f32.mxu1 %vm10254_vm0, %v10255_v1  ;;  %v6788_v34 = vld [vmem:[%s12479_s9 + $0x1c0] sm:$0xff] }
 0xad5   : > { %9497 = vmatprep.subr.bf16.mxu1 %v10253_v0  ;;  %v9555_v37 = vpack.c.bf16 %v6789_v21, %v6788_v34  ;;  %v6827_v34 = vld [vmem:[%s12479_s9 + $0x2f8] sm:$0xff] }
 0xad8   : > { %9499 = vmatpush3.bf16.msra.mxu1 %v9498_v23  ;;  %v6790_v23 = vld [vmem:[%s12479_s9 + $0x1d0] sm:$0xff] }
 0xad9   : > { %9500 = vmatprep.subr.bf16.mxu1 %v10253_v0  ;;  %v9558_v25 = vpack.c.bf16 %v6791_v4, %v6790_v23  ;;  %v6829_v23 = vld [vmem:[%s12479_s9 + $0x308] sm:$0xff] }
 0xadc   : > { %9502 = vmatpush3.bf16.msra.mxu1 %v9501_v39  ;;  %v6792_v39 = vld [vmem:[%s12479_s9 + $0x1e0] sm:$0xff] }
 0xadd   : > { %9503 = vmatprep.subr.bf16.mxu1 %v10253_v0  ;;  %v9561_v44 = vpack.c.bf16 %v6793_v28, %v6792_v39  ;;  %v6830_v39 = vld [vmem:[%s12479_s9 + $0x310] sm:$0xff]  ;;  %v6831_v28 = vld [vmem:[%s12479_s9 + $0x318] sm:$0xff] }
 0xae0   : > { %9505 = vmatpush3.bf16.msra.mxu1 %v9504_v31  ;;  %v6794_v31 = vld [vmem:[%s12479_s9 + $0x1f0] sm:$0xff] }
 0xae1   : > { %9506 = vmatprep.subr.bf16.mxu1 %v10253_v0  ;;  %v9564_v11 = vpack.c.bf16 %v6795_v46, %v6794_v31  ;;  %v6832_v31 = vld [vmem:[%s12479_s9 + $0x320] sm:$0xff]  ;;  %v6833_v46 = vld [vmem:[%s12479_s9 + $0x328] sm:$0xff] }
 0xae4   : > { %9508 = vmatpush3.bf16.msra.mxu1 %v9507_v49  ;;  %v6796_v49 = vld [vmem:[%s12479_s9 + $0x200] sm:$0xff] }
 0xae5   : > { %9509 = vmatprep.subr.bf16.mxu1 %v10253_v0  ;;  %v9567_v27 = vpack.c.bf16 %v6797_v42, %v6796_v49  ;;  %v6834_v49 = vld [vmem:[%s12479_s9 + $0x330] sm:$0xff]  ;;  %v6835_v42 = vld [vmem:[%s12479_s9 + $0x338] sm:$0xff] }
 0xae8   : > { %9511 = vmatpush3.bf16.msra.mxu1 %v9510_v32  ;;  %v5152_v32 = vrot.slane %v11524_v20, 3 }
 0xae9   : > { %9512 = vmatprep.subr.bf16.mxu1 %v10253_v0 }
 0xaec   : > { %9514 = vmatpush3.bf16.msra.mxu1 %v9513_v47  ;;  %v9570_v47 = vpack.c.bf16 %v6799_v36, %v6798_v45  ;;  %v6837_v45 = vld [vmem:[%s12479_s9 + $0x348] sm:$0xff] }
 0xaed   : > { %9515 = vmatprep.subr.bf16.mxu1 %v10253_v0 }
 0xaf0   : > { %9517 = vmatpush3.bf16.msra.mxu1 %v9516_v38  ;;  %v9573_v38 = vpack.c.bf16 %v6801_v48, %v6800_v53  ;;  %v6839_v53 = vld [vmem:[%s12479_s9 + $0x358] sm:$0xff] }
 0xaf1   : > { %9518 = vmatprep.subr.bf16.mxu1 %v10253_v0 }
 0xaf3   : > { %8309 = vmatmul.mubr.f32.vlgmr.msra.gmra.mrb[98].mxu1 %v4972_v18  ;;  %v6804_v18 = vld [vmem:[%s12479_s9 + $0x240] sm:$0xff] }
 0xaf4   : > { %9520 = vmatpush3.bf16.msra.mxu1 %v9519_v52  ;;  %8343 = vmatprep.mubr.msk.f32.mxu1 %vm10254_vm0, %v10255_v1  ;;  %v9576_v52 = vpack.c.bf16 %v6803_v14, %v6802_v43  ;;  %v9579_v55 = vpack.c.bf16 %v6805_v54, %v6804_v18  ;;  %v6841_v43 = vld [vmem:[%s12479_s9 + $0x368] sm:$0xff]  ;;  %v6843_v18 = vld [vmem:[%s12479_s9 + $0x378] sm:$0xff] }
 0xaf5   : > { %9521 = vmatprep.subr.bf16.mxu1 %v10253_v0 }
 0xaf8   : > { %9523 = vmatpush3.bf16.msra.mxu1 %v9522_v56  ;;  %v6806_v56 = vld [vmem:[%s12479_s9 + $0x250] sm:$0xff] }
 0xaf9   : > { %9524 = vmatprep.subr.bf16.mxu1 %v10253_v0  ;;  %v9582_v22 = vpack.c.bf16 %v6807_v57, %v6806_v56  ;;  %v6845_v56 = vld [vmem:[%s12479_s9 + $0x388] sm:$0xff] }
 0xafc   : > { %9526 = vmatpush3.bf16.msra.mxu1 %v9525_v41  ;;  %v6808_v41 = vld [vmem:[%s12479_s9 + $0x260] sm:$0xff] }
 0xafd   : > { %9527 = vmatprep.subr.bf16.mxu1 %v10253_v0  ;;  %v9585_v50 = vpack.c.bf16 %v6809_v58, %v6808_v41  ;;  %v6846_v41 = vld [vmem:[%s12479_s9 + $0x390] sm:$0xff]  ;;  %v6847_v58 = vld [vmem:[%s12479_s9 + $0x398] sm:$0xff] }
 0xb00   : > { %9529 = vmatpush3.bf16.msra.mxu1 %v9528_v60  ;;  %v6810_v60 = vld [vmem:[%s12479_s9 + $0x270] sm:$0xff] }
 0xb01   : > { %9530 = vmatprep.subr.bf16.mxu1 %v10253_v0  ;;  %v9588_v62 = vpack.c.bf16 %v6811_v59, %v6810_v60  ;;  %v6848_v60 = vld [vmem:[%s12479_s9 + $0x3a0] sm:$0xff]  ;;  %v6849_v59 = vld [vmem:[%s12479_s9 + $0x3a8] sm:$0xff] }
 0xb04   : > { %9532 = vmatpush3.bf16.msra.mxu1 %v9531_v6  ;;  %v6812_v6 = vld [vmem:[%s12479_s9 + $0x280] sm:$0xff] }
 0xb05   : > { %9533 = vmatprep.subr.bf16.mxu1 %v10253_v0  ;;  %v9591_v2 = vpack.c.bf16 %v6813_v63, %v6812_v6  ;;  %v6850_v6 = vld [vmem:[%s12479_s9 + $0x3b0] sm:$0xff]  ;;  %v6851_v63 = vld [vmem:[%s12479_s9 + $0x3b8] sm:$0xff] }
 0xb08   : > { %9535 = vmatpush3.bf16.msra.mxu1 %v9534_v15  ;;  %v5242_v15 = vrot.slane %v11524_v20, 4 }
 0xb09   : > { %9536 = vmatprep.subr.bf16.mxu1 %v10253_v0 }
 0xb0c   : > { %9538 = vmatpush3.bf16.msra.mxu1 %v9537_v51  ;;  %v9594_v51 = vpack.c.bf16 %v6815_v40, %v6814_v24  ;;  %v6853_v24 = vld [vmem:[%s12479_s9 + $0x3c8] sm:$0xff] }
 0xb0d   : > { %9539 = vmatprep.subr.bf16.mxu1 %v10253_v0 }
 0xb10   : > { %9541 = vmatpush3.bf16.msra.mxu1 %v9540_v29  ;;  %v9597_v29 = vpack.c.bf16 %v6817_v19, %v6816_v9  ;;  %v6855_v9 = vld [vmem:[%s12479_s9 + $0x3d8] sm:$0xff] }
 0xb11   : > { %9542 = vmatprep.subr.bf16.mxu1 %v10253_v0 }
 0xb13   : > { %8344 = vmatmul.mubr.f32.vlgmr.msra.gmra.mrb[98].mxu1 %v5062_v30  ;;  %v6820_v30 = vld [vmem:[%s12479_s9 + $0x2c0] sm:$0xff] }
 0xb14   : > { %9544 = vmatpush3.bf16.msra.mxu1 %v9543_v33  ;;  %8378 = vmatprep.mubr.msk.f32.mxu1 %vm10254_vm0, %v10255_v1  ;;  %v9600_v33 = vpack.c.bf16 %v6819_v26, %v6818_v3  ;;  %v9603_v61 = vpack.c.bf16 %v6821_v35, %v6820_v30  ;;  %v6857_v3 = vld [vmem:[%s12479_s9 + $0x3e8] sm:$0xff]  ;;  %v6859_v30 = vld [vmem:[%s12479_s9 + $0x3f8] sm:$0xff] }
 0xb15   : > { %9545 = vmatprep.subr.bf16.mxu1 %v10253_v0 }
 0xb18   : > { %9547 = vmatpush3.bf16.msra.mxu1 %v9546_v5  ;;  %v6822_v5 = vld [vmem:[%s12479_s9 + $0x2d0] sm:$0xff] }
 0xb19   : > { %9548 = vmatprep.subr.bf16.mxu1 %v10253_v0  ;;  %v9606_v8 = vpack.c.bf16 %v6823_v7, %v6822_v5  ;;  %v6861_v5 = vld [vmem:[%s12479_s9 + $0x408] sm:$0xff] }
 0xb1c   : > { %9550 = vmatpush3.bf16.msra.mxu1 %v9549_v10  ;;  %v6824_v10 = vld [vmem:[%s12479_s9 + $0x2e0] sm:$0xff] }
 0xb1d   : > { %9551 = vmatprep.subr.bf16.mxu1 %v10253_v0  ;;  %v9609_v16 = vpack.c.bf16 %v6825_v12, %v6824_v10  ;;  %v6862_v10 = vld [vmem:[%s12479_s9 + $0x410] sm:$0xff]  ;;  %v6863_v12 = vld [vmem:[%s12479_s9 + $0x418] sm:$0xff] }
 0xb20   : > { %9553 = vmatpush3.bf16.msra.mxu1 %v9552_v17  ;;  %v6826_v17 = vld [vmem:[%s12479_s9 + $0x2f0] sm:$0xff] }
 0xb21   : > { %9554 = vmatprep.subr.bf16.mxu1 %v10253_v0  ;;  %v9612_v21 = vpack.c.bf16 %v6827_v34, %v6826_v17  ;;  %v6865_v17 = vld [vmem:[%s12479_s9 + $0x428] sm:$0xff] }
 0xb24   : > { %9556 = vmatpush3.bf16.msra.mxu1 %v9555_v37  ;;  %v6828_v37 = vld [vmem:[%s12479_s9 + $0x300] sm:$0xff] }
 0xb25   : > { %9557 = vmatprep.subr.bf16.mxu1 %v10253_v0  ;;  %v9615_v4 = vpack.c.bf16 %v6829_v23, %v6828_v37  ;;  %v6867_v37 = vld [vmem:[%s12479_s9 + $0x438] sm:$0xff] }
 0xb28   : > { %9559 = vmatpush3.bf16.msra.mxu1 %v9558_v25  ;;  %v5332_v25 = vrot.slane %v11524_v20, 5 }
 0xb29   : > { %9560 = vmatprep.subr.bf16.mxu1 %v10253_v0 }
 0xb2c   : > { %9562 = vmatpush3.bf16.msra.mxu1 %v9561_v44  ;;  %v9618_v44 = vpack.c.bf16 %v6831_v28, %v6830_v39  ;;  %v6870_v28 = vld [vmem:[%s12479_s9 + $0x450] sm:$0xff] }
 0xb2d   : > { %9563 = vmatprep.subr.bf16.mxu1 %v10253_v0 }
 0xb30   : > { %9565 = vmatpush3.bf16.msra.mxu1 %v9564_v11  ;;  %v9621_v11 = vpack.c.bf16 %v6833_v46, %v6832_v31  ;;  %v6872_v46 = vld [vmem:[%s12479_s9 + $0x460] sm:$0xff] }
 0xb31   : > { %9566 = vmatprep.subr.bf16.mxu1 %v10253_v0 }
 0xb33   : > { %8379 = vmatmul.mubr.f32.vlgmr.msra.gmra.mrb[98].mxu1 %v5152_v32  ;;  %v6836_v32 = vld [vmem:[%s12479_s9 + $0x340] sm:$0xff] }
 0xb34   : > { %9568 = vmatpush3.bf16.msra.mxu1 %v9567_v27  ;;  %8413 = vmatprep.mubr.msk.f32.mxu1 %vm10254_vm0, %v10255_v1  ;;  %v9624_v27 = vpack.c.bf16 %v6835_v42, %v6834_v49  ;;  %v9627_v36 = vpack.c.bf16 %v6837_v45, %v6836_v32  ;;  %v6874_v42 = vld [vmem:[%s12479_s9 + $0x470] sm:$0xff]  ;;  %v6876_v45 = vld [vmem:[%s12479_s9 + $0x480] sm:$0xff] }
 0xb35   : > { %9569 = vmatprep.subr.bf16.mxu1 %v10253_v0 }
 0xb38   : > { %9571 = vmatpush3.bf16.msra.mxu1 %v9570_v47  ;;  %v6838_v47 = vld [vmem:[%s12479_s9 + $0x350] sm:$0xff] }
 0xb39   : > { %9572 = vmatprep.subr.bf16.mxu1 %v10253_v0  ;;  %v9630_v48 = vpack.c.bf16 %v6839_v53, %v6838_v47  ;;  %v11998_v53 = vmax.f32 %v11522_v13, 0.0  ;;  %v6880_v13 = vld [vmem:[%s12479_s9 + $0x4a0] sm:$0xff] }
 0xb3c   : > { %9574 = vmatpush3.bf16.msra.mxu1 %v9573_v38  ;;  %v6840_v38 = vld [vmem:[%s12479_s9 + $0x360] sm:$0xff] }
 0xb3d   : > { %9575 = vmatprep.subr.bf16.mxu1 %v10253_v0  ;;  %v9633_v14 = vpack.c.bf16 %v6841_v43, %v6840_v38  ;;  %v6879_v38 = vld [vmem:[%s12479_s9 + $0x498] sm:$0xff] }
 0xb40   : > { %9577 = vmatpush3.bf16.msra.mxu1 %v9576_v52  ;;  %v6842_v52 = vld [vmem:[%s12479_s9 + $0x370] sm:$0xff] }
 0xb41   : > { %9578 = vmatprep.subr.bf16.mxu1 %v10253_v0  ;;  %v9636_v54 = vpack.c.bf16 %v6843_v18, %v6842_v52  ;;  %v6882_v18 = vld [vmem:[%s12479_s9 + $0x4b0] sm:$0xff] }
 0xb44   : > { %9580 = vmatpush3.bf16.msra.mxu1 %v9579_v55  ;;  %v6844_v55 = vld [vmem:[%s12479_s9 + $0x380] sm:$0xff] }
 0xb45   : > { %9581 = vmatprep.subr.bf16.mxu1 %v10253_v0  ;;  %v9639_v57 = vpack.c.bf16 %v6845_v56, %v6844_v55  ;;  %v6884_v56 = vld [vmem:[%s12479_s9 + $0x4c0] sm:$0xff] }
 0xb48   : > { %9583 = vmatpush3.bf16.msra.mxu1 %v9582_v22  ;;  %v5422_v22 = vrot.slane %v11524_v20, 6 }
 0xb49   : > { %9584 = vmatprep.subr.bf16.mxu1 %v10253_v0 }
 0xb4c   : > { %9586 = vmatpush3.bf16.msra.mxu1 %v9585_v50  ;;  %v9642_v50 = vpack.c.bf16 %v6847_v58, %v6846_v41  ;;  %v6886_v41 = vld [vmem:[%s12479_s9 + $0x4d0] sm:$0xff]  ;;  %v6887_v58 = vld [vmem:[%s12479_s9 + $0x4d8] sm:$0xff] }
 0xb4d   : > { %9587 = vmatprep.subr.bf16.mxu1 %v10253_v0 }
 0xb50   : > { %9589 = vmatpush3.bf16.msra.mxu1 %v9588_v62  ;;  %v9645_v62 = vpack.c.bf16 %v6849_v59, %v6848_v60  ;;  %v6888_v60 = vld [vmem:[%s12479_s9 + $0x4e0] sm:$0xff]  ;;  %v6889_v59 = vld [vmem:[%s12479_s9 + $0x4e8] sm:$0xff] }
 0xb51   : > { %9590 = vmatprep.subr.bf16.mxu1 %v10253_v0 }
 0xb53   : > { %8414 = vmatmul.mubr.f32.vlgmr.msra.gmra.mrb[98].mxu1 %v5242_v15  ;;  %v6852_v15 = vld [vmem:[%s12479_s9 + $0x3c0] sm:$0xff] }
 0xb54   : > { %9592 = vmatpush3.bf16.msra.mxu1 %v9591_v2  ;;  %8448 = vmatprep.mubr.msk.f32.mxu1 %vm10254_vm0, %v10255_v1  ;;  %v9648_v2 = vpack.c.bf16 %v6851_v63, %v6850_v6  ;;  %v9651_v40 = vpack.c.bf16 %v6853_v24, %v6852_v15  ;;  %v6890_v6 = vld [vmem:[%s12479_s9 + $0x4f0] sm:$0xff]  ;;  %v6891_v63 = vld [vmem:[%s12479_s9 + $0x4f8] sm:$0xff]  ;;  %v6892_v15 = vld [vmem:[%s12479_s9 + $0x500] sm:$0xff] }
 0xb55   : > { %9593 = vmatprep.subr.bf16.mxu1 %v10253_v0  ;;  %v6893_v24 = vld [vmem:[%s12479_s9 + $0x508] sm:$0xff] }
 0xb58   : > { %9595 = vmatpush3.bf16.msra.mxu1 %v9594_v51  ;;  %v6854_v51 = vld [vmem:[%s12479_s9 + $0x3d0] sm:$0xff] }
 0xb59   : > { %9596 = vmatprep.subr.bf16.mxu1 %v10253_v0  ;;  %v9654_v19 = vpack.c.bf16 %v6855_v9, %v6854_v51  ;;  %v5691_v51 = vrot.slane %v11998_v53, 1  ;;  %v6894_v9 = vld [vmem:[%s12479_s9 + $0x510] sm:$0xff] }
 0xb5c   : > { %9598 = vmatpush3.bf16.msra.mxu1 %v9597_v29  ;;  %v6856_v29 = vld [vmem:[%s12479_s9 + $0x3e0] sm:$0xff] }
 0xb5d   : > { %9599 = vmatprep.subr.bf16.mxu1 %v10253_v0  ;;  %v9657_v26 = vpack.c.bf16 %v6857_v3, %v6856_v29  ;;  %v6896_v3 = vld [vmem:[%s12479_s9 + $0x520] sm:$0xff] }
 0xb60   : > { %9601 = vmatpush3.bf16.msra.mxu1 %v9600_v33  ;;  %v6858_v33 = vld [vmem:[%s12479_s9 + $0x3f0] sm:$0xff] }
 0xb61   : > { %9602 = vmatprep.subr.bf16.mxu1 %v10253_v0  ;;  %v9660_v35 = vpack.c.bf16 %v6859_v30, %v6858_v33  ;;  %v6898_v30 = vld [vmem:[%s12479_s9 + $0x530] sm:$0xff] }
 0xb64   : > { %9604 = vmatpush3.bf16.msra.mxu1 %v9603_v61  ;;  %v6860_v61 = vld [vmem:[%s12479_s9 + $0x400] sm:$0xff] }
 0xb65   : > { %9605 = vmatprep.subr.bf16.mxu1 %v10253_v0  ;;  %v9663_v7 = vpack.c.bf16 %v6861_v5, %v6860_v61  ;;  %v6900_v5 = vld [vmem:[%s12479_s9 + $0x540] sm:$0xff] }
 0xb68   : > { %9607 = vmatpush3.bf16.msra.mxu1 %v9606_v8  ;;  %v5512_v8 = vrot.slane %v11524_v20, 7  ;;  %v6864_v20 = vld [vmem:[%s12479_s9 + $0x420] sm:$0xff] }
 0xb69   : > { %9608 = vmatprep.subr.bf16.mxu1 %v10253_v0  ;;  %v9669_v34 = vpack.c.bf16 %v6865_v17, %v6864_v20  ;;  %v6904_v20 = vld [vmem:[%s12479_s9 + $0x560] sm:$0xff]  ;;  %v6905_v17 = vld [vmem:[%s12479_s9 + $0x568] sm:$0xff] }
 0xb6c   : > { %9610 = vmatpush3.bf16.msra.mxu1 %v9609_v16  ;;  %v9666_v16 = vpack.c.bf16 %v6863_v12, %v6862_v10  ;;  %v6902_v10 = vld [vmem:[%s12479_s9 + $0x550] sm:$0xff]  ;;  %v6903_v12 = vld [vmem:[%s12479_s9 + $0x558] sm:$0xff] }
 0xb6d   : > { %9611 = vmatprep.subr.bf16.mxu1 %v10253_v0 }
 0xb70   : > { %9613 = vmatpush3.bf16.msra.mxu1 %v9612_v21  ;;  %v6866_v21 = vld [vmem:[%s12479_s9 + $0x430] sm:$0xff] }
 0xb71   : > { %9614 = vmatprep.subr.bf16.mxu1 %v10253_v0  ;;  %v9672_v23 = vpack.c.bf16 %v6867_v37, %v6866_v21  ;;  %v6906_v21 = vld [vmem:[%s12479_s9 + $0x570] sm:$0xff]  ;;  %v6907_v37 = vld [vmem:[%s12479_s9 + $0x578] sm:$0xff] }
 0xb73   : > { %8449 = vmatmul.mubr.f32.vlgmr.msra.gmra.mrb[98].mxu1 %v5332_v25  ;;  %v6869_v25 = vld [vmem:[%s12479_s9 + $0x448] sm:$0xff] }
 0xb74   : > { %9616 = vmatpush3.bf16.msra.mxu1 %v9615_v4  ;;  %8483 = vmatprep.mubr.msk.f32.mxu1 %vm10254_vm0, %v10255_v1  ;;  %v6868_v4 = vld [vmem:[%s12479_s9 + $0x440] sm:$0xff] }
 0xb75   : > { %9617 = vmatprep.subr.bf16.mxu1 %v10253_v0  ;;  %v9675_v39 = vpack.c.bf16 %v6869_v25, %v6868_v4  ;;  %v6908_v4 = vld [vmem:[%s12479_s9 + $0x580] sm:$0xff]  ;;  %v6909_v25 = vld [vmem:[%s12479_s9 + $0x588] sm:$0xff] }
 0xb78   : > { %9619 = vmatpush3.bf16.msra.mxu1 %v9618_v44  ;;  %v6871_v44 = vld [vmem:[%s12479_s9 + $0x458] sm:$0xff] }
 0xb79   : > { %9620 = vmatprep.subr.bf16.mxu1 %v10253_v0  ;;  %v9678_v31 = vpack.c.bf16 %v6871_v44, %v6870_v28  ;;  %v5781_v28 = vrot.slane %v11998_v53, 2  ;;  %v6910_v44 = vld [vmem:[%s12479_s9 + $0x590] sm:$0xff] }
 0xb7c   : > { %9622 = vmatpush3.bf16.msra.mxu1 %v9621_v11  ;;  %v6873_v11 = vld [vmem:[%s12479_s9 + $0x468] sm:$0xff] }
 0xb7d   : > { %9623 = vmatprep.subr.bf16.mxu1 %v10253_v0  ;;  %v9681_v49 = vpack.c.bf16 %v6873_v11, %v6872_v46  ;;  %v6912_v11 = vld [vmem:[%s12479_s9 + $0x5a0] sm:$0xff] }
 0xb80   : > { %9625 = vmatpush3.bf16.msra.mxu1 %v9624_v27  ;;  %v6875_v27 = vld [vmem:[%s12479_s9 + $0x478] sm:$0xff] }
 0xb81   : > { %9626 = vmatprep.subr.bf16.mxu1 %v10253_v0  ;;  %v9684_v32 = vpack.c.bf16 %v6875_v27, %v6874_v42  ;;  %v6914_v27 = vld [vmem:[%s12479_s9 + $0x5b0] sm:$0xff] }
 0xb84   : > { %9628 = vmatpush3.bf16.msra.mxu1 %v9627_v36  ;;  %v6877_v36 = vld [vmem:[%s12479_s9 + $0x488] sm:$0xff] }
 0xb85   : > { %9629 = vmatprep.subr.bf16.mxu1 %v10253_v0  ;;  %v9687_v47 = vpack.c.bf16 %v6877_v36, %v6876_v45  ;;  %v6916_v36 = vld [vmem:[%s12479_s9 + $0x5c0] sm:$0xff] }
 0xb88   : > { %9631 = vmatpush3.bf16.msra.mxu1 %v9630_v48  ;;  %v6878_v48 = vld [vmem:[%s12479_s9 + $0x490] sm:$0xff] }
 0xb89   : > { %9632 = vmatprep.subr.bf16.mxu1 %v10253_v0  ;;  %v9690_v43 = vpack.c.bf16 %v6879_v38, %v6878_v48  ;;  %v6918_v38 = vld [vmem:[%s12479_s9 + $0x5d0] sm:$0xff] }
 0xb8c   : > { %9634 = vmatpush3.bf16.msra.mxu1 %v9633_v14  ;;  %v6881_v14 = vld [vmem:[%s12479_s9 + $0x4a8] sm:$0xff] }
 0xb8d   : > { %9635 = vmatprep.subr.bf16.mxu1 %v10253_v0  ;;  %v9693_v52 = vpack.c.bf16 %v6881_v14, %v6880_v13  ;;  %v6920_v14 = vld [vmem:[%s12479_s9 + $0x5e0] sm:$0xff] }
 0xb90   : > { %9637 = vmatpush3.bf16.msra.mxu1 %v9636_v54  ;;  %v6883_v54 = vld [vmem:[%s12479_s9 + $0x4b8] sm:$0xff] }
 0xb91   : > { %9638 = vmatprep.subr.bf16.mxu1 %v10253_v0  ;;  %v9696_v55 = vpack.c.bf16 %v6883_v54, %v6882_v18  ;;  %v6922_v54 = vld [vmem:[%s12479_s9 + $0x5f0] sm:$0xff] }
 0xb93   : > { %8484 = vmatmul.mubr.f32.vlgmr.msra.gmra.mrb[98].mxu1 %v5422_v22 }
 0xb94   : > { %9640 = vmatpush3.bf16.msra.mxu1 %v9639_v57  ;;  %8518 = vmatprep.mubr.msk.f32.mxu1 %vm10254_vm0, %v10255_v1  ;;  %v6885_v57 = vld [vmem:[%s12479_s9 + $0x4c8] sm:$0xff] }
 0xb95   : > { %9641 = vmatprep.subr.bf16.mxu1 %v10253_v0  ;;  %v9699_v22 = vpack.c.bf16 %v6885_v57, %v6884_v56  ;;  %v6924_v57 = vld [vmem:[%s12479_s9 + $0x600] sm:$0xff] }
 0xb98   : > { %9643 = vmatpush3.bf16.msra.mxu1 %v9642_v50  ;;  %v9702_v50 = vpack.c.bf16 %v6887_v58, %v6886_v41  ;;  %v5871_v58 = vrot.slane %v11998_v53, 3 }
 0xb99   : > { %9644 = vmatprep.subr.bf16.mxu1 %v10253_v0 }
 0xb9c   : > { %9646 = vmatpush3.bf16.msra.mxu1 %v9645_v62  ;;  %v9705_v62 = vpack.c.bf16 %v6889_v59, %v6888_v60  ;;  %v6927_v60 = vld [vmem:[%s12479_s9 + $0x618] sm:$0xff]  ;;  %v6305_v59 = vld [vmem:[#allocation10] sm:$0xff] }
 0xb9d   : > { %9647 = vmatprep.subr.bf16.mxu1 %v10253_v0 }
 0xba0   : > { %9649 = vmatpush3.bf16.msra.mxu1 %v9648_v2  ;;  %v9708_v2 = vpack.c.bf16 %v6891_v63, %v6890_v6  ;;  %v6307_v6 = vld [vmem:[#allocation10 + $0x10] sm:$0xff] }
 0xba1   : > { %9650 = vmatprep.subr.bf16.mxu1 %v10253_v0 }
 0xba4   : > { %9652 = vmatpush3.bf16.msra.mxu1 %v9651_v40  ;;  %v9711_v40 = vpack.c.bf16 %v6893_v24, %v6892_v15  ;;  %v6308_v15 = vld [vmem:[#allocation10 + $0x18] sm:$0xff]  ;;  %v6928_v24 = vld [vmem:[%s12479_s9 + $0x620] sm:$0xff] }
 0xba5   : > { %9653 = vmatprep.subr.bf16.mxu1 %v10253_v0 }
 0xba8   : > { %9655 = vmatpush3.bf16.msra.mxu1 %v9654_v19  ;;  %v6895_v19 = vld [vmem:[%s12479_s9 + $0x518] sm:$0xff] }
 0xba9   : > { %9656 = vmatprep.subr.bf16.mxu1 %v10253_v0  ;;  %v9714_v29 = vpack.c.bf16 %v6895_v19, %v6894_v9  ;;  %v6309_v9 = vld [vmem:[#allocation10 + $0x20] sm:$0xff]  ;;  %v6310_v19 = vld [vmem:[#allocation10 + $0x28] sm:$0xff] }
 0xbac   : > { %9658 = vmatpush3.bf16.msra.mxu1 %v9657_v26  ;;  %v6897_v26 = vld [vmem:[%s12479_s9 + $0x528] sm:$0xff] }
 0xbad   : > { %9659 = vmatprep.subr.bf16.mxu1 %v10253_v0  ;;  %v9717_v33 = vpack.c.bf16 %v6897_v26, %v6896_v3  ;;  %v6930_v3 = vld [vmem:[%s12479_s9 + $0x630] sm:$0xff]  ;;  %v6931_v26 = vld [vmem:[%s12479_s9 + $0x638] sm:$0xff] }
 0xbb0   : > { %9661 = vmatpush3.bf16.msra.mxu1 %v9660_v35  ;;  %v6899_v35 = vld [vmem:[%s12479_s9 + $0x538] sm:$0xff] }
 0xbb1   : > { %9662 = vmatprep.subr.bf16.mxu1 %v10253_v0  ;;  %v9720_v61 = vpack.c.bf16 %v6899_v35, %v6898_v30  ;;  %v6311_v30 = vld [vmem:[#allocation10 + $0x30] sm:$0xff]  ;;  %v6312_v35 = vld [vmem:[#allocation10 + $0x38] sm:$0xff] }
 0xbb3   : > { %8519 = vmatmul.mubr.f32.vlgmr.msra.gmra.mrb[98].mxu1 %v5512_v8 }
 0xbb4   : > { %9664 = vmatpush3.bf16.msra.mxu1 %v9663_v7  ;;  %8553 = vmatprep.mubr.msk.f32.mxu1 %vm10254_vm0, %v10255_v1  ;;  %v6901_v7 = vld [vmem:[%s12479_s9 + $0x548] sm:$0xff] }
 0xbb5   : > { %9665 = vmatprep.subr.bf16.mxu1 %v10253_v0  ;;  %v9723_v8 = vpack.c.bf16 %v6901_v7, %v6900_v5  ;;  %v6932_v5 = vld [vmem:[%s12479_s9 + $0x640] sm:$0xff]  ;;  %v6933_v7 = vld [vmem:[%s12479_s9 + $0x648] sm:$0xff] }
 0xbb8   : > { %9667 = vmatpush3.bf16.msra.mxu1 %v9666_v16  ;;  %v9726_v16 = vpack.c.bf16 %v6903_v12, %v6902_v10  ;;  %v6313_v10 = vld [vmem:[#allocation10 + $0x40] sm:$0xff]  ;;  %v6314_v12 = vld [vmem:[#allocation10 + $0x48] sm:$0xff] }
 0xbb9   : > { %9668 = vmatprep.subr.bf16.mxu1 %v10253_v0 }
 0xbbc   : > { %9670 = vmatpush3.bf16.msra.mxu1 %v9669_v34  ;;  %v9729_v34 = vpack.c.bf16 %v6905_v17, %v6904_v20  ;;  %v6934_v20 = vld [vmem:[%s12479_s9 + $0x650] sm:$0xff]  ;;  %v6935_v17 = vld [vmem:[%s12479_s9 + $0x658] sm:$0xff] }
 0xbbd   : > { %9671 = vmatprep.subr.bf16.mxu1 %v10253_v0 }
 0xbc0   : > { %9673 = vmatpush3.bf16.msra.mxu1 %v9672_v23  ;;  %v9732_v23 = vpack.c.bf16 %v6907_v37, %v6906_v21  ;;  %v6315_v21 = vld [vmem:[#allocation10 + $0x50] sm:$0xff]  ;;  %v6316_v37 = vld [vmem:[#allocation10 + $0x58] sm:$0xff] }
 0xbc1   : > { %9674 = vmatprep.subr.bf16.mxu1 %v10253_v0 }
 0xbc4   : > { %9676 = vmatpush3.bf16.msra.mxu1 %v9675_v39  ;;  %v9735_v39 = vpack.c.bf16 %v6909_v25, %v6908_v4  ;;  %v6936_v4 = vld [vmem:[%s12479_s9 + $0x660] sm:$0xff]  ;;  %v6937_v25 = vld [vmem:[%s12479_s9 + $0x668] sm:$0xff] }
 0xbc5   : > { %9677 = vmatprep.subr.bf16.mxu1 %v10253_v0 }
 0xbc8   : > { %9679 = vmatpush3.bf16.msra.mxu1 %v9678_v31  ;;  %v6911_v31 = vld [vmem:[%s12479_s9 + $0x598] sm:$0xff] }
 0xbc9   : > { %9680 = vmatprep.subr.bf16.mxu1 %v10253_v0  ;;  %v9738_v46 = vpack.c.bf16 %v6911_v31, %v6910_v44  ;;  %v6318_v44 = vld [vmem:[#allocation10 + $0x68] sm:$0xff]  ;;  %v9777_v31 = vpack.c.bf16 %v6937_v25, %v6936_v4 }
 0xbca   : > { %v6973_v4 = vld [vmem:[%s12479_s9 + $0x788] sm:$0xff] }
 0xbcc   : > { %9682 = vmatpush3.bf16.msra.mxu1 %v9681_v49  ;;  %v6913_v49 = vld [vmem:[%s12479_s9 + $0x5a8] sm:$0xff] }
 0xbcd   : > { %9683 = vmatprep.subr.bf16.mxu1 %v10253_v0  ;;  %v9741_v42 = vpack.c.bf16 %v6913_v49, %v6912_v11  ;;  %v6939_v11 = vld [vmem:[%s12479_s9 + $0x678] sm:$0xff] }
 0xbd0   : > { %9685 = vmatpush3.bf16.msra.mxu1 %v9684_v32  ;;  %v6915_v32 = vld [vmem:[%s12479_s9 + $0x5b8] sm:$0xff] }
 0xbd1   : > { %9686 = vmatprep.subr.bf16.mxu1 %v10253_v0  ;;  %v9744_v45 = vpack.c.bf16 %v6915_v32, %v6914_v27  ;;  %v6940_v27 = vld [vmem:[%s12479_s9 + $0x680] sm:$0xff]  ;;  %v6941_v32 = vld [vmem:[%s12479_s9 + $0x688] sm:$0xff] }
 0xbd3   : > { %8554 = vmatmul.mubr.f32.vlgmr.msra.gmra.mrb[98].mxu1 %v11998_v53 }
 0xbd4   : > { %9688 = vmatpush3.bf16.msra.mxu1 %v9687_v47  ;;  %8588 = vmatprep.mubr.msk.f32.mxu1 %vm10254_vm0, %v10255_v1  ;;  %v6917_v47 = vld [vmem:[%s12479_s9 + $0x5c8] sm:$0xff] }
 0xbd5   : > { %9689 = vmatprep.subr.bf16.mxu1 %v10253_v0  ;;  %v9747_v48 = vpack.c.bf16 %v6917_v47, %v6916_v36  ;;  %v5961_v36 = vrot.slane %v11998_v53, 4  ;;  %v6942_v47 = vld [vmem:[%s12479_s9 + $0x690] sm:$0xff] }
 0xbd8   : > { %9691 = vmatpush3.bf16.msra.mxu1 %v9690_v43  ;;  %v6919_v43 = vld [vmem:[%s12479_s9 + $0x5d8] sm:$0xff] }
 0xbd9   : > { %9692 = vmatprep.subr.bf16.mxu1 %v10253_v0  ;;  %v9750_v13 = vpack.c.bf16 %v6919_v43, %v6918_v38  ;;  %v6944_v43 = vld [vmem:[%s12479_s9 + $0x6a0] sm:$0xff] }
 0xbdc   : > { %9694 = vmatpush3.bf16.msra.mxu1 %v9693_v52  ;;  %v6921_v52 = vld [vmem:[%s12479_s9 + $0x5e8] sm:$0xff] }
 0xbdd   : > { %9695 = vmatprep.subr.bf16.mxu1 %v10253_v0  ;;  %v9753_v18 = vpack.c.bf16 %v6921_v52, %v6920_v14  ;;  %v6946_v52 = vld [vmem:[%s12479_s9 + $0x6b0] sm:$0xff] }
 0xbe0   : > { %9697 = vmatpush3.bf16.msra.mxu1 %v9696_v55  ;;  %v6923_v55 = vld [vmem:[%s12479_s9 + $0x5f8] sm:$0xff] }
 0xbe1   : > { %9698 = vmatprep.subr.bf16.mxu1 %v10253_v0  ;;  %v9756_v56 = vpack.c.bf16 %v6923_v55, %v6922_v54  ;;  %v6948_v55 = vld [vmem:[%s12479_s9 + $0x6c0] sm:$0xff] }
 0xbe4   : > { %9700 = vmatpush3.bf16.msra.mxu1 %v9699_v22  ;;  %v6925_v22 = vld [vmem:[%s12479_s9 + $0x608] sm:$0xff] }
 0xbe5   : > { %9701 = vmatprep.subr.bf16.mxu1 %v10253_v0  ;;  %v9759_v41 = vpack.c.bf16 %v6925_v22, %v6924_v57  ;;  %v6950_v22 = vld [vmem:[%s12479_s9 + $0x6d0] sm:$0xff] }
 0xbe8   : > { %9703 = vmatpush3.bf16.msra.mxu1 %v9702_v50  ;;  %v6926_v50 = vld [vmem:[%s12479_s9 + $0x610] sm:$0xff] }
 0xbe9   : > { %9704 = vmatprep.subr.bf16.mxu1 %v10253_v0  ;;  %v9762_v63 = vpack.c.bf16 %v6927_v60, %v6926_v50  ;;  %v6952_v50 = vld [vmem:[%s12479_s9 + $0x6e0] sm:$0xff]  ;;  %v6953_v60 = vld [vmem:[%s12479_s9 + $0x6e8] sm:$0xff] }
 0xbec   : > { %9706 = vmatpush3.bf16.msra.mxu1 %v9705_v62  ;;  %v6306_v62 = vld [vmem:[#allocation10 + $0x8] sm:$0xff] }
 0xbed   : > { %9707 = vmatprep.subr.bf16.mxu1 %v10253_v0 }
 0xbf0   : > { %9709 = vmatpush3.bf16.msra.mxu1 %v9708_v2  ;;  %v9855_v2 = vpack.c.bf16 %v6306_v62, %v6305_v59  ;;  %v9801_v59 = vpack.c.bf16 %v6953_v60, %v6952_v50  ;;  %v6954_v62 = vld [vmem:[%s12479_s9 + $0x6f0] sm:$0xff] }
 0xbf1   : > { %9710 = vmatprep.subr.bf16.mxu1 %v10253_v0 }
 0xbf2   : > { %9856 = vmatpush3.bf16.msra.mxu0 %v9855_v2  ;;  %v6956_v2 = vld [vmem:[%s12479_s9 + $0x700] sm:$0xff] }
 0xbf3   : > { %8589 = vmatmul.mubr.f32.vlgmr.msra.gmra.mrb[98].mxu1 %v5691_v51  ;;  %v9858_v51 = vpack.c.bf16 %v6308_v15, %v6307_v6  ;;  %9857 = vmatprep.subr.bf16.mxu0 %v10253_v0  ;;  %v6955_v6 = vld [vmem:[%s12479_s9 + $0x6f8] sm:$0xff]  ;;  %v6957_v15 = vld [vmem:[%s12479_s9 + $0x708] sm:$0xff] }
 0xbf4   : > { %9712 = vmatpush3.bf16.msra.mxu1 %v9711_v40  ;;  %8623 = vmatprep.mubr.msk.f32.mxu1 %vm10254_vm0, %v10255_v1  ;;  %v6929_v40 = vld [vmem:[%s12479_s9 + $0x628] sm:$0xff] }
 0xbf5   : > { %9713 = vmatprep.subr.bf16.mxu1 %v10253_v0 }
 0xbf6   : > { %9859 = vmatpush3.bf16.msra.mxu0 %v9858_v51  ;;  %v6958_v51 = vld [vmem:[%s12479_s9 + $0x710] sm:$0xff] }
 0xbf7   : > { %9860 = vmatprep.subr.bf16.mxu0 %v10253_v0 }
 0xbf8   : > { %9715 = vmatpush3.bf16.msra.mxu1 %v9714_v29  ;;  %v9765_v29 = vpack.c.bf16 %v6929_v40, %v6928_v24  ;;  %v9807_v24 = vpack.c.bf16 %v6957_v15, %v6956_v2  ;;  %v6051_v40 = vrot.slane %v11998_v53, 5 }
 0xbf9   : > { %9716 = vmatprep.subr.bf16.mxu1 %v10253_v0 }
 0xbfc   : > { %9718 = vmatpush3.bf16.msra.mxu1 %v9717_v33  ;;  %v9861_v33 = vpack.c.bf16 %v6310_v19, %v6309_v9  ;;  %v6959_v9 = vld [vmem:[%s12479_s9 + $0x718] sm:$0xff] }
 0xbfd   : > { %9719 = vmatprep.subr.bf16.mxu1 %v10253_v0  ;;  %v9810_v19 = vpack.c.bf16 %v6959_v9, %v6958_v51 }
 0xbfe   : > { %9862 = vmatpush3.bf16.msra.mxu0 %v9861_v33  ;;  %v6962_v33 = vld [vmem:[%s12479_s9 + $0x730] sm:$0xff] }
 0xbff   : > { %9863 = vmatprep.subr.bf16.mxu0 %v10253_v0 }
 0xc00   : > { %9721 = vmatpush3.bf16.msra.mxu1 %v9720_v61  ;;  %v9768_v61 = vpack.c.bf16 %v6931_v26, %v6930_v3  ;;  %v6961_v3 = vld [vmem:[%s12479_s9 + $0x728] sm:$0xff] }
 0xc01   : > { %9722 = vmatprep.subr.bf16.mxu1 %v10253_v0 }
 0xc04   : > { %9724 = vmatpush3.bf16.msra.mxu1 %v9723_v8  ;;  %v9864_v8 = vpack.c.bf16 %v6312_v35, %v6311_v30  ;;  %v6963_v30 = vld [vmem:[%s12479_s9 + $0x738] sm:$0xff] }
 0xc05   : > { %9725 = vmatprep.subr.bf16.mxu1 %v10253_v0  ;;  %v9816_v35 = vpack.c.bf16 %v6963_v30, %v6962_v33 }
 0xc06   : > { %9865 = vmatpush3.bf16.msra.mxu0 %v9864_v8  ;;  %v6966_v8 = vld [vmem:[%s12479_s9 + $0x750] sm:$0xff] }
 0xc07   : > { %9866 = vmatprep.subr.bf16.mxu0 %v10253_v0 }
 0xc08   : > { %9727 = vmatpush3.bf16.msra.mxu1 %v9726_v16  ;;  %v9771_v16 = vpack.c.bf16 %v6933_v7, %v6932_v5  ;;  %v6965_v5 = vld [vmem:[%s12479_s9 + $0x748] sm:$0xff] }
 0xc09   : > { %9728 = vmatprep.subr.bf16.mxu1 %v10253_v0 }
 0xc0c   : > { %9730 = vmatpush3.bf16.msra.mxu1 %v9729_v34  ;;  %v9867_v34 = vpack.c.bf16 %v6314_v12, %v6313_v10  ;;  %v6967_v10 = vld [vmem:[%s12479_s9 + $0x758] sm:$0xff] }
 0xc0d   : > { %9731 = vmatprep.subr.bf16.mxu1 %v10253_v0  ;;  %v9822_v12 = vpack.c.bf16 %v6967_v10, %v6966_v8 }
 0xc0e   : > { %9868 = vmatpush3.bf16.msra.mxu0 %v9867_v34  ;;  %v6970_v34 = vld [vmem:[%s12479_s9 + $0x770] sm:$0xff] }
 0xc0f   : > { %9869 = vmatprep.subr.bf16.mxu0 %v10253_v0 }
 0xc10   : > { %9733 = vmatpush3.bf16.msra.mxu1 %v9732_v23  ;;  %v9774_v23 = vpack.c.bf16 %v6935_v17, %v6934_v20  ;;  %v6969_v20 = vld [vmem:[%s12479_s9 + $0x768] sm:$0xff] }
 0xc11   : > { %9734 = vmatprep.subr.bf16.mxu1 %v10253_v0 }
 0xc13   : > { %8624 = vmatmul.mubr.f32.vlgmr.msra.gmra.mrb[98].mxu1 %v5781_v28  ;;  %v6317_v28 = vld [vmem:[#allocation10 + $0x60] sm:$0xff] }
 0xc14   : > { %9736 = vmatpush3.bf16.msra.mxu1 %v9735_v39  ;;  %8658 = vmatprep.mubr.msk.f32.mxu1 %vm10254_vm0, %v10255_v1  ;;  %v9870_v39 = vpack.c.bf16 %v6316_v37, %v6315_v21  ;;  %v9873_v49 = vpack.c.bf16 %v6318_v44, %v6317_v28  ;;  %v6971_v21 = vld [vmem:[%s12479_s9 + $0x778] sm:$0xff]  ;;  %v6974_v28 = vld [vmem:[%s12479_s9 + $0x790] sm:$0xff] }
 0xc15   : > { %9737 = vmatprep.subr.bf16.mxu1 %v10253_v0  ;;  %v9828_v37 = vpack.c.bf16 %v6971_v21, %v6970_v34  ;;  %v6975_v44 = vld [vmem:[%s12479_s9 + $0x798] sm:$0xff] }
 0xc16   : > { %9871 = vmatpush3.bf16.msra.mxu0 %v9870_v39  ;;  %v6141_v39 = vrot.slane %v11998_v53, 6 }
 0xc17   : > { %9872 = vmatprep.subr.bf16.mxu0 %v10253_v0 }
 0xc18   : > { %9739 = vmatpush3.bf16.msra.mxu1 %v9738_v46  ;;  %v6938_v46 = vld [vmem:[%s12479_s9 + $0x670] sm:$0xff] }
 0xc19   : > { %9740 = vmatprep.subr.bf16.mxu1 %v10253_v0 }
 0xc1a   : > { %9874 = vmatpush3.bf16.msra.mxu0 %v9873_v49 }
 0xc1b   : > { %9875 = vmatprep.subr.bf16.mxu0 %v10253_v0 }
 0xc1c   : > { %9742 = vmatpush3.bf16.msra.mxu1 %v9741_v42  ;;  %v9780_v42 = vpack.c.bf16 %v6939_v11, %v6938_v46  ;;  %v6976_v46 = vld [vmem:[%s12479_s9 + $0x7a0] sm:$0xff]  ;;  %v6977_v11 = vld [vmem:[%s12479_s9 + $0x7a8] sm:$0xff] }
 0xc1d   : > { %9743 = vmatprep.subr.bf16.mxu1 %v10253_v0  ;;  %v9837_v49 = vpack.c.bf16 %v6977_v11, %v6976_v46 }
 0xc20   : > { %9745 = vmatpush3.bf16.msra.mxu1 %v9744_v45  ;;  %v9783_v45 = vpack.c.bf16 %v6941_v32, %v6940_v27  ;;  %v6980_v32 = vld [vmem:[%s12479_s9 + $0x7c0] sm:$0xff] }
 0xc21   : > { %9746 = vmatprep.subr.bf16.mxu1 %v10253_v0 }
 0xc24   : > { %9748 = vmatpush3.bf16.msra.mxu1 %v9747_v48  ;;  %v6943_v48 = vld [vmem:[%s12479_s9 + $0x698] sm:$0xff] }
 0xc25   : > { %9749 = vmatprep.subr.bf16.mxu1 %v10253_v0  ;;  %v9786_v38 = vpack.c.bf16 %v6943_v48, %v6942_v47  ;;  %v6982_v47 = vld [vmem:[%s12479_s9 + $0x7d0] sm:$0xff]  ;;  %v6983_v48 = vld [vmem:[%s12479_s9 + $0x7d8] sm:$0xff] }
 0xc28   : > { %9751 = vmatpush3.bf16.msra.mxu1 %v9750_v13  ;;  %v6945_v13 = vld [vmem:[%s12479_s9 + $0x6a8] sm:$0xff] }
 0xc29   : > { %9752 = vmatprep.subr.bf16.mxu1 %v10253_v0  ;;  %v9789_v14 = vpack.c.bf16 %v6945_v13, %v6944_v43  ;;  %v6984_v43 = vld [vmem:[%s12479_s9 + $0x7e0] sm:$0xff]  ;;  %v6985_v13 = vld [vmem:[%s12479_s9 + $0x7e8] sm:$0xff] }
 0xc2c   : > { %9754 = vmatpush3.bf16.msra.mxu1 %v9753_v18  ;;  %v6947_v18 = vld [vmem:[%s12479_s9 + $0x6b8] sm:$0xff] }
 0xc2d   : > { %9755 = vmatprep.subr.bf16.mxu1 %v10253_v0  ;;  %v9792_v54 = vpack.c.bf16 %v6947_v18, %v6946_v52  ;;  %v6986_v52 = vld [vmem:[%s12479_s9 + $0x7f0] sm:$0xff]  ;;  %v6987_v18 = vld [vmem:[%s12479_s9 + $0x7f8] sm:$0xff] }
 0xc30   : > { %9757 = vmatpush3.bf16.msra.mxu1 %v9756_v56  ;;  %v6949_v56 = vld [vmem:[%s12479_s9 + $0x6c8] sm:$0xff] }
 0xc31   : > { %9758 = vmatprep.subr.bf16.mxu1 %v10253_v0  ;;  %v9795_v57 = vpack.c.bf16 %v6949_v56, %v6948_v55  ;;  %v6231_v55 = vrot.slane %v11998_v53, 7  ;;  %v6319_v56 = vld [vmem:[#allocation10 + $0x70] sm:$0xff] }
 0xc33   : > { %8659 = vmatmul.mubr.f32.vlgmr.msra.gmra.mrb[98].mxu1 %v5871_v58 }
 0xc34   : > { %9760 = vmatpush3.bf16.msra.mxu1 %v9759_v41  ;;  %8693 = vmatprep.mubr.msk.f32.mxu1 %vm10254_vm0, %v10255_v1  ;;  %v6951_v41 = vld [vmem:[%s12479_s9 + $0x6d8] sm:$0xff] }
 0xc35   : > { %9761 = vmatprep.subr.bf16.mxu1 %v10253_v0  ;;  %v9798_v58 = vpack.c.bf16 %v6951_v41, %v6950_v22  ;;  %v4866_v41 = vld [vmem:[%s12480_s10] sm:$0x1] }
 0xc38   : > { %9763 = vmatpush3.bf16.msra.mxu1 %v9762_v63  ;;  %v9804_v63 = vpack.c.bf16 %v6955_v6, %v6954_v62 }
 0xc39   : > { %9764 = vmatprep.subr.bf16.mxu1 %v10253_v0 }
 0xc3c   : > { %9766 = vmatpush3.bf16.msra.mxu1 %v9765_v29  ;;  %v6960_v29 = vld [vmem:[%s12479_s9 + $0x720] sm:$0xff] }
 0xc3d   : > { %9767 = vmatprep.subr.bf16.mxu1 %v10253_v0  ;;  %v9813_v26 = vpack.c.bf16 %v6961_v3, %v6960_v29 }
 0xc40   : > { %9769 = vmatpush3.bf16.msra.mxu1 %v9768_v61  ;;  %v6964_v61 = vld [vmem:[%s12479_s9 + $0x740] sm:$0xff] }
 0xc41   : > { %9770 = vmatprep.subr.bf16.mxu1 %v10253_v0  ;;  %v9819_v7 = vpack.c.bf16 %v6965_v5, %v6964_v61 }
 0xc44   : > { %9772 = vmatpush3.bf16.msra.mxu1 %v9771_v16  ;;  %v6968_v16 = vld [vmem:[%s12479_s9 + $0x760] sm:$0xff] }
 0xc45   : > { %9773 = vmatprep.subr.bf16.mxu1 %v10253_v0  ;;  %v9825_v17 = vpack.c.bf16 %v6969_v20, %v6968_v16 }
 0xc48   : > { %9775 = vmatpush3.bf16.msra.mxu1 %v9774_v23  ;;  %v6972_v23 = vld [vmem:[%s12479_s9 + $0x780] sm:$0xff] }
 0xc49   : > { %9776 = vmatprep.subr.bf16.mxu1 %v10253_v0  ;;  %v9831_v25 = vpack.c.bf16 %v6973_v4, %v6972_v23 }
 0xc4c   : > { %9778 = vmatpush3.bf16.msra.mxu1 %v9777_v31  ;;  %v9834_v31 = vpack.c.bf16 %v6975_v44, %v6974_v28 }
 0xc4d   : > { %9779 = vmatprep.subr.bf16.mxu1 %v10253_v0 }
 0xc50   : > { %9781 = vmatpush3.bf16.msra.mxu1 %v9780_v42  ;;  %v6978_v42 = vld [vmem:[%s12479_s9 + $0x7b0] sm:$0xff] }
 0xc51   : > { %9782 = vmatprep.subr.bf16.mxu1 %v10253_v0 }
 0xc53   : > { %8694 = vmatmul.mubr.f32.vlgmr.msra.gmra.mrb[98].mxu1 %v5961_v36 }
 0xc54   : > { %9784 = vmatpush3.bf16.msra.mxu1 %v9783_v45  ;;  %8728 = vmatprep.mubr.msk.f32.mxu1 %vm10254_vm0, %v10255_v1  ;;  %v6981_v45 = vld [vmem:[%s12479_s9 + $0x7c8] sm:$0xff] }
 0xc55   : > { %9785 = vmatprep.subr.bf16.mxu1 %v10253_v0  ;;  %v9843_v36 = vpack.c.bf16 %v6981_v45, %v6980_v32 }
 0xc58   : > { %9787 = vmatpush3.bf16.msra.mxu1 %v9786_v38  ;;  %v9846_v38 = vpack.c.bf16 %v6983_v48, %v6982_v47 }
 0xc59   : > { %9788 = vmatprep.subr.bf16.mxu1 %v10253_v0 }
 0xc5c   : > { %9790 = vmatpush3.bf16.msra.mxu1 %v9789_v14  ;;  %v9849_v14 = vpack.c.bf16 %v6985_v13, %v6984_v43 }
 0xc5d   : > { %9791 = vmatprep.subr.bf16.mxu1 %v10253_v0 }
 0xc60   : > { %9793 = vmatpush3.bf16.msra.mxu1 %v9792_v54  ;;  %v9852_v54 = vpack.c.bf16 %v6987_v18, %v6986_v52 }
 0xc61   : > { %9794 = vmatprep.subr.bf16.mxu1 %v10253_v0 }
 0xc64   : > { %9796 = vmatpush3.bf16.msra.mxu1 %v9795_v57  ;;  %v6320_v57 = vld [vmem:[#allocation10 + $0x78] sm:$0xff] }
 0xc65   : > { %9797 = vmatprep.subr.bf16.mxu1 %v10253_v0  ;;  %v9876_v22 = vpack.c.bf16 %v6320_v57, %v6319_v56 }
 0xc67   : > { %9877 = vmatpush3.bf16.msra.mxu0 %v9876_v22 }
 0xc68   : > { %9799 = vmatpush3.bf16.msra.mxu1 %v9798_v58 }
 0xc69   : > { %9800 = vmatprep.subr.bf16.mxu1 %v10253_v0 }
 0xc6c   : > { %9802 = vmatpush3.bf16.msra.mxu1 %v9801_v59 }
 0xc6d   : > { %9803 = vmatprep.subr.bf16.mxu1 %v10253_v0 }
 0xc70   : > { %9805 = vmatpush3.bf16.msra.mxu1 %v9804_v63 }
 0xc71   : > { %9806 = vmatprep.subr.bf16.mxu1 %v10253_v0 }
 0xc73   : > { %8729 = vmatmul.mubr.f32.vlgmr.msra.gmra.mrb[98].mxu1 %v6051_v40 }
 0xc74   : > { %9808 = vmatpush3.bf16.msra.mxu1 %v9807_v24  ;;  %8763 = vmatprep.mubr.msk.f32.mxu1 %vm10254_vm0, %v10255_v1 }
 0xc75   : > { %9809 = vmatprep.subr.bf16.mxu1 %v10253_v0 }
 0xc78   : > { %9811 = vmatpush3.bf16.msra.mxu1 %v9810_v19 }
 0xc79   : > { %9812 = vmatprep.subr.bf16.mxu1 %v10253_v0 }
 0xc7c   : > { %9814 = vmatpush3.bf16.msra.mxu1 %v9813_v26 }
 0xc7d   : > { %9815 = vmatprep.subr.bf16.mxu1 %v10253_v0 }
 0xc80   : > { %9817 = vmatpush3.bf16.msra.mxu1 %v9816_v35 }
 0xc81   : > { %9818 = vmatprep.subr.bf16.mxu1 %v10253_v0 }
 0xc84   : > { %9820 = vmatpush3.bf16.msra.mxu1 %v9819_v7 }
 0xc85   : > { %9821 = vmatprep.subr.bf16.mxu1 %v10253_v0 }
 0xc88   : > { %9823 = vmatpush3.bf16.msra.mxu1 %v9822_v12 }
 0xc89   : > { %9824 = vmatprep.subr.bf16.mxu1 %v10253_v0 }
 0xc8c   : > { %9826 = vmatpush3.bf16.msra.mxu1 %v9825_v17 }
 0xc8d   : > { %9827 = vmatprep.subr.bf16.mxu1 %v10253_v0 }
 0xc90   : > { %9829 = vmatpush3.bf16.msra.mxu1 %v9828_v37 }
 0xc91   : > { %9830 = vmatprep.subr.bf16.mxu1 %v10253_v0 }
 0xc93   : > { %8764 = vmatmul.mubr.f32.vlgmr.msra.gmra.mrb[98].mxu1 %v6141_v39 }
 0xc94   : > { %9832 = vmatpush3.bf16.msra.mxu1 %v9831_v25  ;;  %8798 = vmatprep.mubr.msk.f32.mxu1 %vm10254_vm0, %v10255_v1  ;;  %v6979_v1 = vld [vmem:[%s12479_s9 + $0x7b8] sm:$0xff] }
 0xc95   : > { %9833 = vmatprep.subr.bf16.mxu1 %v10253_v0  ;;  %v9840_v27 = vpack.c.bf16 %v6979_v1, %v6978_v42 }
 0xc98   : > { %9835 = vmatpush3.bf16.msra.mxu1 %v9834_v31 }
 0xc99   : > { %9836 = vmatprep.subr.bf16.mxu1 %v10253_v0 }
 0xc9c   : > { %9838 = vmatpush3.bf16.msra.mxu1 %v9837_v49 }
 0xc9d   : > { %9839 = vmatprep.subr.bf16.mxu1 %v10253_v0 }
 0xca0   : > { %9841 = vmatpush3.bf16.msra.mxu1 %v9840_v27 }
 0xca1   : > { %9842 = vmatprep.subr.bf16.mxu1 %v10253_v0 }
 0xca4   : > { %9844 = vmatpush3.bf16.msra.mxu1 %v9843_v36 }
 0xca5   : > { %9845 = vmatprep.subr.bf16.mxu1 %v10253_v0 }
 0xca8   : > { %9847 = vmatpush3.bf16.msra.mxu1 %v9846_v38 }
 0xca9   : > { %9848 = vmatprep.subr.bf16.mxu1 %v10253_v0 }
 0xcac   : > { %9850 = vmatpush3.bf16.msra.mxu1 %v9849_v14 }
 0xcad   : > { %9851 = vmatprep.subr.bf16.mxu1 %v10253_v0  ;;  %v6321_v0 = vld [vmem:[%s12482_s12] sm:$0x1] }
 0xcb0   : > { %9853 = vmatpush3.bf16.msra.mxu1 %v9852_v54 }
 0xcb3   : > { %8799 = vmatmul.mubr.f32.vlgmr.msra.gmra.mrb[98].mxu1 %v6231_v55 }
 0xd86   : > { %v6299_v58 = vpop.f32.mrb[98].mxu1 }
 0xd87   : > { %v9878_v50 = vadd.f32 %v6299_v58, %v4866_v41  ;;  %v8800_v60 = vpop.f32.mrb[99].mxu1 }
 0xd89   : > { %v6304_v59 = vmax.f32 %v9878_v50, 0.0 }
 0xd8b   : > { %8834 = vmatmul.mubr.f32.vlgmr.msra.gmra.mrb[224].mxu0 %v6304_v59 }
 0xe5e   : > { %v6388_v53 = vpop.f32.mrb[224].mxu0 }
 0xe5f   : > { %v6389_v62 = vadd.f32 %v6388_v53, %v6321_v0  ;;  %v8835_v6 = vpop.f32.mrb[225].mxu0 }
 0xe61   : > { %v6392_v63 = vsel %vm621_vm1, %v6389_v62, -inf }
 0xe62   : > { %6393 = vmax.xlane.f32.xlu0 %v6392_v63 }
 0xeef   : > { %v6394_v2 = vpop.xlane.xlu0 %6393 }
 0xef0   : > { %v6395_v15 = vsub.f32 %v6389_v62, %v6394_v2 }
 0xef2   : > { %v6396_v24 = vmul.f32 1.442695, %v6395_v15 }
 0xef4   : > { %10024 = vpow2.f32 %v6396_v24 }
 0xefe   : > { %v10025_v40 = vpop.eup %10024 }
 0xeff   : > { %v6398_v51 = vsel %vm621_vm1, %v10025_v40, 0.0 }
 0xf00   : > { %6399 = vadd.xlane.f32.xlu0 %v6398_v51 }
 0xf8d   : > { %v6400_v9 = vpop.xlane.xlu0 %6399 }
 0xf8e   : > { %10026 = vlog2.f32 %v6400_v9 }
 0xf98   : > { %v10027_v19 = vpop.eup %10026 }
 0xf99   : > { %v6402_v29 = vmul.f32 0.6931472, %v10027_v19 }
 0xf9b   : > { %v6403_v3 = vadd.f32 %v6402_v29, %v6394_v2 }
 0xf9d   : > { %v6404_v26 = vsub.f32 %v6389_v62, %v6403_v3 }
 0xf9f   : > { %6405 = vst [vmem:[%s505_s24] sm:$0x1] %v6404_v26 }
 0xfa0   : > { %10181 = shalt.err (!%p10178_p0)
}
 0xfa1   : > { %s10182_s18 = scalar_lea.hbm %s12428_s7, 16  ;;  %s10186_s27 = scalar_lea.hbm %s12530_s2, 32 }
 0xfa2   : > { %p10183_p10 = scmp.ne.s32.totalorder %s12428_s7, %s10182_s18  ;;  %p10187_p4 = scmp.lt.u32.totalorder %s12428_s7, %s12530_s2 }
 0xfa3   : > { %p10188_p12 = scmp.lt.u32.totalorder %s10186_s27, %s10182_s18  ;;  %p10190_p8 = scmp.lt.u32.totalorder %s10182_s18, %s12428_s7 }
 0xfa4   : > { %p10184_p2 = pnand %p10183_p10, %p12531_p11 }
 0xfa5   : > { %p10189_p7 = por %p10188_p12, %p10187_p4 }
 0xfa6   : > { %p10185_p3 = pneg %p10184_p2 }
 0xfa7   : > { %p10191_p13 = por %p10190_p8, %p10189_p7 }
 0xfa9   : > { %p10192_p1 = pnand %p10191_p13, %p10185_p3 }
 0xfab   : > { %10195 = shalt.err (!%p10192_p1)
}
 0xfac   : > { %9946 = dma.vmem_to_hbm [thread:$0]  (%p12531_p11), %s12430_s16, 16, %s12428_s7, %s6407_s30  }
 0xfad PF: > { %s12532_s20 = sld [smem:[#allocation19_spill]]  ;;  %s12533_s23 = sld [smem:[#allocation16_spill]] }
 0xfae   : > { %s12534_s24 = sld [smem:[#allocation23_spill]] }
 0xfb3   : > { %p9978_p6 = scmp.ge.s32.totalorder %s12532_s20, 2  ;;  %s6431_s14 = sand.u32 1, %s12533_s23  }
 0xfb4   : > { %p12535_p9 = scmp.ne.s32.totalorder %s12534_s24, 0  ;;  %s6432_s17 = scalar_lea.sflag [#allocation4], %s6431_s14 }
 0xfb6   : > { %p9965_p5 = pnand %p9978_p6, %p12535_p9 }
 0xfb8   : > { %10225 = dma.done.wait (!%p9965_p5), %s6432_s17, 16  }
 0xfb9   : > { %10227 = vsyncadd (!%p9965_p5), %s6432_s17, 4294967280  ;;  %s12536_s28 = sld [smem:[#allocation20_spill]]  ;;  %s12537_s25 = sld [smem:[#allocation17_spill]] }
 0xfba   : > { %s12538_s26 = sld [smem:[#allocation18_spill]]  ;;  %s12539_s27 = sld [smem:[#allocation21_spill]] }
 0xfbf   : > { %p26_p0 = scmp.ge.s32.totalorder %s12536_s28, 4  }
 0xfc1   :  { %28 = sbr.rel (!%p26_p0) target bundleno = 10 (0xa), region = 175 }
 0xfc8   :  { %6436 = vsyncpa [#allocation3], 1 }
 0xfc9   :  { %6438 = vsyncpa [#allocation3 + $0x1], 1 }
 0xfca   :  { %6439 = vsyncpa [#allocation6], 1 }
 0xfcb   :  { %6440 = vsyncpa [#allocation9], 1 }
 0xfcc   :  { %6441 = vsyncpa [#allocation4], 1 }
 0xfcd   :  { %6443 = vsyncpa [#allocation4 + $0x1], 1 }

</bundles_post_ra>
